<compile_context>
chip_gen: v7x
topology: tpu7x:2x2x1
jax: 0.10.0
libtpu: 0.0.40
codegen_flags: <defaults>
</compile_context>

<pallas_src>
import math

import numpy as np
import jax
import jax.numpy as jnp
from jax.experimental import pallas as pl
from jax.experimental.pallas import tpu as pltpu

# ---------------- scaled-down generator configuration ----------------
STYLE_DIM = 64                  # (orig 512)
SIZE = 16                       # output resolution (orig 1024)
CH = 32                         # channels at every resolution
N_LATENT = 6                    # W+ latents (orig 18)
MAX_HW = SIZE * SIZE

LRELU_SLOPE = 0.2
LRELU_SCALE = math.sqrt(2.0)    # FusedLeakyReLU scale

CONV_LAYERS = ("conv1", "conv_up8", "conv8", "conv_up16", "conv16")
RGB_LAYERS = ("to_rgb1", "to_rgb8", "to_rgb16")
STYLE_LAYERS = ("conv1", "to_rgb1", "conv_up8", "conv8", "to_rgb8",
                "conv_up16", "conv16", "to_rgb16")
STYLE_OFFSET = {n: i * CH for i, n in enumerate(STYLE_LAYERS)}
LATENT_IDX = {"conv1": 0, "to_rgb1": 1, "conv_up8": 1, "conv8": 2,
              "to_rgb8": 3, "conv_up16": 3, "conv16": 4, "to_rgb16": 5}
CONV_RES = {"conv1": 4, "conv_up8": 8, "conv8": 8, "conv_up16": 16, "conv16": 16}

CONV_SCALE = 1.0 / math.sqrt(CH * 9)     # modulated 3x3 conv weight scale
RGB_SCALE = 1.0 / math.sqrt(CH)          # modulated 1x1 conv weight scale
STYLE_SCALE = 1.0 / math.sqrt(STYLE_DIM)

PACK_KEYS = ("mod_w", "mod_b", "const", "conv_w", "conv_wsq", "conv_b", "noise",
             "rgb_w", "rgb_b", "up8", "up16", "m4", "m8", "m16")


# --------------------------- the fused Pallas kernel ---------------------------
def _generator_kernel(wx_ref, mod_w_ref, mod_b_ref, const_ref,
                      conv_w_ref, conv_wsq_ref, conv_b_ref, noise_ref,
                      rgb_w_ref, rgb_b_ref, up8_ref, up16_ref,
                      m4_ref, m8_ref, m16_ref,
                      ix_ref, fx_ref):
    """One grid step == full generator forward for one sample (grid axis = batch)."""
    bf = jnp.bfloat16
    f32 = jnp.float32

    # --- all 8 EqualLinear style projections for this sample: one MXU matmul ---
    # (STYLE_SCALE folded into mod_w at pack time; bias_init=1 in mod_b.)
    s_all = (jnp.dot(mod_w_ref[...], wx_ref[0].astype(bf),
                     preferred_element_type=f32)
             + mod_b_ref[...])                                   # [8*CH, N_LATENT]

    def style(name):                                             # [CH, 1]
        off = STYLE_OFFSET[name]
        lat = LATENT_IDX[name]
        return s_all[off:off + CH, lat:lat + 1]

    # --- demod factors (CONV_SCALE^2 folded into conv_wsq at pack time) ---
    demod = {}
    for li, name in enumerate(CONV_LAYERS):
        s = style(name)
        demod[name] = jax.lax.rsqrt(
            jnp.dot(conv_wsq_ref[li], s * s, preferred_element_type=f32) + 1e-8)

    masks = {4: m4_ref[...], 8: m8_ref[...], 16: m16_ref[...]}   # [2, hw] each

    def shift_lanes(x, d, hw):
        # out[:, p] = x[:, p + d], zero-filled outside [0, hw).
        if d == 0:
            return x
        z = jnp.zeros((CH, abs(d)), x.dtype)
        if d > 0:
            return jnp.concatenate([x[:, d:], z], axis=1)
        return jnp.concatenate([z, x[:, :hw + d]], axis=1)

    def styled_conv(x, name):
        """Modulated 3x3 conv + noise + bias + fused leaky-ReLU.  x: [CH, hw] f32."""
        li = CONV_LAYERS.index(name)
        res = CONV_RES[name]
        hw = res * res
        mask = masks[res]
        xm = x * style(name)                                     # modulate input chans
        # im2col via static lane shifts -> one stacked-K (9*CH) MXU matmul.
        parts = []
        for t in range(9):
            oy, ox = t // 3 - 1, t % 3 - 1
            sh = shift_lanes(xm, oy * res + ox, hw)
            if ox == -1:                                         # zero row-wrapped cols
                sh = sh * mask[0:1, :]
            elif ox == 1:
                sh = sh * mask[1:2, :]
            parts.append(sh.astype(bf))                          # single bf16 round
        slab = jnp.concatenate(parts, axis=0)                    # [9*CH, hw] bf16
        y = jnp.dot(conv_w_ref[li], slab, preferred_element_type=f32)
        y = y * demod[name]                                      # demodulate out chans
        z = y + noise_ref[li][:, :hw] + conv_b_ref[li]
        return z * jnp.where(z >= 0.0, LRELU_SCALE, LRELU_SLOPE * LRELU_SCALE)

    def to_rgb(x, name, skip=None):
        """Modulated 1x1 conv (no demod, RGB_SCALE folded) + bias (+ skip)."""
        ri = RGB_LAYERS.index(name)
        y = jnp.dot(rgb_w_ref[ri], (x * style(name)).astype(bf),
                    preferred_element_type=f32) + rgb_b_ref[ri]
        return y if skip is None else y + skip

    def upsample(x, up_ref):
        # TODO(synk): StyleGAN2 uses transposed modulated conv + upfirdn2d [1,3,3,1]
        # blur; approximated with a nearest-neighbour 2x upsample (tiny 0/1 matmul).
        return jnp.dot(x.astype(bf), up_ref[...], preferred_element_type=f32)

    out = styled_conv(const_ref[...], "conv1")                   # 4x4
    skip = to_rgb(out, "to_rgb1")

    out = styled_conv(upsample(out, up8_ref), "conv_up8")        # 8x8
    out = styled_conv(out, "conv8")
    skip = to_rgb(out, "to_rgb8", upsample(skip, up8_ref))
    fx_ref[0] = out                                              # HFGI warp/refine feature

    out = styled_conv(upsample(out, up16_ref), "conv_up16")      # 16x16
    out = styled_conv(out, "conv16")
    ix_ref[0] = to_rgb(out, "to_rgb16", upsample(skip, up16_ref))


# ------------------------ host-side constant matrices ------------------------
def _nn_upsample_matrix(h, w):
    """0/1 matrix U so that x[C, h*w] @ U == nearest-neighbour 2x upsample."""
    m = np.zeros((h * w, 4 * h * w), np.float32)
    for oh in range(2 * h):
        for ow in range(2 * w):
            m[(oh // 2) * w + (ow // 2), oh * (2 * w) + ow] = 1.0
    return m


def _border_masks(res):
    """[2, res*res] masks: row 0 valid for ox=-1 (pw>=1), row 1 valid for ox=+1."""
    pw = np.arange(res * res) % res
    left = (pw >= 1).astype(np.float32)
    right = (pw <= res - 2).astype(np.float32)
    return np.stack([left, right])


# ---------------------- parameter init / packing for the kernel ----------------------
def init_params(key):
    keys = iter(jax.random.split(key, 64))

    def randn(shape):
        return jax.random.normal(next(keys), shape, jnp.float32)

    def styled_conv_params():
        return dict(
            weight=randn((CH, CH, 3, 3)),
            mod_w=randn((CH, STYLE_DIM)),           # EqualLinear weight [out=CH, in=STYLE_DIM]
            mod_b=jnp.ones((CH,), jnp.float32),     # bias_init = 1
            bias=jnp.zeros((CH,), jnp.float32),     # FusedLeakyReLU bias
            noise_strength=0.1 * randn(()),         # nonzero so the noise path is exercised
        )

    def to_rgb_params():
        return dict(
            weight=randn((3, CH, 1, 1)),
            mod_w=randn((CH, STYLE_DIM)),
            mod_b=jnp.ones((CH,), jnp.float32),
            bias=jnp.zeros((3,), jnp.float32),
        )

    return dict(
        const=randn((1, CH, 4, 4)),
        convs={n: styled_conv_params() for n in CONV_LAYERS},
        rgbs={n: to_rgb_params() for n in RGB_LAYERS},
        noises={n: randn((1, 1, CONV_RES[n], CONV_RES[n])) for n in CONV_LAYERS},
    )


def prepare_params(params):
    """One-time packing into the stacked / scale-folded / bf16 layouts the kernel uses."""
    bf = jnp.bfloat16

    def sp(name):
        return params["convs"][name] if name in CONV_LAYERS else params["rgbs"][name]

    # STYLE_SCALE folded into the stacked EqualLinear weight.
    mod_w = (STYLE_SCALE
             * jnp.concatenate([sp(n)["mod_w"] for n in STYLE_LAYERS], axis=0)).astype(bf)
    mod_b = jnp.concatenate([sp(n)["mod_b"] for n in STYLE_LAYERS], axis=0).reshape(-1, 1)
    const = params["const"].reshape(CH, 16)

    # conv weights packed tap-major along K: [layer, oc, 9*ic]; CONV_SCALE folded in.
    conv_w = jnp.stack(
        [jnp.transpose(params["convs"][n]["weight"], (0, 2, 3, 1)).reshape(CH, 9 * CH)
         for n in CONV_LAYERS])
    conv_w = (CONV_SCALE * conv_w).astype(bf)
    # wsq[o, i] = CONV_SCALE^2 * sum_taps w[o, i, :, :]^2  (f32, demod factor)
    conv_wsq = (CONV_SCALE ** 2) * jnp.stack(
        [jnp.sum(params["convs"][n]["weight"] ** 2, axis=(2, 3)) for n in CONV_LAYERS])
    conv_b = jnp.stack(
        [params["convs"][n]["bias"] for n in CONV_LAYERS]).reshape(-1, CH, 1)

    noise = jnp.zeros((len(CONV_LAYERS), 1, MAX_HW), jnp.float32)
    for i, n in enumerate(CONV_LAYERS):
        hw = CONV_RES[n] ** 2
        nz = (params["convs"][n]["noise_strength"] * params["noises"][n]).reshape(1, hw)
        noise = noise.at[i, :, :hw].set(nz)

    rgb_w = (RGB_SCALE * jnp.stack(
        [params["rgbs"][n]["weight"].reshape(3, CH) for n in RGB_LAYERS])).astype(bf)
    rgb_b = jnp.stack(
        [params["rgbs"][n]["bias"] for n in RGB_LAYERS]).reshape(-1, 3, 1)

    return dict(
        mod_w=mod_w, mod_b=mod_b, const=const,
        conv_w=conv_w, conv_wsq=conv_wsq, conv_b=conv_b, noise=noise,
        rgb_w=rgb_w, rgb_b=rgb_b,
        up8=jnp.asarray(_nn_upsample_matrix(4, 4), dtype=bf),
        up16=jnp.asarray(_nn_upsample_matrix(8, 8), dtype=bf),
        m4=jnp.asarray(_border_masks(4)),
        m8=jnp.asarray(_border_masks(8)),
        m16=jnp.asarray(_border_masks(16)),
    )


# -------------------------------- forward wrappers --------------------------------
@jax.jit
def _stylegan_pallas(packed, wx):
    B = wx.shape[0]
    wx_t = jnp.transpose(wx, (0, 2, 1))          # [B, STYLE_DIM, N_LATENT]

    def full_spec(arr):
        zeros = (0,) * arr.ndim                  # constant index_map -> VMEM-resident
        return pl.BlockSpec(arr.shape, lambda b, _z=zeros: _z)

    in_specs = ([pl.BlockSpec((1, STYLE_DIM, N_LATENT), lambda b: (b, 0, 0))]
                + [full_spec(packed[k]) for k in PACK_KEYS])
    out_specs = (pl.BlockSpec((1, 3, MAX_HW), lambda b: (b, 0, 0)),
                 pl.BlockSpec((1, CH, 64), lambda b: (b, 0, 0)))
    out_shape = (jax.ShapeDtypeStruct((B, 3, MAX_HW), jnp.float32),
                 jax.ShapeDtypeStruct((B, CH, 64), jnp.float32))

    ix_flat, fx_flat = pl.pallas_call(
        _generator_kernel,
        grid=(B,),
        out_shape=out_shape,
        in_specs=in_specs,
        out_specs=out_specs,
        compiler_params=pltpu.CompilerParams(dimension_semantics=("parallel",)),
    )(wx_t, *[packed[k] for k in PACK_KEYS])
    return ix_flat.reshape(B, 3, SIZE, SIZE), fx_flat.reshape(B, CH, 8, 8)


def hfgi_forward(packed, wx, inversion_condition=None, refining_condition=None,
                 warping_condition=None, f_condition=None):
    # TODO(synk): HFGI conditioning branches (inversion/refining/warping/f_condition)
    # and the submodules unused in forward (e4e encoder, aligner, residual encoder,
    # latent editor, loss builder) are not translated; only the default (all-None)
    # StyleGAN decode path runs.
    assert inversion_condition is None and refining_condition is None
    assert warping_condition is None and f_condition is None
    ix, fx = _stylegan_pallas(packed, wx)
    return ix, wx, fx


if __name__ == "__main__":
    key = jax.random.PRNGKey(0)
    pkey, wkey = jax.random.split(key)
    params = init_params(pkey)
    packed = prepare_params(params)

    B = 2
    wx = jax.random.normal(wkey, (B, N_LATENT, STYLE_DIM), jnp.float32)

    ix, wx_out, fx = hfgi_forward(packed, wx)
    jax.block_until_ready((ix, wx_out, fx))

    assert ix.shape == (B, 3, SIZE, SIZE)
    assert wx_out.shape == (B, N_LATENT, STYLE_DIM)
    assert fx.shape == (B, CH, 8, 8)
    assert bool(jnp.all(jnp.isfinite(ix))) and bool(jnp.all(jnp.isfinite(fx)))
    print("KERNEL_OK")
</pallas_src>

<mosaic_0001>
module attributes {stable_mosaic.version = 11 : i64} {
  func.func @_generator_kernel(%arg0: i32, %arg1: memref<1x64x6xf32, #tpu.memory_space<vmem>>, %arg2: memref<256x64xbf16, #tpu.memory_space<vmem>>, %arg3: memref<256x1xf32, #tpu.memory_space<vmem>>, %arg4: memref<32x16xf32, #tpu.memory_space<vmem>>, %arg5: memref<5x32x288xbf16, #tpu.memory_space<vmem>>, %arg6: memref<5x32x32xf32, #tpu.memory_space<vmem>>, %arg7: memref<5x32x1xf32, #tpu.memory_space<vmem>>, %arg8: memref<5x1x256xf32, #tpu.memory_space<vmem>>, %arg9: memref<3x3x32xbf16, #tpu.memory_space<vmem>>, %arg10: memref<3x3x1xf32, #tpu.memory_space<vmem>>, %arg11: memref<16x64xbf16, #tpu.memory_space<vmem>>, %arg12: memref<64x256xbf16, #tpu.memory_space<vmem>>, %arg13: memref<2x16xf32, #tpu.memory_space<vmem>>, %arg14: memref<2x64xf32, #tpu.memory_space<vmem>>, %arg15: memref<2x256xf32, #tpu.memory_space<vmem>>, %arg16: memref<1x3x256xf32, #tpu.memory_space<vmem>>, %arg17: memref<1x32x64xf32, #tpu.memory_space<vmem>>) attributes {dimension_semantics = [#tpu.dimension_semantics<parallel>], iteration_bounds = array<i64: 2>, scalar_prefetch = 0 : i64, scratch_operands = 0 : i64, tpu.core_type = #tpu.core_type<tc>, window_params = [{transform_indices = @transform_0, window_bounds = array<i64: 1, 64, 6>}, {pipeline_mode = #tpu.pipeline_mode<synchronous>, transform_indices = @transform_1, window_bounds = array<i64: 256, 64>}, {pipeline_mode = #tpu.pipeline_mode<synchronous>, transform_indices = @transform_2, window_bounds = array<i64: 256, 1>}, {pipeline_mode = #tpu.pipeline_mode<synchronous>, transform_indices = @transform_3, window_bounds = array<i64: 32, 16>}, {pipeline_mode = #tpu.pipeline_mode<synchronous>, transform_indices = @transform_4, window_bounds = array<i64: 5, 32, 288>}, {pipeline_mode = #tpu.pipeline_mode<synchronous>, transform_indices = @transform_5, window_bounds = array<i64: 5, 32, 32>}, {pipeline_mode = #tpu.pipeline_mode<synchronous>, transform_indices = @transform_6, window_bounds = array<i64: 5, 32, 1>}, {pipeline_mode = #tpu.pipeline_mode<synchronous>, transform_indices = @transform_7, window_bounds = array<i64: 5, 1, 256>}, {pipeline_mode = #tpu.pipeline_mode<synchronous>, transform_indices = @transform_8, window_bounds = array<i64: 3, 3, 32>}, {pipeline_mode = #tpu.pipeline_mode<synchronous>, transform_indices = @transform_9, window_bounds = array<i64: 3, 3, 1>}, {pipeline_mode = #tpu.pipeline_mode<synchronous>, transform_indices = @transform_10, window_bounds = array<i64: 16, 64>}, {pipeline_mode = #tpu.pipeline_mode<synchronous>, transform_indices = @transform_11, window_bounds = array<i64: 64, 256>}, {pipeline_mode = #tpu.pipeline_mode<synchronous>, transform_indices = @transform_12, window_bounds = array<i64: 2, 16>}, {pipeline_mode = #tpu.pipeline_mode<synchronous>, transform_indices = @transform_13, window_bounds = array<i64: 2, 64>}, {pipeline_mode = #tpu.pipeline_mode<synchronous>, transform_indices = @transform_14, window_bounds = array<i64: 2, 256>}, {transform_indices = @transform_15, window_bounds = array<i64: 1, 3, 256>}, {transform_indices = @transform_16, window_bounds = array<i64: 1, 32, 64>}]} {
    %c0 = arith.constant 0 : index
    %c0_0 = arith.constant 0 : index
    %0 = vector.load %arg2[%c0, %c0_0] : memref<256x64xbf16, #tpu.memory_space<vmem>>, vector<256x64xbf16>
    %c0_1 = arith.constant 0 : index
    %c0_2 = arith.constant 0 : index
    %c0_3 = arith.constant 0 : index
    %1 = vector.load %arg1[%c0_1, %c0_2, %c0_3] : memref<1x64x6xf32, #tpu.memory_space<vmem>>, vector<1x64x6xf32>
    %2 = vector.shape_cast %1 : vector<1x64x6xf32> to vector<64x6xf32>
    %3 = arith.truncf %2 : vector<64x6xf32> to vector<64x6xbf16>
    %cst = arith.constant dense<0.000000e+00> : vector<256x6xf32>
    %4 = tpu.matmul %0, %3, %cst {dimension_numbers = #tpu.dot_dimension_numbers<[1], [0], [0], [1], [0, 0, 1, 1], [], []>} : vector<256x64xbf16>, vector<64x6xbf16>, vector<256x6xf32> -> vector<256x6xf32>
    %c0_4 = arith.constant 0 : index
    %c0_5 = arith.constant 0 : index
    %5 = vector.load %arg3[%c0_4, %c0_5] : memref<256x1xf32, #tpu.memory_space<vmem>>, vector<256x1xf32>
    %6 = vector.broadcast %5 : vector<256x1xf32> to vector<256x6xf32>
    %7 = arith.addf %4, %6 : vector<256x6xf32>
    %8 = vector.extract_strided_slice %7 {offsets = [0, 0], sizes = [32, 1], strides = [1, 1]} : vector<256x6xf32> to vector<32x1xf32>
    %c0_6 = arith.constant 0 : index
    %c0_7 = arith.constant 0 : index
    %c0_8 = arith.constant 0 : index
    %9 = vector.load %arg6[%c0_6, %c0_7, %c0_8] : memref<5x32x32xf32, #tpu.memory_space<vmem>>, vector<1x32x32xf32>
    %10 = vector.shape_cast %9 : vector<1x32x32xf32> to vector<32x32xf32>
    %11 = arith.mulf %8, %8 : vector<32x1xf32>
    %cst_9 = arith.constant dense<0.000000e+00> : vector<32x1xf32>
    %12 = tpu.matmul %10, %11, %cst_9 {dimension_numbers = #tpu.dot_dimension_numbers<[1], [0], [0], [1], [0, 0, 1, 1], [], []>} : vector<32x32xf32>, vector<32x1xf32>, vector<32x1xf32> -> vector<32x1xf32>
    %cst_10 = arith.constant 9.99999993E-9 : f32
    %13 = vector.broadcast %cst_10 : f32 to vector<32x1xf32>
    %14 = arith.addf %12, %13 : vector<32x1xf32>
    %15 = math.rsqrt %14 : vector<32x1xf32>
    %16 = vector.extract_strided_slice %7 {offsets = [64, 1], sizes = [32, 1], strides = [1, 1]} : vector<256x6xf32> to vector<32x1xf32>
    %c1 = arith.constant 1 : index
    %c0_11 = arith.constant 0 : index
    %c0_12 = arith.constant 0 : index
    %17 = vector.load %arg6[%c1, %c0_11, %c0_12] : memref<5x32x32xf32, #tpu.memory_space<vmem>>, vector<1x32x32xf32>
    %18 = vector.shape_cast %17 : vector<1x32x32xf32> to vector<32x32xf32>
    %19 = arith.mulf %16, %16 : vector<32x1xf32>
    %cst_13 = arith.constant dense<0.000000e+00> : vector<32x1xf32>
    %20 = tpu.matmul %18, %19, %cst_13 {dimension_numbers = #tpu.dot_dimension_numbers<[1], [0], [0], [1], [0, 0, 1, 1], [], []>} : vector<32x32xf32>, vector<32x1xf32>, vector<32x1xf32> -> vector<32x1xf32>
    %cst_14 = arith.constant 9.99999993E-9 : f32
    %21 = vector.broadcast %cst_14 : f32 to vector<32x1xf32>
    %22 = arith.addf %20, %21 : vector<32x1xf32>
    %23 = math.rsqrt %22 : vector<32x1xf32>
    %24 = vector.extract_strided_slice %7 {offsets = [96, 2], sizes = [32, 1], strides = [1, 1]} : vector<256x6xf32> to vector<32x1xf32>
    %c2 = arith.constant 2 : index
    %c0_15 = arith.constant 0 : index
    %c0_16 = arith.constant 0 : index
    %25 = vector.load %arg6[%c2, %c0_15, %c0_16] : memref<5x32x32xf32, #tpu.memory_space<vmem>>, vector<1x32x32xf32>
    %26 = vector.shape_cast %25 : vector<1x32x32xf32> to vector<32x32xf32>
    %27 = arith.mulf %24, %24 : vector<32x1xf32>
    %cst_17 = arith.constant dense<0.000000e+00> : vector<32x1xf32>
    %28 = tpu.matmul %26, %27, %cst_17 {dimension_numbers = #tpu.dot_dimension_numbers<[1], [0], [0], [1], [0, 0, 1, 1], [], []>} : vector<32x32xf32>, vector<32x1xf32>, vector<32x1xf32> -> vector<32x1xf32>
    %cst_18 = arith.constant 9.99999993E-9 : f32
    %29 = vector.broadcast %cst_18 : f32 to vector<32x1xf32>
    %30 = arith.addf %28, %29 : vector<32x1xf32>
    %31 = math.rsqrt %30 : vector<32x1xf32>
    %32 = vector.extract_strided_slice %7 {offsets = [160, 3], sizes = [32, 1], strides = [1, 1]} : vector<256x6xf32> to vector<32x1xf32>
    %c3 = arith.constant 3 : index
    %c0_19 = arith.constant 0 : index
    %c0_20 = arith.constant 0 : index
    %33 = vector.load %arg6[%c3, %c0_19, %c0_20] : memref<5x32x32xf32, #tpu.memory_space<vmem>>, vector<1x32x32xf32>
    %34 = vector.shape_cast %33 : vector<1x32x32xf32> to vector<32x32xf32>
    %35 = arith.mulf %32, %32 : vector<32x1xf32>
    %cst_21 = arith.constant dense<0.000000e+00> : vector<32x1xf32>
    %36 = tpu.matmul %34, %35, %cst_21 {dimension_numbers = #tpu.dot_dimension_numbers<[1], [0], [0], [1], [0, 0, 1, 1], [], []>} : vector<32x32xf32>, vector<32x1xf32>, vector<32x1xf32> -> vector<32x1xf32>
    %cst_22 = arith.constant 9.99999993E-9 : f32
    %37 = vector.broadcast %cst_22 : f32 to vector<32x1xf32>
    %38 = arith.addf %36, %37 : vector<32x1xf32>
    %39 = math.rsqrt %38 : vector<32x1xf32>
    %40 = vector.extract_strided_slice %7 {offsets = [192, 4], sizes = [32, 1], strides = [1, 1]} : vector<256x6xf32> to vector<32x1xf32>
    %c4 = arith.constant 4 : index
    %c0_23 = arith.constant 0 : index
    %c0_24 = arith.constant 0 : index
    %41 = vector.load %arg6[%c4, %c0_23, %c0_24] : memref<5x32x32xf32, #tpu.memory_space<vmem>>, vector<1x32x32xf32>
    %42 = vector.shape_cast %41 : vector<1x32x32xf32> to vector<32x32xf32>
    %43 = arith.mulf %40, %40 : vector<32x1xf32>
    %cst_25 = arith.constant dense<0.000000e+00> : vector<32x1xf32>
    %44 = tpu.matmul %42, %43, %cst_25 {dimension_numbers = #tpu.dot_dimension_numbers<[1], [0], [0], [1], [0, 0, 1, 1], [], []>} : vector<32x32xf32>, vector<32x1xf32>, vector<32x1xf32> -> vector<32x1xf32>
    %cst_26 = arith.constant 9.99999993E-9 : f32
    %45 = vector.broadcast %cst_26 : f32 to vector<32x1xf32>
    %46 = arith.addf %44, %45 : vector<32x1xf32>
    %47 = math.rsqrt %46 : vector<32x1xf32>
    %c0_27 = arith.constant 0 : index
    %c0_28 = arith.constant 0 : index
    %48 = vector.load %arg13[%c0_27, %c0_28] : memref<2x16xf32, #tpu.memory_space<vmem>>, vector<2x16xf32>
    %c0_29 = arith.constant 0 : index
    %c0_30 = arith.constant 0 : index
    %49 = vector.load %arg14[%c0_29, %c0_30] : memref<2x64xf32, #tpu.memory_space<vmem>>, vector<2x64xf32>
    %c0_31 = arith.constant 0 : index
    %c0_32 = arith.constant 0 : index
    %50 = vector.load %arg15[%c0_31, %c0_32] : memref<2x256xf32, #tpu.memory_space<vmem>>, vector<2x256xf32>
    %c0_33 = arith.constant 0 : index
    %c0_34 = arith.constant 0 : index
    %51 = vector.load %arg4[%c0_33, %c0_34] : memref<32x16xf32, #tpu.memory_space<vmem>>, vector<32x16xf32>
    %52 = vector.extract_strided_slice %7 {offsets = [0, 0], sizes = [32, 1], strides = [1, 1]} : vector<256x6xf32> to vector<32x1xf32>
    %53 = vector.broadcast %52 : vector<32x1xf32> to vector<32x16xf32>
    %54 = arith.mulf %51, %53 : vector<32x16xf32>
    %cst_35 = arith.constant 0.000000e+00 : f32
    %55 = vector.broadcast %cst_35 : f32 to vector<32x5xf32>
    %56 = vector.extract_strided_slice %54 {offsets = [0, 0], sizes = [32, 11], strides = [1, 1]} : vector<32x16xf32> to vector<32x11xf32>
    %57 = tpu.concatenate %55, %56 in 1 : vector<32x5xf32>, vector<32x11xf32> -> vector<32x16xf32>
    %58 = vector.extract_strided_slice %48 {offsets = [0, 0], sizes = [1, 16], strides = [1, 1]} : vector<2x16xf32> to vector<1x16xf32>
    %59 = vector.broadcast %58 : vector<1x16xf32> to vector<32x16xf32>
    %60 = arith.mulf %57, %59 : vector<32x16xf32>
    %61 = arith.truncf %60 : vector<32x16xf32> to vector<32x16xbf16>
    %cst_36 = arith.constant 0.000000e+00 : f32
    %62 = vector.broadcast %cst_36 : f32 to vector<32x4xf32>
    %63 = vector.extract_strided_slice %54 {offsets = [0, 0], sizes = [32, 12], strides = [1, 1]} : vector<32x16xf32> to vector<32x12xf32>
    %64 = tpu.concatenate %62, %63 in 1 : vector<32x4xf32>, vector<32x12xf32> -> vector<32x16xf32>
    %65 = arith.truncf %64 : vector<32x16xf32> to vector<32x16xbf16>
    %cst_37 = arith.constant 0.000000e+00 : f32
    %66 = vector.broadcast %cst_37 : f32 to vector<32x3xf32>
    %67 = vector.extract_strided_slice %54 {offsets = [0, 0], sizes = [32, 13], strides = [1, 1]} : vector<32x16xf32> to vector<32x13xf32>
    %68 = tpu.concatenate %66, %67 in 1 : vector<32x3xf32>, vector<32x13xf32> -> vector<32x16xf32>
    %69 = vector.extract_strided_slice %48 {offsets = [1, 0], sizes = [1, 16], strides = [1, 1]} : vector<2x16xf32> to vector<1x16xf32>
    %70 = vector.broadcast %69 : vector<1x16xf32> to vector<32x16xf32>
    %71 = arith.mulf %68, %70 : vector<32x16xf32>
    %72 = arith.truncf %71 : vector<32x16xf32> to vector<32x16xbf16>
    %cst_38 = arith.constant 0.000000e+00 : f32
    %73 = vector.broadcast %cst_38 : f32 to vector<32x1xf32>
    %74 = vector.extract_strided_slice %54 {offsets = [0, 0], sizes = [32, 15], strides = [1, 1]} : vector<32x16xf32> to vector<32x15xf32>
    %75 = tpu.concatenate %73, %74 in 1 : vector<32x1xf32>, vector<32x15xf32> -> vector<32x16xf32>
    %76 = vector.extract_strided_slice %48 {offsets = [0, 0], sizes = [1, 16], strides = [1, 1]} : vector<2x16xf32> to vector<1x16xf32>
    %77 = vector.broadcast %76 : vector<1x16xf32> to vector<32x16xf32>
    %78 = arith.mulf %75, %77 : vector<32x16xf32>
    %79 = arith.truncf %78 : vector<32x16xf32> to vector<32x16xbf16>
    %80 = arith.truncf %54 : vector<32x16xf32> to vector<32x16xbf16>
    %cst_39 = arith.constant 0.000000e+00 : f32
    %81 = vector.broadcast %cst_39 : f32 to vector<32x1xf32>
    %82 = vector.extract_strided_slice %54 {offsets = [0, 1], sizes = [32, 15], strides = [1, 1]} : vector<32x16xf32> to vector<32x15xf32>
    %83 = tpu.concatenate %82, %81 in 1 : vector<32x15xf32>, vector<32x1xf32> -> vector<32x16xf32>
    %84 = vector.extract_strided_slice %48 {offsets = [1, 0], sizes = [1, 16], strides = [1, 1]} : vector<2x16xf32> to vector<1x16xf32>
    %85 = vector.broadcast %84 : vector<1x16xf32> to vector<32x16xf32>
    %86 = arith.mulf %83, %85 : vector<32x16xf32>
    %87 = arith.truncf %86 : vector<32x16xf32> to vector<32x16xbf16>
    %cst_40 = arith.constant 0.000000e+00 : f32
    %88 = vector.broadcast %cst_40 : f32 to vector<32x3xf32>
    %89 = vector.extract_strided_slice %54 {offsets = [0, 3], sizes = [32, 13], strides = [1, 1]} : vector<32x16xf32> to vector<32x13xf32>
    %90 = tpu.concatenate %89, %88 in 1 : vector<32x13xf32>, vector<32x3xf32> -> vector<32x16xf32>
    %91 = vector.extract_strided_slice %48 {offsets = [0, 0], sizes = [1, 16], strides = [1, 1]} : vector<2x16xf32> to vector<1x16xf32>
    %92 = vector.broadcast %91 : vector<1x16xf32> to vector<32x16xf32>
    %93 = arith.mulf %90, %92 : vector<32x16xf32>
    %94 = arith.truncf %93 : vector<32x16xf32> to vector<32x16xbf16>
    %cst_41 = arith.constant 0.000000e+00 : f32
    %95 = vector.broadcast %cst_41 : f32 to vector<32x4xf32>
    %96 = vector.extract_strided_slice %54 {offsets = [0, 4], sizes = [32, 12], strides = [1, 1]} : vector<32x16xf32> to vector<32x12xf32>
    %97 = tpu.concatenate %96, %95 in 1 : vector<32x12xf32>, vector<32x4xf32> -> vector<32x16xf32>
    %98 = arith.truncf %97 : vector<32x16xf32> to vector<32x16xbf16>
    %cst_42 = arith.constant 0.000000e+00 : f32
    %99 = vector.broadcast %cst_42 : f32 to vector<32x5xf32>
    %100 = vector.extract_strided_slice %54 {offsets = [0, 5], sizes = [32, 11], strides = [1, 1]} : vector<32x16xf32> to vector<32x11xf32>
    %101 = tpu.concatenate %100, %99 in 1 : vector<32x11xf32>, vector<32x5xf32> -> vector<32x16xf32>
    %102 = vector.extract_strided_slice %48 {offsets = [1, 0], sizes = [1, 16], strides = [1, 1]} : vector<2x16xf32> to vector<1x16xf32>
    %103 = vector.broadcast %102 : vector<1x16xf32> to vector<32x16xf32>
    %104 = arith.mulf %101, %103 : vector<32x16xf32>
    %105 = arith.truncf %104 : vector<32x16xf32> to vector<32x16xbf16>
    %106 = tpu.concatenate %61, %65, %72, %79, %80, %87, %94, %98, %105 in 0 : vector<32x16xbf16>, vector<32x16xbf16>, vector<32x16xbf16>, vector<32x16xbf16>, vector<32x16xbf16>, vector<32x16xbf16>, vector<32x16xbf16>, vector<32x16xbf16>, vector<32x16xbf16> -> vector<288x16xbf16>
    %c0_43 = arith.constant 0 : index
    %c0_44 = arith.constant 0 : index
    %c0_45 = arith.constant 0 : index
    %107 = vector.load %arg5[%c0_43, %c0_44, %c0_45] : memref<5x32x288xbf16, #tpu.memory_space<vmem>>, vector<1x32x288xbf16>
    %108 = vector.shape_cast %107 : vector<1x32x288xbf16> to vector<32x288xbf16>
    %cst_46 = arith.constant dense<0.000000e+00> : vector<32x16xf32>
    %109 = tpu.matmul %108, %106, %cst_46 {dimension_numbers = #tpu.dot_dimension_numbers<[1], [0], [0], [1], [0, 0, 1, 1], [], []>} : vector<32x288xbf16>, vector<288x16xbf16>, vector<32x16xf32> -> vector<32x16xf32>
    %110 = vector.broadcast %15 : vector<32x1xf32> to vector<32x16xf32>
    %111 = arith.mulf %109, %110 : vector<32x16xf32>
    %c0_47 = arith.constant 0 : index
    %c0_48 = arith.constant 0 : index
    %c0_49 = arith.constant 0 : index
    %112 = vector.load %arg8[%c0_47, %c0_48, %c0_49] : memref<5x1x256xf32, #tpu.memory_space<vmem>>, vector<1x1x256xf32>
    %113 = vector.shape_cast %112 : vector<1x1x256xf32> to vector<1x256xf32>
    %114 = vector.extract_strided_slice %113 {offsets = [0, 0], sizes = [1, 16], strides = [1, 1]} : vector<1x256xf32> to vector<1x16xf32>
    %115 = vector.broadcast %114 : vector<1x16xf32> to vector<32x16xf32>
    %116 = arith.addf %111, %115 : vector<32x16xf32>
    %c0_50 = arith.constant 0 : index
    %c0_51 = arith.constant 0 : index
    %c0_52 = arith.constant 0 : index
    %117 = vector.load %arg7[%c0_50, %c0_51, %c0_52] : memref<5x32x1xf32, #tpu.memory_space<vmem>>, vector<1x32x1xf32>
    %118 = vector.shape_cast %117 : vector<1x32x1xf32> to vector<32x1xf32>
    %119 = vector.broadcast %118 : vector<32x1xf32> to vector<32x16xf32>
    %120 = arith.addf %116, %119 : vector<32x16xf32>
    %cst_53 = arith.constant 0.000000e+00 : f32
    %121 = vector.broadcast %cst_53 : f32 to vector<32x16xf32>
    %122 = arith.cmpf oge, %120, %121 : vector<32x16xf32>
    %cst_54 = arith.constant 1.41421354 : f32
    %cst_55 = arith.constant 0.282842726 : f32
    %123 = vector.broadcast %cst_54 : f32 to vector<32x16xf32>
    %124 = vector.broadcast %cst_55 : f32 to vector<32x16xf32>
    %125 = arith.select %122, %123, %124 : vector<32x16xi1>, vector<32x16xf32>
    %126 = arith.mulf %120, %125 : vector<32x16xf32>
    %c0_56 = arith.constant 0 : index
    %c0_57 = arith.constant 0 : index
    %c0_58 = arith.constant 0 : index
    %127 = vector.load %arg9[%c0_56, %c0_57, %c0_58] : memref<3x3x32xbf16, #tpu.memory_space<vmem>>, vector<1x3x32xbf16>
    %128 = vector.shape_cast %127 : vector<1x3x32xbf16> to vector<3x32xbf16>
    %129 = vector.extract_strided_slice %7 {offsets = [32, 1], sizes = [32, 1], strides = [1, 1]} : vector<256x6xf32> to vector<32x1xf32>
    %130 = vector.broadcast %129 : vector<32x1xf32> to vector<32x16xf32>
    %131 = arith.mulf %126, %130 : vector<32x16xf32>
    %132 = arith.truncf %131 : vector<32x16xf32> to vector<32x16xbf16>
    %cst_59 = arith.constant dense<0.000000e+00> : vector<3x16xf32>
    %133 = tpu.matmul %128, %132, %cst_59 {dimension_numbers = #tpu.dot_dimension_numbers<[1], [0], [0], [1], [0, 0, 1, 1], [], []>} : vector<3x32xbf16>, vector<32x16xbf16>, vector<3x16xf32> -> vector<3x16xf32>
    %c0_60 = arith.constant 0 : index
    %c0_61 = arith.constant 0 : index
    %c0_62 = arith.constant 0 : index
    %134 = vector.load %arg10[%c0_60, %c0_61, %c0_62] : memref<3x3x1xf32, #tpu.memory_space<vmem>>, vector<1x3x1xf32>
    %135 = vector.shape_cast %134 : vector<1x3x1xf32> to vector<3x1xf32>
    %136 = vector.broadcast %135 : vector<3x1xf32> to vector<3x16xf32>
    %137 = arith.addf %133, %136 : vector<3x16xf32>
    %138 = arith.truncf %126 : vector<32x16xf32> to vector<32x16xbf16>
    %c0_63 = arith.constant 0 : index
    %c0_64 = arith.constant 0 : index
    %139 = vector.load %arg11[%c0_63, %c0_64] : memref<16x64xbf16, #tpu.memory_space<vmem>>, vector<16x64xbf16>
    %cst_65 = arith.constant dense<0.000000e+00> : vector<32x64xf32>
    %140 = tpu.matmul %138, %139, %cst_65 {dimension_numbers = #tpu.dot_dimension_numbers<[1], [0], [0], [1], [0, 0, 1, 1], [], []>} : vector<32x16xbf16>, vector<16x64xbf16>, vector<32x64xf32> -> vector<32x64xf32>
    %141 = vector.extract_strided_slice %7 {offsets = [64, 1], sizes = [32, 1], strides = [1, 1]} : vector<256x6xf32> to vector<32x1xf32>
    %142 = vector.broadcast %141 : vector<32x1xf32> to vector<32x64xf32>
    %143 = arith.mulf %140, %142 : vector<32x64xf32>
    %cst_66 = arith.constant 0.000000e+00 : f32
    %144 = vector.broadcast %cst_66 : f32 to vector<32x9xf32>
    %145 = vector.extract_strided_slice %143 {offsets = [0, 0], sizes = [32, 55], strides = [1, 1]} : vector<32x64xf32> to vector<32x55xf32>
    %146 = tpu.concatenate %144, %145 in 1 : vector<32x9xf32>, vector<32x55xf32> -> vector<32x64xf32>
    %147 = vector.extract_strided_slice %49 {offsets = [0, 0], sizes = [1, 64], strides = [1, 1]} : vector<2x64xf32> to vector<1x64xf32>
    %148 = vector.broadcast %147 : vector<1x64xf32> to vector<32x64xf32>
    %149 = arith.mulf %146, %148 : vector<32x64xf32>
    %150 = arith.truncf %149 : vector<32x64xf32> to vector<32x64xbf16>
    %cst_67 = arith.constant 0.000000e+00 : f32
    %151 = vector.broadcast %cst_67 : f32 to vector<32x8xf32>
    %152 = vector.extract_strided_slice %143 {offsets = [0, 0], sizes = [32, 56], strides = [1, 1]} : vector<32x64xf32> to vector<32x56xf32>
    %153 = tpu.concatenate %151, %152 in 1 : vector<32x8xf32>, vector<32x56xf32> -> vector<32x64xf32>
    %154 = arith.truncf %153 : vector<32x64xf32> to vector<32x64xbf16>
    %cst_68 = arith.constant 0.000000e+00 : f32
    %155 = vector.broadcast %cst_68 : f32 to vector<32x7xf32>
    %156 = vector.extract_strided_slice %143 {offsets = [0, 0], sizes = [32, 57], strides = [1, 1]} : vector<32x64xf32> to vector<32x57xf32>
    %157 = tpu.concatenate %155, %156 in 1 : vector<32x7xf32>, vector<32x57xf32> -> vector<32x64xf32>
    %158 = vector.extract_strided_slice %49 {offsets = [1, 0], sizes = [1, 64], strides = [1, 1]} : vector<2x64xf32> to vector<1x64xf32>
    %159 = vector.broadcast %158 : vector<1x64xf32> to vector<32x64xf32>
    %160 = arith.mulf %157, %159 : vector<32x64xf32>
    %161 = arith.truncf %160 : vector<32x64xf32> to vector<32x64xbf16>
    %cst_69 = arith.constant 0.000000e+00 : f32
    %162 = vector.broadcast %cst_69 : f32 to vector<32x1xf32>
    %163 = vector.extract_strided_slice %143 {offsets = [0, 0], sizes = [32, 63], strides = [1, 1]} : vector<32x64xf32> to vector<32x63xf32>
    %164 = tpu.concatenate %162, %163 in 1 : vector<32x1xf32>, vector<32x63xf32> -> vector<32x64xf32>
    %165 = vector.extract_strided_slice %49 {offsets = [0, 0], sizes = [1, 64], strides = [1, 1]} : vector<2x64xf32> to vector<1x64xf32>
    %166 = vector.broadcast %165 : vector<1x64xf32> to vector<32x64xf32>
    %167 = arith.mulf %164, %166 : vector<32x64xf32>
    %168 = arith.truncf %167 : vector<32x64xf32> to vector<32x64xbf16>
    %169 = arith.truncf %143 : vector<32x64xf32> to vector<32x64xbf16>
    %cst_70 = arith.constant 0.000000e+00 : f32
    %170 = vector.broadcast %cst_70 : f32 to vector<32x1xf32>
    %171 = vector.extract_strided_slice %143 {offsets = [0, 1], sizes = [32, 63], strides = [1, 1]} : vector<32x64xf32> to vector<32x63xf32>
    %172 = tpu.concatenate %171, %170 in 1 : vector<32x63xf32>, vector<32x1xf32> -> vector<32x64xf32>
    %173 = vector.extract_strided_slice %49 {offsets = [1, 0], sizes = [1, 64], strides = [1, 1]} : vector<2x64xf32> to vector<1x64xf32>
    %174 = vector.broadcast %173 : vector<1x64xf32> to vector<32x64xf32>
    %175 = arith.mulf %172, %174 : vector<32x64xf32>
    %176 = arith.truncf %175 : vector<32x64xf32> to vector<32x64xbf16>
    %cst_71 = arith.constant 0.000000e+00 : f32
    %177 = vector.broadcast %cst_71 : f32 to vector<32x7xf32>
    %178 = vector.extract_strided_slice %143 {offsets = [0, 7], sizes = [32, 57], strides = [1, 1]} : vector<32x64xf32> to vector<32x57xf32>
    %179 = tpu.concatenate %178, %177 in 1 : vector<32x57xf32>, vector<32x7xf32> -> vector<32x64xf32>
    %180 = vector.extract_strided_slice %49 {offsets = [0, 0], sizes = [1, 64], strides = [1, 1]} : vector<2x64xf32> to vector<1x64xf32>
    %181 = vector.broadcast %180 : vector<1x64xf32> to vector<32x64xf32>
    %182 = arith.mulf %179, %181 : vector<32x64xf32>
    %183 = arith.truncf %182 : vector<32x64xf32> to vector<32x64xbf16>
    %cst_72 = arith.constant 0.000000e+00 : f32
    %184 = vector.broadcast %cst_72 : f32 to vector<32x8xf32>
    %185 = vector.extract_strided_slice %143 {offsets = [0, 8], sizes = [32, 56], strides = [1, 1]} : vector<32x64xf32> to vector<32x56xf32>
    %186 = tpu.concatenate %185, %184 in 1 : vector<32x56xf32>, vector<32x8xf32> -> vector<32x64xf32>
    %187 = arith.truncf %186 : vector<32x64xf32> to vector<32x64xbf16>
    %cst_73 = arith.constant 0.000000e+00 : f32
    %188 = vector.broadcast %cst_73 : f32 to vector<32x9xf32>
    %189 = vector.extract_strided_slice %143 {offsets = [0, 9], sizes = [32, 55], strides = [1, 1]} : vector<32x64xf32> to vector<32x55xf32>
    %190 = tpu.concatenate %189, %188 in 1 : vector<32x55xf32>, vector<32x9xf32> -> vector<32x64xf32>
    %191 = vector.extract_strided_slice %49 {offsets = [1, 0], sizes = [1, 64], strides = [1, 1]} : vector<2x64xf32> to vector<1x64xf32>
    %192 = vector.broadcast %191 : vector<1x64xf32> to vector<32x64xf32>
    %193 = arith.mulf %190, %192 : vector<32x64xf32>
    %194 = arith.truncf %193 : vector<32x64xf32> to vector<32x64xbf16>
    %195 = tpu.concatenate %150, %154, %161, %168, %169, %176, %183, %187, %194 in 0 : vector<32x64xbf16>, vector<32x64xbf16>, vector<32x64xbf16>, vector<32x64xbf16>, vector<32x64xbf16>, vector<32x64xbf16>, vector<32x64xbf16>, vector<32x64xbf16>, vector<32x64xbf16> -> vector<288x64xbf16>
    %c1_74 = arith.constant 1 : index
    %c0_75 = arith.constant 0 : index
    %c0_76 = arith.constant 0 : index
    %196 = vector.load %arg5[%c1_74, %c0_75, %c0_76] : memref<5x32x288xbf16, #tpu.memory_space<vmem>>, vector<1x32x288xbf16>
    %197 = vector.shape_cast %196 : vector<1x32x288xbf16> to vector<32x288xbf16>
    %cst_77 = arith.constant dense<0.000000e+00> : vector<32x64xf32>
    %198 = tpu.matmul %197, %195, %cst_77 {dimension_numbers = #tpu.dot_dimension_numbers<[1], [0], [0], [1], [0, 0, 1, 1], [], []>} : vector<32x288xbf16>, vector<288x64xbf16>, vector<32x64xf32> -> vector<32x64xf32>
    %199 = vector.broadcast %23 : vector<32x1xf32> to vector<32x64xf32>
    %200 = arith.mulf %198, %199 : vector<32x64xf32>
    %c1_78 = arith.constant 1 : index
    %c0_79 = arith.constant 0 : index
    %c0_80 = arith.constant 0 : index
    %201 = vector.load %arg8[%c1_78, %c0_79, %c0_80] : memref<5x1x256xf32, #tpu.memory_space<vmem>>, vector<1x1x256xf32>
    %202 = vector.shape_cast %201 : vector<1x1x256xf32> to vector<1x256xf32>
    %203 = vector.extract_strided_slice %202 {offsets = [0, 0], sizes = [1, 64], strides = [1, 1]} : vector<1x256xf32> to vector<1x64xf32>
    %204 = vector.broadcast %203 : vector<1x64xf32> to vector<32x64xf32>
    %205 = arith.addf %200, %204 : vector<32x64xf32>
    %c1_81 = arith.constant 1 : index
    %c0_82 = arith.constant 0 : index
    %c0_83 = arith.constant 0 : index
    %206 = vector.load %arg7[%c1_81, %c0_82, %c0_83] : memref<5x32x1xf32, #tpu.memory_space<vmem>>, vector<1x32x1xf32>
    %207 = vector.shape_cast %206 : vector<1x32x1xf32> to vector<32x1xf32>
    %208 = vector.broadcast %207 : vector<32x1xf32> to vector<32x64xf32>
    %209 = arith.addf %205, %208 : vector<32x64xf32>
    %cst_84 = arith.constant 0.000000e+00 : f32
    %210 = vector.broadcast %cst_84 : f32 to vector<32x64xf32>
    %211 = arith.cmpf oge, %209, %210 : vector<32x64xf32>
    %cst_85 = arith.constant 1.41421354 : f32
    %cst_86 = arith.constant 0.282842726 : f32
    %212 = vector.broadcast %cst_85 : f32 to vector<32x64xf32>
    %213 = vector.broadcast %cst_86 : f32 to vector<32x64xf32>
    %214 = arith.select %211, %212, %213 : vector<32x64xi1>, vector<32x64xf32>
    %215 = arith.mulf %209, %214 : vector<32x64xf32>
    %216 = vector.extract_strided_slice %7 {offsets = [96, 2], sizes = [32, 1], strides = [1, 1]} : vector<256x6xf32> to vector<32x1xf32>
    %217 = vector.broadcast %216 : vector<32x1xf32> to vector<32x64xf32>
    %218 = arith.mulf %215, %217 : vector<32x64xf32>
    %cst_87 = arith.constant 0.000000e+00 : f32
    %219 = vector.broadcast %cst_87 : f32 to vector<32x9xf32>
    %220 = vector.extract_strided_slice %218 {offsets = [0, 0], sizes = [32, 55], strides = [1, 1]} : vector<32x64xf32> to vector<32x55xf32>
    %221 = tpu.concatenate %219, %220 in 1 : vector<32x9xf32>, vector<32x55xf32> -> vector<32x64xf32>
    %222 = vector.extract_strided_slice %49 {offsets = [0, 0], sizes = [1, 64], strides = [1, 1]} : vector<2x64xf32> to vector<1x64xf32>
    %223 = vector.broadcast %222 : vector<1x64xf32> to vector<32x64xf32>
    %224 = arith.mulf %221, %223 : vector<32x64xf32>
    %225 = arith.truncf %224 : vector<32x64xf32> to vector<32x64xbf16>
    %cst_88 = arith.constant 0.000000e+00 : f32
    %226 = vector.broadcast %cst_88 : f32 to vector<32x8xf32>
    %227 = vector.extract_strided_slice %218 {offsets = [0, 0], sizes = [32, 56], strides = [1, 1]} : vector<32x64xf32> to vector<32x56xf32>
    %228 = tpu.concatenate %226, %227 in 1 : vector<32x8xf32>, vector<32x56xf32> -> vector<32x64xf32>
    %229 = arith.truncf %228 : vector<32x64xf32> to vector<32x64xbf16>
    %cst_89 = arith.constant 0.000000e+00 : f32
    %230 = vector.broadcast %cst_89 : f32 to vector<32x7xf32>
    %231 = vector.extract_strided_slice %218 {offsets = [0, 0], sizes = [32, 57], strides = [1, 1]} : vector<32x64xf32> to vector<32x57xf32>
    %232 = tpu.concatenate %230, %231 in 1 : vector<32x7xf32>, vector<32x57xf32> -> vector<32x64xf32>
    %233 = vector.extract_strided_slice %49 {offsets = [1, 0], sizes = [1, 64], strides = [1, 1]} : vector<2x64xf32> to vector<1x64xf32>
    %234 = vector.broadcast %233 : vector<1x64xf32> to vector<32x64xf32>
    %235 = arith.mulf %232, %234 : vector<32x64xf32>
    %236 = arith.truncf %235 : vector<32x64xf32> to vector<32x64xbf16>
    %cst_90 = arith.constant 0.000000e+00 : f32
    %237 = vector.broadcast %cst_90 : f32 to vector<32x1xf32>
    %238 = vector.extract_strided_slice %218 {offsets = [0, 0], sizes = [32, 63], strides = [1, 1]} : vector<32x64xf32> to vector<32x63xf32>
    %239 = tpu.concatenate %237, %238 in 1 : vector<32x1xf32>, vector<32x63xf32> -> vector<32x64xf32>
    %240 = vector.extract_strided_slice %49 {offsets = [0, 0], sizes = [1, 64], strides = [1, 1]} : vector<2x64xf32> to vector<1x64xf32>
    %241 = vector.broadcast %240 : vector<1x64xf32> to vector<32x64xf32>
    %242 = arith.mulf %239, %241 : vector<32x64xf32>
    %243 = arith.truncf %242 : vector<32x64xf32> to vector<32x64xbf16>
    %244 = arith.truncf %218 : vector<32x64xf32> to vector<32x64xbf16>
    %cst_91 = arith.constant 0.000000e+00 : f32
    %245 = vector.broadcast %cst_91 : f32 to vector<32x1xf32>
    %246 = vector.extract_strided_slice %218 {offsets = [0, 1], sizes = [32, 63], strides = [1, 1]} : vector<32x64xf32> to vector<32x63xf32>
    %247 = tpu.concatenate %246, %245 in 1 : vector<32x63xf32>, vector<32x1xf32> -> vector<32x64xf32>
    %248 = vector.extract_strided_slice %49 {offsets = [1, 0], sizes = [1, 64], strides = [1, 1]} : vector<2x64xf32> to vector<1x64xf32>
    %249 = vector.broadcast %248 : vector<1x64xf32> to vector<32x64xf32>
    %250 = arith.mulf %247, %249 : vector<32x64xf32>
    %251 = arith.truncf %250 : vector<32x64xf32> to vector<32x64xbf16>
    %cst_92 = arith.constant 0.000000e+00 : f32
    %252 = vector.broadcast %cst_92 : f32 to vector<32x7xf32>
    %253 = vector.extract_strided_slice %218 {offsets = [0, 7], sizes = [32, 57], strides = [1, 1]} : vector<32x64xf32> to vector<32x57xf32>
    %254 = tpu.concatenate %253, %252 in 1 : vector<32x57xf32>, vector<32x7xf32> -> vector<32x64xf32>
    %255 = vector.extract_strided_slice %49 {offsets = [0, 0], sizes = [1, 64], strides = [1, 1]} : vector<2x64xf32> to vector<1x64xf32>
    %256 = vector.broadcast %255 : vector<1x64xf32> to vector<32x64xf32>
    %257 = arith.mulf %254, %256 : vector<32x64xf32>
    %258 = arith.truncf %257 : vector<32x64xf32> to vector<32x64xbf16>
    %cst_93 = arith.constant 0.000000e+00 : f32
    %259 = vector.broadcast %cst_93 : f32 to vector<32x8xf32>
    %260 = vector.extract_strided_slice %218 {offsets = [0, 8], sizes = [32, 56], strides = [1, 1]} : vector<32x64xf32> to vector<32x56xf32>
    %261 = tpu.concatenate %260, %259 in 1 : vector<32x56xf32>, vector<32x8xf32> -> vector<32x64xf32>
    %262 = arith.truncf %261 : vector<32x64xf32> to vector<32x64xbf16>
    %cst_94 = arith.constant 0.000000e+00 : f32
    %263 = vector.broadcast %cst_94 : f32 to vector<32x9xf32>
    %264 = vector.extract_strided_slice %218 {offsets = [0, 9], sizes = [32, 55], strides = [1, 1]} : vector<32x64xf32> to vector<32x55xf32>
    %265 = tpu.concatenate %264, %263 in 1 : vector<32x55xf32>, vector<32x9xf32> -> vector<32x64xf32>
    %266 = vector.extract_strided_slice %49 {offsets = [1, 0], sizes = [1, 64], strides = [1, 1]} : vector<2x64xf32> to vector<1x64xf32>
    %267 = vector.broadcast %266 : vector<1x64xf32> to vector<32x64xf32>
    %268 = arith.mulf %265, %267 : vector<32x64xf32>
    %269 = arith.truncf %268 : vector<32x64xf32> to vector<32x64xbf16>
    %270 = tpu.concatenate %225, %229, %236, %243, %244, %251, %258, %262, %269 in 0 : vector<32x64xbf16>, vector<32x64xbf16>, vector<32x64xbf16>, vector<32x64xbf16>, vector<32x64xbf16>, vector<32x64xbf16>, vector<32x64xbf16>, vector<32x64xbf16>, vector<32x64xbf16> -> vector<288x64xbf16>
    %c2_95 = arith.constant 2 : index
    %c0_96 = arith.constant 0 : index
    %c0_97 = arith.constant 0 : index
    %271 = vector.load %arg5[%c2_95, %c0_96, %c0_97] : memref<5x32x288xbf16, #tpu.memory_space<vmem>>, vector<1x32x288xbf16>
    %272 = vector.shape_cast %271 : vector<1x32x288xbf16> to vector<32x288xbf16>
    %cst_98 = arith.constant dense<0.000000e+00> : vector<32x64xf32>
    %273 = tpu.matmul %272, %270, %cst_98 {dimension_numbers = #tpu.dot_dimension_numbers<[1], [0], [0], [1], [0, 0, 1, 1], [], []>} : vector<32x288xbf16>, vector<288x64xbf16>, vector<32x64xf32> -> vector<32x64xf32>
    %274 = vector.broadcast %31 : vector<32x1xf32> to vector<32x64xf32>
    %275 = arith.mulf %273, %274 : vector<32x64xf32>
    %c2_99 = arith.constant 2 : index
    %c0_100 = arith.constant 0 : index
    %c0_101 = arith.constant 0 : index
    %276 = vector.load %arg8[%c2_99, %c0_100, %c0_101] : memref<5x1x256xf32, #tpu.memory_space<vmem>>, vector<1x1x256xf32>
    %277 = vector.shape_cast %276 : vector<1x1x256xf32> to vector<1x256xf32>
    %278 = vector.extract_strided_slice %277 {offsets = [0, 0], sizes = [1, 64], strides = [1, 1]} : vector<1x256xf32> to vector<1x64xf32>
    %279 = vector.broadcast %278 : vector<1x64xf32> to vector<32x64xf32>
    %280 = arith.addf %275, %279 : vector<32x64xf32>
    %c2_102 = arith.constant 2 : index
    %c0_103 = arith.constant 0 : index
    %c0_104 = arith.constant 0 : index
    %281 = vector.load %arg7[%c2_102, %c0_103, %c0_104] : memref<5x32x1xf32, #tpu.memory_space<vmem>>, vector<1x32x1xf32>
    %282 = vector.shape_cast %281 : vector<1x32x1xf32> to vector<32x1xf32>
    %283 = vector.broadcast %282 : vector<32x1xf32> to vector<32x64xf32>
    %284 = arith.addf %280, %283 : vector<32x64xf32>
    %cst_105 = arith.constant 0.000000e+00 : f32
    %285 = vector.broadcast %cst_105 : f32 to vector<32x64xf32>
    %286 = arith.cmpf oge, %284, %285 : vector<32x64xf32>
    %cst_106 = arith.constant 1.41421354 : f32
    %cst_107 = arith.constant 0.282842726 : f32
    %287 = vector.broadcast %cst_106 : f32 to vector<32x64xf32>
    %288 = vector.broadcast %cst_107 : f32 to vector<32x64xf32>
    %289 = arith.select %286, %287, %288 : vector<32x64xi1>, vector<32x64xf32>
    %290 = arith.mulf %284, %289 : vector<32x64xf32>
    %291 = arith.truncf %137 : vector<3x16xf32> to vector<3x16xbf16>
    %c0_108 = arith.constant 0 : index
    %c0_109 = arith.constant 0 : index
    %292 = vector.load %arg11[%c0_108, %c0_109] : memref<16x64xbf16, #tpu.memory_space<vmem>>, vector<16x64xbf16>
    %cst_110 = arith.constant dense<0.000000e+00> : vector<3x64xf32>
    %293 = tpu.matmul %291, %292, %cst_110 {dimension_numbers = #tpu.dot_dimension_numbers<[1], [0], [0], [1], [0, 0, 1, 1], [], []>} : vector<3x16xbf16>, vector<16x64xbf16>, vector<3x64xf32> -> vector<3x64xf32>
    %c1_111 = arith.constant 1 : index
    %c0_112 = arith.constant 0 : index
    %c0_113 = arith.constant 0 : index
    %294 = vector.load %arg9[%c1_111, %c0_112, %c0_113] : memref<3x3x32xbf16, #tpu.memory_space<vmem>>, vector<1x3x32xbf16>
    %295 = vector.shape_cast %294 : vector<1x3x32xbf16> to vector<3x32xbf16>
    %296 = vector.extract_strided_slice %7 {offsets = [128, 3], sizes = [32, 1], strides = [1, 1]} : vector<256x6xf32> to vector<32x1xf32>
    %297 = vector.broadcast %296 : vector<32x1xf32> to vector<32x64xf32>
    %298 = arith.mulf %290, %297 : vector<32x64xf32>
    %299 = arith.truncf %298 : vector<32x64xf32> to vector<32x64xbf16>
    %cst_114 = arith.constant dense<0.000000e+00> : vector<3x64xf32>
    %300 = tpu.matmul %295, %299, %cst_114 {dimension_numbers = #tpu.dot_dimension_numbers<[1], [0], [0], [1], [0, 0, 1, 1], [], []>} : vector<3x32xbf16>, vector<32x64xbf16>, vector<3x64xf32> -> vector<3x64xf32>
    %c1_115 = arith.constant 1 : index
    %c0_116 = arith.constant 0 : index
    %c0_117 = arith.constant 0 : index
    %301 = vector.load %arg10[%c1_115, %c0_116, %c0_117] : memref<3x3x1xf32, #tpu.memory_space<vmem>>, vector<1x3x1xf32>
    %302 = vector.shape_cast %301 : vector<1x3x1xf32> to vector<3x1xf32>
    %303 = vector.broadcast %302 : vector<3x1xf32> to vector<3x64xf32>
    %304 = arith.addf %300, %303 : vector<3x64xf32>
    %305 = arith.addf %304, %293 : vector<3x64xf32>
    %c0_118 = arith.constant 0 : index
    %c0_119 = arith.constant 0 : index
    %c0_120 = arith.constant 0 : index
    %306 = vector.load %arg17[%c0_118, %c0_119, %c0_120] : memref<1x32x64xf32, #tpu.memory_space<vmem>>, vector<1x32x64xf32>
    %307 = vector.shape_cast %306 : vector<1x32x64xf32> to vector<32x64xf32>
    %308 = vector.shape_cast %290 : vector<32x64xf32> to vector<1x32x64xf32>
    tpu.vector_store %arg17[%c0_118, %c0_119, %c0_120], %308 {strides = array<i32>} : memref<1x32x64xf32, #tpu.memory_space<vmem>>, vector<1x32x64xf32>,
    %309 = arith.truncf %290 : vector<32x64xf32> to vector<32x64xbf16>
    %c0_121 = arith.constant 0 : index
    %c0_122 = arith.constant 0 : index
    %310 = vector.load %arg12[%c0_121, %c0_122] : memref<64x256xbf16, #tpu.memory_space<vmem>>, vector<64x256xbf16>
    %cst_123 = arith.constant dense<0.000000e+00> : vector<32x256xf32>
    %311 = tpu.matmul %309, %310, %cst_123 {dimension_numbers = #tpu.dot_dimension_numbers<[1], [0], [0], [1], [0, 0, 1, 1], [], []>} : vector<32x64xbf16>, vector<64x256xbf16>, vector<32x256xf32> -> vector<32x256xf32>
    %312 = vector.extract_strided_slice %7 {offsets = [160, 3], sizes = [32, 1], strides = [1, 1]} : vector<256x6xf32> to vector<32x1xf32>
    %313 = vector.broadcast %312 : vector<32x1xf32> to vector<32x256xf32>
    %314 = arith.mulf %311, %313 : vector<32x256xf32>
    %cst_124 = arith.constant 0.000000e+00 : f32
    %315 = vector.broadcast %cst_124 : f32 to vector<32x17xf32>
    %316 = vector.extract_strided_slice %314 {offsets = [0, 0], sizes = [32, 239], strides = [1, 1]} : vector<32x256xf32> to vector<32x239xf32>
    %317 = tpu.concatenate %315, %316 in 1 : vector<32x17xf32>, vector<32x239xf32> -> vector<32x256xf32>
    %318 = vector.extract_strided_slice %50 {offsets = [0, 0], sizes = [1, 256], strides = [1, 1]} : vector<2x256xf32> to vector<1x256xf32>
    %319 = vector.broadcast %318 : vector<1x256xf32> to vector<32x256xf32>
    %320 = arith.mulf %317, %319 : vector<32x256xf32>
    %321 = arith.truncf %320 : vector<32x256xf32> to vector<32x256xbf16>
    %cst_125 = arith.constant 0.000000e+00 : f32
    %322 = vector.broadcast %cst_125 : f32 to vector<32x16xf32>
    %323 = vector.extract_strided_slice %314 {offsets = [0, 0], sizes = [32, 240], strides = [1, 1]} : vector<32x256xf32> to vector<32x240xf32>
    %324 = tpu.concatenate %322, %323 in 1 : vector<32x16xf32>, vector<32x240xf32> -> vector<32x256xf32>
    %325 = arith.truncf %324 : vector<32x256xf32> to vector<32x256xbf16>
    %cst_126 = arith.constant 0.000000e+00 : f32
    %326 = vector.broadcast %cst_126 : f32 to vector<32x15xf32>
    %327 = vector.extract_strided_slice %314 {offsets = [0, 0], sizes = [32, 241], strides = [1, 1]} : vector<32x256xf32> to vector<32x241xf32>
    %328 = tpu.concatenate %326, %327 in 1 : vector<32x15xf32>, vector<32x241xf32> -> vector<32x256xf32>
    %329 = vector.extract_strided_slice %50 {offsets = [1, 0], sizes = [1, 256], strides = [1, 1]} : vector<2x256xf32> to vector<1x256xf32>
    %330 = vector.broadcast %329 : vector<1x256xf32> to vector<32x256xf32>
    %331 = arith.mulf %328, %330 : vector<32x256xf32>
    %332 = arith.truncf %331 : vector<32x256xf32> to vector<32x256xbf16>
    %cst_127 = arith.constant 0.000000e+00 : f32
    %333 = vector.broadcast %cst_127 : f32 to vector<32x1xf32>
    %334 = vector.extract_strided_slice %314 {offsets = [0, 0], sizes = [32, 255], strides = [1, 1]} : vector<32x256xf32> to vector<32x255xf32>
    %335 = tpu.concatenate %333, %334 in 1 : vector<32x1xf32>, vector<32x255xf32> -> vector<32x256xf32>
    %336 = vector.extract_strided_slice %50 {offsets = [0, 0], sizes = [1, 256], strides = [1, 1]} : vector<2x256xf32> to vector<1x256xf32>
    %337 = vector.broadcast %336 : vector<1x256xf32> to vector<32x256xf32>
    %338 = arith.mulf %335, %337 : vector<32x256xf32>
    %339 = arith.truncf %338 : vector<32x256xf32> to vector<32x256xbf16>
    %340 = arith.truncf %314 : vector<32x256xf32> to vector<32x256xbf16>
    %cst_128 = arith.constant 0.000000e+00 : f32
    %341 = vector.broadcast %cst_128 : f32 to vector<32x1xf32>
    %342 = vector.extract_strided_slice %314 {offsets = [0, 1], sizes = [32, 255], strides = [1, 1]} : vector<32x256xf32> to vector<32x255xf32>
    %343 = tpu.concatenate %342, %341 in 1 : vector<32x255xf32>, vector<32x1xf32> -> vector<32x256xf32>
    %344 = vector.extract_strided_slice %50 {offsets = [1, 0], sizes = [1, 256], strides = [1, 1]} : vector<2x256xf32> to vector<1x256xf32>
    %345 = vector.broadcast %344 : vector<1x256xf32> to vector<32x256xf32>
    %346 = arith.mulf %343, %345 : vector<32x256xf32>
    %347 = arith.truncf %346 : vector<32x256xf32> to vector<32x256xbf16>
    %cst_129 = arith.constant 0.000000e+00 : f32
    %348 = vector.broadcast %cst_129 : f32 to vector<32x15xf32>
    %349 = vector.extract_strided_slice %314 {offsets = [0, 15], sizes = [32, 241], strides = [1, 1]} : vector<32x256xf32> to vector<32x241xf32>
    %350 = tpu.concatenate %349, %348 in 1 : vector<32x241xf32>, vector<32x15xf32> -> vector<32x256xf32>
    %351 = vector.extract_strided_slice %50 {offsets = [0, 0], sizes = [1, 256], strides = [1, 1]} : vector<2x256xf32> to vector<1x256xf32>
    %352 = vector.broadcast %351 : vector<1x256xf32> to vector<32x256xf32>
    %353 = arith.mulf %350, %352 : vector<32x256xf32>
    %354 = arith.truncf %353 : vector<32x256xf32> to vector<32x256xbf16>
    %cst_130 = arith.constant 0.000000e+00 : f32
    %355 = vector.broadcast %cst_130 : f32 to vector<32x16xf32>
    %356 = vector.extract_strided_slice %314 {offsets = [0, 16], sizes = [32, 240], strides = [1, 1]} : vector<32x256xf32> to vector<32x240xf32>
    %357 = tpu.concatenate %356, %355 in 1 : vector<32x240xf32>, vector<32x16xf32> -> vector<32x256xf32>
    %358 = arith.truncf %357 : vector<32x256xf32> to vector<32x256xbf16>
    %cst_131 = arith.constant 0.000000e+00 : f32
    %359 = vector.broadcast %cst_131 : f32 to vector<32x17xf32>
    %360 = vector.extract_strided_slice %314 {offsets = [0, 17], sizes = [32, 239], strides = [1, 1]} : vector<32x256xf32> to vector<32x239xf32>
    %361 = tpu.concatenate %360, %359 in 1 : vector<32x239xf32>, vector<32x17xf32> -> vector<32x256xf32>
    %362 = vector.extract_strided_slice %50 {offsets = [1, 0], sizes = [1, 256], strides = [1, 1]} : vector<2x256xf32> to vector<1x256xf32>
    %363 = vector.broadcast %362 : vector<1x256xf32> to vector<32x256xf32>
    %364 = arith.mulf %361, %363 : vector<32x256xf32>
    %365 = arith.truncf %364 : vector<32x256xf32> to vector<32x256xbf16>
    %366 = tpu.concatenate %321, %325, %332, %339, %340, %347, %354, %358, %365 in 0 : vector<32x256xbf16>, vector<32x256xbf16>, vector<32x256xbf16>, vector<32x256xbf16>, vector<32x256xbf16>, vector<32x256xbf16>, vector<32x256xbf16>, vector<32x256xbf16>, vector<32x256xbf16> -> vector<288x256xbf16>
    %c3_132 = arith.constant 3 : index
    %c0_133 = arith.constant 0 : index
    %c0_134 = arith.constant 0 : index
    %367 = vector.load %arg5[%c3_132, %c0_133, %c0_134] : memref<5x32x288xbf16, #tpu.memory_space<vmem>>, vector<1x32x288xbf16>
    %368 = vector.shape_cast %367 : vector<1x32x288xbf16> to vector<32x288xbf16>
    %cst_135 = arith.constant dense<0.000000e+00> : vector<32x256xf32>
    %369 = tpu.matmul %368, %366, %cst_135 {dimension_numbers = #tpu.dot_dimension_numbers<[1], [0], [0], [1], [0, 0, 1, 1], [], []>} : vector<32x288xbf16>, vector<288x256xbf16>, vector<32x256xf32> -> vector<32x256xf32>
    %370 = vector.broadcast %39 : vector<32x1xf32> to vector<32x256xf32>
    %371 = arith.mulf %369, %370 : vector<32x256xf32>
    %c3_136 = arith.constant 3 : index
    %c0_137 = arith.constant 0 : index
    %c0_138 = arith.constant 0 : index
    %372 = vector.load %arg8[%c3_136, %c0_137, %c0_138] : memref<5x1x256xf32, #tpu.memory_space<vmem>>, vector<1x1x256xf32>
    %373 = vector.shape_cast %372 : vector<1x1x256xf32> to vector<1x256xf32>
    %374 = vector.broadcast %373 : vector<1x256xf32> to vector<32x256xf32>
    %375 = arith.addf %371, %374 : vector<32x256xf32>
    %c3_139 = arith.constant 3 : index
    %c0_140 = arith.constant 0 : index
    %c0_141 = arith.constant 0 : index
    %376 = vector.load %arg7[%c3_139, %c0_140, %c0_141] : memref<5x32x1xf32, #tpu.memory_space<vmem>>, vector<1x32x1xf32>
    %377 = vector.shape_cast %376 : vector<1x32x1xf32> to vector<32x1xf32>
    %378 = vector.broadcast %377 : vector<32x1xf32> to vector<32x256xf32>
    %379 = arith.addf %375, %378 : vector<32x256xf32>
    %cst_142 = arith.constant 0.000000e+00 : f32
    %380 = vector.broadcast %cst_142 : f32 to vector<32x256xf32>
    %381 = arith.cmpf oge, %379, %380 : vector<32x256xf32>
    %cst_143 = arith.constant 1.41421354 : f32
    %cst_144 = arith.constant 0.282842726 : f32
    %382 = vector.broadcast %cst_143 : f32 to vector<32x256xf32>
    %383 = vector.broadcast %cst_144 : f32 to vector<32x256xf32>
    %384 = arith.select %381, %382, %383 : vector<32x256xi1>, vector<32x256xf32>
    %385 = arith.mulf %379, %384 : vector<32x256xf32>
    %386 = vector.extract_strided_slice %7 {offsets = [192, 4], sizes = [32, 1], strides = [1, 1]} : vector<256x6xf32> to vector<32x1xf32>
    %387 = vector.broadcast %386 : vector<32x1xf32> to vector<32x256xf32>
    %388 = arith.mulf %385, %387 : vector<32x256xf32>
    %cst_145 = arith.constant 0.000000e+00 : f32
    %389 = vector.broadcast %cst_145 : f32 to vector<32x17xf32>
    %390 = vector.extract_strided_slice %388 {offsets = [0, 0], sizes = [32, 239], strides = [1, 1]} : vector<32x256xf32> to vector<32x239xf32>
    %391 = tpu.concatenate %389, %390 in 1 : vector<32x17xf32>, vector<32x239xf32> -> vector<32x256xf32>
    %392 = vector.extract_strided_slice %50 {offsets = [0, 0], sizes = [1, 256], strides = [1, 1]} : vector<2x256xf32> to vector<1x256xf32>
    %393 = vector.broadcast %392 : vector<1x256xf32> to vector<32x256xf32>
    %394 = arith.mulf %391, %393 : vector<32x256xf32>
    %395 = arith.truncf %394 : vector<32x256xf32> to vector<32x256xbf16>
    %cst_146 = arith.constant 0.000000e+00 : f32
    %396 = vector.broadcast %cst_146 : f32 to vector<32x16xf32>
    %397 = vector.extract_strided_slice %388 {offsets = [0, 0], sizes = [32, 240], strides = [1, 1]} : vector<32x256xf32> to vector<32x240xf32>
    %398 = tpu.concatenate %396, %397 in 1 : vector<32x16xf32>, vector<32x240xf32> -> vector<32x256xf32>
    %399 = arith.truncf %398 : vector<32x256xf32> to vector<32x256xbf16>
    %cst_147 = arith.constant 0.000000e+00 : f32
    %400 = vector.broadcast %cst_147 : f32 to vector<32x15xf32>
    %401 = vector.extract_strided_slice %388 {offsets = [0, 0], sizes = [32, 241], strides = [1, 1]} : vector<32x256xf32> to vector<32x241xf32>
    %402 = tpu.concatenate %400, %401 in 1 : vector<32x15xf32>, vector<32x241xf32> -> vector<32x256xf32>
    %403 = vector.extract_strided_slice %50 {offsets = [1, 0], sizes = [1, 256], strides = [1, 1]} : vector<2x256xf32> to vector<1x256xf32>
    %404 = vector.broadcast %403 : vector<1x256xf32> to vector<32x256xf32>
    %405 = arith.mulf %402, %404 : vector<32x256xf32>
    %406 = arith.truncf %405 : vector<32x256xf32> to vector<32x256xbf16>
    %cst_148 = arith.constant 0.000000e+00 : f32
    %407 = vector.broadcast %cst_148 : f32 to vector<32x1xf32>
    %408 = vector.extract_strided_slice %388 {offsets = [0, 0], sizes = [32, 255], strides = [1, 1]} : vector<32x256xf32> to vector<32x255xf32>
    %409 = tpu.concatenate %407, %408 in 1 : vector<32x1xf32>, vector<32x255xf32> -> vector<32x256xf32>
    %410 = vector.extract_strided_slice %50 {offsets = [0, 0], sizes = [1, 256], strides = [1, 1]} : vector<2x256xf32> to vector<1x256xf32>
    %411 = vector.broadcast %410 : vector<1x256xf32> to vector<32x256xf32>
    %412 = arith.mulf %409, %411 : vector<32x256xf32>
    %413 = arith.truncf %412 : vector<32x256xf32> to vector<32x256xbf16>
    %414 = arith.truncf %388 : vector<32x256xf32> to vector<32x256xbf16>
    %cst_149 = arith.constant 0.000000e+00 : f32
    %415 = vector.broadcast %cst_149 : f32 to vector<32x1xf32>
    %416 = vector.extract_strided_slice %388 {offsets = [0, 1], sizes = [32, 255], strides = [1, 1]} : vector<32x256xf32> to vector<32x255xf32>
    %417 = tpu.concatenate %416, %415 in 1 : vector<32x255xf32>, vector<32x1xf32> -> vector<32x256xf32>
    %418 = vector.extract_strided_slice %50 {offsets = [1, 0], sizes = [1, 256], strides = [1, 1]} : vector<2x256xf32> to vector<1x256xf32>
    %419 = vector.broadcast %418 : vector<1x256xf32> to vector<32x256xf32>
    %420 = arith.mulf %417, %419 : vector<32x256xf32>
    %421 = arith.truncf %420 : vector<32x256xf32> to vector<32x256xbf16>
    %cst_150 = arith.constant 0.000000e+00 : f32
    %422 = vector.broadcast %cst_150 : f32 to vector<32x15xf32>
    %423 = vector.extract_strided_slice %388 {offsets = [0, 15], sizes = [32, 241], strides = [1, 1]} : vector<32x256xf32> to vector<32x241xf32>
    %424 = tpu.concatenate %423, %422 in 1 : vector<32x241xf32>, vector<32x15xf32> -> vector<32x256xf32>
    %425 = vector.extract_strided_slice %50 {offsets = [0, 0], sizes = [1, 256], strides = [1, 1]} : vector<2x256xf32> to vector<1x256xf32>
    %426 = vector.broadcast %425 : vector<1x256xf32> to vector<32x256xf32>
    %427 = arith.mulf %424, %426 : vector<32x256xf32>
    %428 = arith.truncf %427 : vector<32x256xf32> to vector<32x256xbf16>
    %cst_151 = arith.constant 0.000000e+00 : f32
    %429 = vector.broadcast %cst_151 : f32 to vector<32x16xf32>
    %430 = vector.extract_strided_slice %388 {offsets = [0, 16], sizes = [32, 240], strides = [1, 1]} : vector<32x256xf32> to vector<32x240xf32>
    %431 = tpu.concatenate %430, %429 in 1 : vector<32x240xf32>, vector<32x16xf32> -> vector<32x256xf32>
    %432 = arith.truncf %431 : vector<32x256xf32> to vector<32x256xbf16>
    %cst_152 = arith.constant 0.000000e+00 : f32
    %433 = vector.broadcast %cst_152 : f32 to vector<32x17xf32>
    %434 = vector.extract_strided_slice %388 {offsets = [0, 17], sizes = [32, 239], strides = [1, 1]} : vector<32x256xf32> to vector<32x239xf32>
    %435 = tpu.concatenate %434, %433 in 1 : vector<32x239xf32>, vector<32x17xf32> -> vector<32x256xf32>
    %436 = vector.extract_strided_slice %50 {offsets = [1, 0], sizes = [1, 256], strides = [1, 1]} : vector<2x256xf32> to vector<1x256xf32>
    %437 = vector.broadcast %436 : vector<1x256xf32> to vector<32x256xf32>
    %438 = arith.mulf %435, %437 : vector<32x256xf32>
    %439 = arith.truncf %438 : vector<32x256xf32> to vector<32x256xbf16>
    %440 = tpu.concatenate %395, %399, %406, %413, %414, %421, %428, %432, %439 in 0 : vector<32x256xbf16>, vector<32x256xbf16>, vector<32x256xbf16>, vector<32x256xbf16>, vector<32x256xbf16>, vector<32x256xbf16>, vector<32x256xbf16>, vector<32x256xbf16>, vector<32x256xbf16> -> vector<288x256xbf16>
    %c4_153 = arith.constant 4 : index
    %c0_154 = arith.constant 0 : index
    %c0_155 = arith.constant 0 : index
    %441 = vector.load %arg5[%c4_153, %c0_154, %c0_155] : memref<5x32x288xbf16, #tpu.memory_space<vmem>>, vector<1x32x288xbf16>
    %442 = vector.shape_cast %441 : vector<1x32x288xbf16> to vector<32x288xbf16>
    %cst_156 = arith.constant dense<0.000000e+00> : vector<32x256xf32>
    %443 = tpu.matmul %442, %440, %cst_156 {dimension_numbers = #tpu.dot_dimension_numbers<[1], [0], [0], [1], [0, 0, 1, 1], [], []>} : vector<32x288xbf16>, vector<288x256xbf16>, vector<32x256xf32> -> vector<32x256xf32>
    %444 = vector.broadcast %47 : vector<32x1xf32> to vector<32x256xf32>
    %445 = arith.mulf %443, %444 : vector<32x256xf32>
    %c4_157 = arith.constant 4 : index
    %c0_158 = arith.constant 0 : index
    %c0_159 = arith.constant 0 : index
    %446 = vector.load %arg8[%c4_157, %c0_158, %c0_159] : memref<5x1x256xf32, #tpu.memory_space<vmem>>, vector<1x1x256xf32>
    %447 = vector.shape_cast %446 : vector<1x1x256xf32> to vector<1x256xf32>
    %448 = vector.broadcast %447 : vector<1x256xf32> to vector<32x256xf32>
    %449 = arith.addf %445, %448 : vector<32x256xf32>
    %c4_160 = arith.constant 4 : index
    %c0_161 = arith.constant 0 : index
    %c0_162 = arith.constant 0 : index
    %450 = vector.load %arg7[%c4_160, %c0_161, %c0_162] : memref<5x32x1xf32, #tpu.memory_space<vmem>>, vector<1x32x1xf32>
    %451 = vector.shape_cast %450 : vector<1x32x1xf32> to vector<32x1xf32>
    %452 = vector.broadcast %451 : vector<32x1xf32> to vector<32x256xf32>
    %453 = arith.addf %449, %452 : vector<32x256xf32>
    %cst_163 = arith.constant 0.000000e+00 : f32
    %454 = vector.broadcast %cst_163 : f32 to vector<32x256xf32>
    %455 = arith.cmpf oge, %453, %454 : vector<32x256xf32>
    %cst_164 = arith.constant 1.41421354 : f32
    %cst_165 = arith.constant 0.282842726 : f32
    %456 = vector.broadcast %cst_164 : f32 to vector<32x256xf32>
    %457 = vector.broadcast %cst_165 : f32 to vector<32x256xf32>
    %458 = arith.select %455, %456, %457 : vector<32x256xi1>, vector<32x256xf32>
    %459 = arith.mulf %453, %458 : vector<32x256xf32>
    %460 = arith.truncf %305 : vector<3x64xf32> to vector<3x64xbf16>
    %c0_166 = arith.constant 0 : index
    %c0_167 = arith.constant 0 : index
    %461 = vector.load %arg12[%c0_166, %c0_167] : memref<64x256xbf16, #tpu.memory_space<vmem>>, vector<64x256xbf16>
    %cst_168 = arith.constant dense<0.000000e+00> : vector<3x256xf32>
    %462 = tpu.matmul %460, %461, %cst_168 {dimension_numbers = #tpu.dot_dimension_numbers<[1], [0], [0], [1], [0, 0, 1, 1], [], []>} : vector<3x64xbf16>, vector<64x256xbf16>, vector<3x256xf32> -> vector<3x256xf32>
    %c2_169 = arith.constant 2 : index
    %c0_170 = arith.constant 0 : index
    %c0_171 = arith.constant 0 : index
    %463 = vector.load %arg9[%c2_169, %c0_170, %c0_171] : memref<3x3x32xbf16, #tpu.memory_space<vmem>>, vector<1x3x32xbf16>
    %464 = vector.shape_cast %463 : vector<1x3x32xbf16> to vector<3x32xbf16>
    %465 = vector.extract_strided_slice %7 {offsets = [224, 5], sizes = [32, 1], strides = [1, 1]} : vector<256x6xf32> to vector<32x1xf32>
    %466 = vector.broadcast %465 : vector<32x1xf32> to vector<32x256xf32>
    %467 = arith.mulf %459, %466 : vector<32x256xf32>
    %468 = arith.truncf %467 : vector<32x256xf32> to vector<32x256xbf16>
    %cst_172 = arith.constant dense<0.000000e+00> : vector<3x256xf32>
    %469 = tpu.matmul %464, %468, %cst_172 {dimension_numbers = #tpu.dot_dimension_numbers<[1], [0], [0], [1], [0, 0, 1, 1], [], []>} : vector<3x32xbf16>, vector<32x256xbf16>, vector<3x256xf32> -> vector<3x256xf32>
    %c2_173 = arith.constant 2 : index
    %c0_174 = arith.constant 0 : index
    %c0_175 = arith.constant 0 : index
    %470 = vector.load %arg10[%c2_173, %c0_174, %c0_175] : memref<3x3x1xf32, #tpu.memory_space<vmem>>, vector<1x3x1xf32>
    %471 = vector.shape_cast %470 : vector<1x3x1xf32> to vector<3x1xf32>
    %472 = vector.broadcast %471 : vector<3x1xf32> to vector<3x256xf32>
    %473 = arith.addf %469, %472 : vector<3x256xf32>
    %474 = arith.addf %473, %462 : vector<3x256xf32>
    %c0_176 = arith.constant 0 : index
    %c0_177 = arith.constant 0 : index
    %c0_178 = arith.constant 0 : index
    %475 = vector.load %arg16[%c0_176, %c0_177, %c0_178] : memref<1x3x256xf32, #tpu.memory_space<vmem>>, vector<1x3x256xf32>
    %476 = vector.shape_cast %475 : vector<1x3x256xf32> to vector<3x256xf32>
    %477 = vector.shape_cast %474 : vector<3x256xf32> to vector<1x3x256xf32>
    tpu.vector_store %arg16[%c0_176, %c0_177, %c0_178], %477 {strides = array<i32>} : memref<1x3x256xf32, #tpu.memory_space<vmem>>, vector<1x3x256xf32>,
    return
  }
  func.func @transform_0(%arg0: i32) -> (i32, i32, i32) {
    %c0_i32 = arith.constant 0 : i32
    %c0_i32_0 = arith.constant 0 : i32
    %c0_i32_1 = arith.constant 0 : i32
    return %arg0, %c0_i32, %c0_i32_0 : i32, i32, i32
  }
  func.func @transform_1(%arg0: i32) -> (i32, i32) {
    %c0_i32 = arith.constant 0 : i32
    %c0_i32_0 = arith.constant 0 : i32
    %c0_i32_1 = arith.constant 0 : i32
    return %c0_i32, %c0_i32_0 : i32, i32
  }
  func.func @transform_2(%arg0: i32) -> (i32, i32) {
    %c0_i32 = arith.constant 0 : i32
    %c0_i32_0 = arith.constant 0 : i32
    %c0_i32_1 = arith.constant 0 : i32
    return %c0_i32, %c0_i32_0 : i32, i32
  }
  func.func @transform_3(%arg0: i32) -> (i32, i32) {
    %c0_i32 = arith.constant 0 : i32
    %c0_i32_0 = arith.constant 0 : i32
    %c0_i32_1 = arith.constant 0 : i32
    return %c0_i32, %c0_i32_0 : i32, i32
  }
  func.func @transform_4(%arg0: i32) -> (i32, i32, i32) {
    %c0_i32 = arith.constant 0 : i32
    %c0_i32_0 = arith.constant 0 : i32
    %c0_i32_1 = arith.constant 0 : i32
    %c0_i32_2 = arith.constant 0 : i32
    return %c0_i32, %c0_i32_0, %c0_i32_1 : i32, i32, i32
  }
  func.func @transform_5(%arg0: i32) -> (i32, i32, i32) {
    %c0_i32 = arith.constant 0 : i32
    %c0_i32_0 = arith.constant 0 : i32
    %c0_i32_1 = arith.constant 0 : i32
    %c0_i32_2 = arith.constant 0 : i32
    return %c0_i32, %c0_i32_0, %c0_i32_1 : i32, i32, i32
  }
  func.func @transform_6(%arg0: i32) -> (i32, i32, i32) {
    %c0_i32 = arith.constant 0 : i32
    %c0_i32_0 = arith.constant 0 : i32
    %c0_i32_1 = arith.constant 0 : i32
    %c0_i32_2 = arith.constant 0 : i32
    return %c0_i32, %c0_i32_0, %c0_i32_1 : i32, i32, i32
  }
  func.func @transform_7(%arg0: i32) -> (i32, i32, i32) {
    %c0_i32 = arith.constant 0 : i32
    %c0_i32_0 = arith.constant 0 : i32
    %c0_i32_1 = arith.constant 0 : i32
    %c0_i32_2 = arith.constant 0 : i32
    return %c0_i32, %c0_i32_0, %c0_i32_1 : i32, i32, i32
  }
  func.func @transform_8(%arg0: i32) -> (i32, i32, i32) {
    %c0_i32 = arith.constant 0 : i32
    %c0_i32_0 = arith.constant 0 : i32
    %c0_i32_1 = arith.constant 0 : i32
    %c0_i32_2 = arith.constant 0 : i32
    return %c0_i32, %c0_i32_0, %c0_i32_1 : i32, i32, i32
  }
  func.func @transform_9(%arg0: i32) -> (i32, i32, i32) {
    %c0_i32 = arith.constant 0 : i32
    %c0_i32_0 = arith.constant 0 : i32
    %c0_i32_1 = arith.constant 0 : i32
    %c0_i32_2 = arith.constant 0 : i32
    return %c0_i32, %c0_i32_0, %c0_i32_1 : i32, i32, i32
  }
  func.func @transform_10(%arg0: i32) -> (i32, i32) {
    %c0_i32 = arith.constant 0 : i32
    %c0_i32_0 = arith.constant 0 : i32
    %c0_i32_1 = arith.constant 0 : i32
    return %c0_i32, %c0_i32_0 : i32, i32
  }
  func.func @transform_11(%arg0: i32) -> (i32, i32) {
    %c0_i32 = arith.constant 0 : i32
    %c0_i32_0 = arith.constant 0 : i32
    %c0_i32_1 = arith.constant 0 : i32
    return %c0_i32, %c0_i32_0 : i32, i32
  }
  func.func @transform_12(%arg0: i32) -> (i32, i32) {
    %c0_i32 = arith.constant 0 : i32
    %c0_i32_0 = arith.constant 0 : i32
    %c0_i32_1 = arith.constant 0 : i32
    return %c0_i32, %c0_i32_0 : i32, i32
  }
  func.func @transform_13(%arg0: i32) -> (i32, i32) {
    %c0_i32 = arith.constant 0 : i32
    %c0_i32_0 = arith.constant 0 : i32
    %c0_i32_1 = arith.constant 0 : i32
    return %c0_i32, %c0_i32_0 : i32, i32
  }
  func.func @transform_14(%arg0: i32) -> (i32, i32) {
    %c0_i32 = arith.constant 0 : i32
    %c0_i32_0 = arith.constant 0 : i32
    %c0_i32_1 = arith.constant 0 : i32
    return %c0_i32, %c0_i32_0 : i32, i32
  }
  func.func @transform_15(%arg0: i32) -> (i32, i32, i32) {
    %c0_i32 = arith.constant 0 : i32
    %c0_i32_0 = arith.constant 0 : i32
    %c0_i32_1 = arith.constant 0 : i32
    return %arg0, %c0_i32, %c0_i32_0 : i32, i32, i32
  }
  func.func @transform_16(%arg0: i32) -> (i32, i32, i32) {
    %c0_i32 = arith.constant 0 : i32
    %c0_i32_0 = arith.constant 0 : i32
    %c0_i32_1 = arith.constant 0 : i32
    return %arg0, %c0_i32, %c0_i32_0 : i32, i32, i32
  }
}

</mosaic_0001>

<bundles_post_ra>
// kernel: _stylegan_pallas.1
= control target key start
LH: loop header
LB: loop body
LE: loop exit
PB: predicated region body
PF: predicated region fallthrough
CT: control target
= control target key end

     0   :  { %s6025_s21 = smov 0   ;;  %s7877_s0 = inlined_call_operand.vmem [shape: f32[2,64,6], index: 0, kind: input, shape index: {}]   ;;  %s7878_s1 = inlined_call_operand.vmem [shape: bf16[256,64], index: 1, kind: input, shape index: {}]   ;;  %s7879_s2 = inlined_call_operand.vmem [shape: f32[256,1], index: 2, kind: input, shape index: {}]   ;;  %s7880_s3 = inlined_call_operand.vmem [shape: f32[32,16], index: 3, kind: input, shape index: {}]   ;;  %s7881_s4 = inlined_call_operand.vmem [shape: bf16[5,32,288], index: 4, kind: input, shape index: {}]   ;;  %s7882_s5 = inlined_call_operand.vmem [shape: f32[5,32,32], index: 5, kind: input, shape index: {}]   ;;  %s7883_s6 = inlined_call_operand.vmem [shape: f32[5,32,1], index: 6, kind: input, shape index: {}]   ;;  %s7884_s7 = inlined_call_operand.vmem [shape: f32[5,1,256], index: 7, kind: input, shape index: {}]   ;;  %s7885_s8 = inlined_call_operand.vmem [shape: bf16[3,3,32], index: 8, kind: input, shape index: {}]   ;;  %s7886_s9 = inlined_call_operand.vmem [shape: f32[3,3,1], index: 9, kind: input, shape index: {}]   ;;  %s7887_s10 = inlined_call_operand.vmem [shape: bf16[16,64], index: 10, kind: input, shape index: {}]   ;;  %s7888_s11 = inlined_call_operand.vmem [shape: bf16[64,256], index: 11, kind: input, shape index: {}]   ;;  %s7889_s12 = inlined_call_operand.vmem [shape: f32[2,16], index: 12, kind: input, shape index: {}]   ;;  %s7890_s13 = inlined_call_operand.vmem [shape: f32[2,64], index: 13, kind: input, shape index: {}]   ;;  %s7891_s14 = inlined_call_operand.vmem [shape: f32[2,256], index: 14, kind: input, shape index: {}]   ;;  %s7892_s15 = inlined_call_operand.vmem [shape: f32[2,3,256], index: 15, kind: output, shape index: {0}]   ;;  %s7893_s16 = inlined_call_operand.vmem [shape: f32[2,32,64], index: 16, kind: output, shape index: {1}]  }
   0x1   :  { %7902 = sst [smem:[#allocation11_spill]] %s7877_s0 }
   0x2 LB: > { %s4876_s22 = sadd.s32 4294967295, %s5908_s21   ;;  %p4880_p0 = scmp.ge.s32.totalorder %s5908_s21, 1  ;;  %s5908_s21 = sphi %s6025_s21, %s27_s21  }
   0x3   : > { %p465_p1 = scmp.lt.s32.totalorder %s5908_s21, 3 }
   0x5   : > { %p466_p2 = pnand %p4880_p0, %p465_p1 }
   0x7   : > { %469 = sbr.rel (%p466_p2) target bundleno = 3183 (0xc6f), region = 80 }
   0xe   : > { %p520_p3 = scmp.lt.s32.totalorder %s4876_s22, 1  ;;  %v5792_v0 = vld [vmem:[%s7878_s1] sm:$0xff]   ;;  %vm852_vm0 = vcmask 523264   ;;  %v7894_v1 = vmov 0   ;;  %s7903_s28 = sld [smem:[#allocation11_spill]]  ;;  %v582_v15 = vld [vmem:[%s7879_s2 + $0x10] sm:$0xff] }
   0xf   : > { %5329 = vmatprep.mubr.msk.bf16.mxu0 %vm852_vm0, %v5792_v0  ;;  %5588 = vset.pattern.permute.xlu0 %v7894_v1  ;;  %v580_v14 = vld [vmem:[%s7879_s2] sm:$0xff]  ;;  %v581_v16 = vld [vmem:[%s7879_s2 + $0x8] sm:$0xff]  ;;  %v583_v17 = vld [vmem:[%s7879_s2 + $0x18] sm:$0xff]  ;;  %vm1070_vm1 = vcmask 261120   ;;  %s5913_s30 = smov 125   ;;  %s5914_s0 = smov 124  }
  0x10   : > { %s7939_s22 = smov (!%p520_p3, %s4876_s22), 1  ;;  %5589 = vset.pattern.permute.xlu1 %v7894_v1  ;;  %614 = vperm.xlu0 %5588, %v580_v14   ;;  %v5793_v18 = vld [vmem:[%s7878_s1 + $0x8] sm:$0xff]   ;;  %v5794_v19 = vld [vmem:[%s7878_s1 + $0x10] sm:$0xff]   ;;  %v588_v20 = vld [vmem:[%s7879_s2 + $0x40] sm:$0xff]  ;;  %s5917_s23 = smov 3   ;;  %vm1723_vm2 = vcmask 39936  }
  0x11   : > { %s5151_s25 = sshll.u32 %s7939_s22, 6  ;;  %624 = vperm.xlu1 %5589, %v582_v15   ;;  %v589_v21 = vld [vmem:[%s7879_s2 + $0x48] sm:$0xff]  ;;  %v590_v22 = vld [vmem:[%s7879_s2 + $0x50] sm:$0xff]  ;;  %v591_v23 = vld [vmem:[%s7879_s2 + $0x58] sm:$0xff]  ;;  %vm1821_vm3 = vcmask 121856   ;;  %vm1750_vm4 = vcmask 31744  }
  0x12   : > { %v5795_v24 = vld [vmem:[%s7878_s1 + $0x18] sm:$0xff]   ;;  %v5796_v25 = vld [vmem:[%s7878_s1 + $0x20] sm:$0xff]   ;;  %v593_v27 = vld [vmem:[%s7879_s2 + $0x68] sm:$0xff]  ;;  %vm1844_vm6 = vcmask 105472   ;;  %vm1769_vm8 = vcmask 23552   ;;  %vm1796_vm9 = vcmask 7168  }
  0x13   : > { %v592_v26 = vld [vmem:[%s7879_s2 + $0x60] sm:$0xff]  ;;  %v594_v28 = vld [vmem:[%s7879_s2 + $0x70] sm:$0xff]  ;;  %v595_v29 = vld [vmem:[%s7879_s2 + $0x78] sm:$0xff]  ;;  %vm1867_vm10 = vcmask 97280   ;;  %vm1886_vm12 = vcmask 89088   ;;  %s5923_s27 = smov 9  }
  0x14   : > { %s524_s29 = scalar_lea.vmem %s7903_s28, %s5151_s25  ;;  %619 = vperm.xlu0 %5588, %v581_v16   ;;  %v5797_v30 = vld [vmem:[%s7878_s1 + $0x28] sm:$0xff]   ;;  %v5798_v31 = vld [vmem:[%s7878_s1 + $0x30] sm:$0xff]   ;;  %v600_v32 = vld [vmem:[%s7879_s2 + $0xa0] sm:$0xff]  ;;  %s5911_s28 = smov 127  }
  0x15   : > { %v568_v2 = vld [vmem:[%s524_s29] sm:$0xff]  ;;  %v569_v3 = vld [vmem:[%s524_s29 + $0x8] sm:$0xff]  ;;  %v570_v4 = vld [vmem:[%s524_s29 + $0x10] sm:$0xff]  ;;  %629 = vperm.xlu1 %5589, %v583_v17   ;;  %s5915_s25 = smov 5   ;;  %s5925_s17 = smov 8  }
  0x16   : > { %v576_v5 = vpack.c.bf16 %v569_v3, %v568_v2  ;;  %v571_v6 = vld [vmem:[%s524_s29 + $0x18] sm:$0xff]  ;;  %v572_v8 = vld [vmem:[%s524_s29 + $0x20] sm:$0xff]  ;;  %v573_v9 = vld [vmem:[%s524_s29 + $0x28] sm:$0xff]  ;;  %s5927_s19 = smov 7   ;;  %s7898_s24 = smov 120  }
  0x17   : > { %v577_v7 = vpack.c.bf16 %v571_v6, %v570_v4  ;;  %v578_v10 = vpack.c.bf16 %v573_v9, %v572_v8  ;;  %v574_v11 = vld [vmem:[%s524_s29 + $0x30] sm:$0xff]  ;;  %v575_v12 = vld [vmem:[%s524_s29 + $0x38] sm:$0xff]  ;;  %v601_v33 = vld [vmem:[%s7879_s2 + $0xa8] sm:$0xff]  ;;  %s5912_s29 = smov 126   ;;  %s5153_s18 = sshll.u32 %s7939_s22, 5 }
  0x18   : > { %5321 = vmatprep.subr.bf16.mxu0 %v576_v5  ;;  %v579_v13 = vpack.c.bf16 %v575_v12, %v574_v11  ;;  %654 = vperm.xlu0 %5588, %v588_v20   ;;  %v602_v34 = vld [vmem:[%s7879_s2 + $0xb0] sm:$0xff]  ;;  %v603_v35 = vld [vmem:[%s7879_s2 + $0xb8] sm:$0xff]  ;;  %v5800_v37 = vld [vmem:[%s7878_s1 + $0x40] sm:$0xff]  }
  0x19   : > { %5322 = vmatpush3.bf16.msra.mxu0 %v576_v5  ;;  %659 = vperm.xlu1 %5589, %v589_v21   ;;  %v5799_v36 = vld [vmem:[%s7878_s1 + $0x38] sm:$0xff]   ;;  %v604_v38 = vld [vmem:[%s7879_s2 + $0xc0] sm:$0xff]  ;;  %v605_v39 = vld [vmem:[%s7879_s2 + $0xc8] sm:$0xff] }
  0x1a   : > { %5323 = vmatprep.subr.bf16.mxu0 %v577_v7  ;;  %v606_v40 = vld [vmem:[%s7879_s2 + $0xd0] sm:$0xff]  ;;  %v607_v41 = vld [vmem:[%s7879_s2 + $0xd8] sm:$0xff]  ;;  %v5801_v42 = vld [vmem:[%s7878_s1 + $0x48] sm:$0xff]  }
  0x1b   : > { %v5802_v43 = vld [vmem:[%s7878_s1 + $0x50] sm:$0xff]   ;;  %v5803_v44 = vld [vmem:[%s7878_s1 + $0x58] sm:$0xff]   ;;  %v5804_v45 = vld [vmem:[%s7878_s1 + $0x60] sm:$0xff]  }
  0x1c   : > { %664 = vperm.xlu0 %5588, %v590_v22   ;;  %v5805_v46 = vld [vmem:[%s7878_s1 + $0x68] sm:$0xff]   ;;  %v1062_v47 = vld [vmem:[%s7882_s5] sm:$0xff]  ;;  %v1065_v21 = vld [vmem:[%s7882_s5 + $0x18] sm:$0xff] }
  0x1d   : > { %5324 = vmatpush3.bf16.msra.mxu0 %v577_v7  ;;  %669 = vperm.xlu1 %5589, %v591_v23   ;;  %v1063_v11 = vld [vmem:[%s7882_s5 + $0x8] sm:$0xff]  ;;  %vm6478_vm5 = vmneg %vm1750_vm4  ;;  %vm2200_vm4 = vcmask 130048  }
  0x1e   : > { %5325 = vmatprep.subr.bf16.mxu0 %v578_v10  ;;  %5369 = vmatprep.mubr.msk.f32.mxu1 %vm1070_vm1, %v1062_v47  ;;  %vm4963_vm7 = vmpackc.low %vm6478_vm5, %vm6478_vm5  ;;  %vm5926_vm5 = vmmov 0  }
  0x1f   : > { %vm6519_vm11 = vmpackc.low %vm1867_vm10, %vm1867_vm10 }
  0x20   : > { %674 = vperm.xlu0 %5588, %v592_v26  }
  0x21   : > { %5326 = vmatpush3.bf16.msra.mxu0 %v578_v10  ;;  %679 = vperm.xlu1 %5589, %v593_v27  }
  0x22   : > { %5327 = vmatprep.subr.bf16.mxu0 %v579_v13 }
  0x24   : > { %684 = vperm.xlu0 %5588, %v594_v28  }
  0x25   : > { %5328 = vmatpush3.bf16.msra.mxu0 %v579_v13  ;;  %689 = vperm.xlu1 %5589, %v595_v29   ;;  %v1064_v13 = vld [vmem:[%s7882_s5 + $0x10] sm:$0xff]  ;;  %v4923_v29 = vld [vmem:[%s7882_s5 + $0x20] sm:$0xff] }
  0x28   : > { %5330 = vmatmul.mubr.msk.bf16.vlgmr.msra.gmra.mrb[0].mxu0 %vm852_vm0, %v5793_v18  ;;  %714 = vperm.xlu0 %5588, %v600_v32  }
  0x29   : > { %5333 = vmatprep.mubr.msk.bf16.mxu0 %vm852_vm0, %v5794_v19  ;;  %719 = vperm.xlu1 %5589, %v601_v33  }
  0x2c   : > { %724 = vperm.xlu0 %5588, %v602_v34  }
  0x2d   : > { %729 = vperm.xlu1 %5589, %v603_v35  }
  0x30   : > { %5334 = vmatmul.mubr.msk.bf16.gmra.mrb[4].mxu0 %vm852_vm0, %v5795_v24  ;;  %734 = vperm.xlu0 %5588, %v604_v38  }
  0x31   : > { %5337 = vmatprep.mubr.msk.bf16.mxu0 %vm852_vm0, %v5796_v25  ;;  %739 = vperm.xlu1 %5589, %v605_v39  }
  0x34   : > { %744 = vperm.xlu0 %5588, %v606_v40  }
  0x35   : > { %749 = vperm.xlu1 %5589, %v607_v41  }
  0x38   : > { %5338 = vmatmul.mubr.msk.bf16.gmra.mrb[8].mxu0 %vm852_vm0, %v5797_v30 }
  0x39   : > { %5341 = vmatprep.mubr.msk.bf16.mxu0 %vm852_vm0, %v5798_v31 }
  0x40   : > { %5342 = vmatmul.mubr.msk.bf16.gmra.mrb[12].mxu0 %vm852_vm0, %v5799_v36 }
  0x41   : > { %5345 = vmatprep.mubr.msk.bf16.mxu0 %vm852_vm0, %v5800_v37 }
  0x48   : > { %5346 = vmatmul.mubr.msk.bf16.gmra.mrb[16].mxu0 %vm852_vm0, %v5801_v42 }
  0x49   : > { %5349 = vmatprep.mubr.msk.bf16.mxu0 %vm852_vm0, %v5802_v43 }
  0x50   : > { %5350 = vmatmul.mubr.msk.bf16.gmra.mrb[20].mxu0 %vm852_vm0, %v5803_v44 }
  0x51   : > { %5353 = vmatprep.mubr.msk.bf16.mxu0 %vm852_vm0, %v5804_v45 }
  0x58   : > { %5354 = vmatmul.mubr.msk.bf16.gmra.mrb[24].mxu0 %vm852_vm0, %v5805_v46 }
  0x8f   : > { %v615_v48 = vpop.permute.xlu0 %614 }
  0x90   : > { %v625_v49 = vpop.permute.xlu1 %624 }
  0x93   : > { %v620_v50 = vpop.permute.xlu0 %619 }
  0x94   : > { %v630_v54 = vpop.permute.xlu1 %629 }
  0x97   : > { %v655_v62 = vpop.permute.xlu0 %654 }
  0x98   : > { %v660_v3 = vpop.permute.xlu1 %659 }
  0x9b   : > { %v665_v9 = vpop.permute.xlu0 %664 }
  0x9c   : > { %v670_v10 = vpop.permute.xlu1 %669 }
  0x9f   : > { %v675_v16 = vpop.permute.xlu0 %674 }
  0xa0   : > { %v680_v22 = vpop.permute.xlu1 %679 }
  0xa3   : > { %v685_v30 = vpop.permute.xlu0 %684 }
  0xa4   : > { %v690_v35 = vpop.permute.xlu1 %689 }
  0xa7   : > { %v715_v43 = vpop.permute.xlu0 %714 }
  0xa8   : > { %v720_v47 = vpop.permute.xlu1 %719 }
  0xfb   : > { %v5331_v51 = vpop.f32.mrb[0].mxu0 }
  0xfc   : > { %v944_v52 = vadd.f32 %v5331_v51, %v625_v49  ;;  %v935_v53 = vpop.f32.mrb[1].mxu0 }
  0xfd   : > { %v936_v55 = vadd.f32 %v935_v53, %v615_v48  ;;  %v5332_v56 = vpop.f32.mrb[2].mxu0  ;;  %v725_v53 = vpop.permute.xlu0 %724 }
  0xfe   : > { %v947_v57 = vadd.f32 %v5332_v56, %v630_v54  ;;  %v938_v58 = vpop.f32.mrb[3].mxu0  ;;  %v1068_v60 = vmul.f32 %v944_v52, %v944_v52  ;;  %v730_v54 = vpop.permute.xlu1 %729 }
  0xff   : > { %v939_v59 = vadd.f32 %v938_v58, %v620_v50  ;;  %1685 = vperm.xlu0 %5588, %v936_v55   ;;  %v1066_v63 = vmul.f32 %v936_v55, %v936_v55 }
 0x100   : > { %v1069_v61 = vmul.f32 %v947_v57, %v947_v57 }
 0x101   : > { %v1067_v0 = vmul.f32 %v939_v59, %v939_v59  ;;  %1690 = vperm.xlu1 %5589, %v939_v59   ;;  %v735_v58 = vpop.permute.xlu0 %734 }
 0x102   : > { %v5487_v2 = vpack.c.bf16 %v1069_v61, %v1068_v60 }
 0x103   : > { %1695 = vperm.xlu0 %5588, %v944_v52   ;;  %v5483_v4 = vpack.c.bf16 %v1067_v0, %v1066_v63  ;;  %v6161_v5 = vpop.f32.mrb[4].mxu0  ;;  %v740_v63 = vpop.permute.xlu1 %739 }
 0x104   : > { %v6163_v6 = vpop.f32.mrb[5].mxu0 }
 0x105   : > { %1700 = vperm.xlu1 %5589, %v947_v57   ;;  %5484 = vmatprep.subr.bf16.mxu1 %v5483_v4  ;;  %v6165_v7 = vpop.f32.mrb[6].mxu0 }
 0x106   : > { %5486 = vmatpush3.bf16.msra.mxu1 %v5483_v4  ;;  %v6167_v8 = vpop.f32.mrb[7].mxu0 }
 0x107   : > { %5488 = vmatprep.subr.bf16.mxu1 %v5487_v2 }
 0x10a   : > { %5490 = vmatpush3.bf16.msra.mxu1 %v5487_v2 }
 0x10b   : > { %v5339_v12 = vpop.f32.mrb[8].mxu0 }
 0x10c   : > { %v6175_v14 = vadd.f32 %v5339_v12, %v665_v9  ;;  %v967_v15 = vpop.f32.mrb[9].mxu0 }
 0x10d   : > { %v6177_v17 = vadd.f32 %v967_v15, %v655_v62  ;;  %v5340_v18 = vpop.f32.mrb[10].mxu0  ;;  %5370 = vmatmul.mubr.msk.f32.vlgmr.msra.gmra.mrb[0].mxu1 %vm1070_vm1, %v1063_v11  ;;  %v745_v11 = vpop.permute.xlu0 %744 }
 0x10e   : > { %v6180_v19 = vadd.f32 %v5340_v18, %v670_v10  ;;  %v970_v20 = vpop.f32.mrb[11].mxu0  ;;  %5372 = vmatprep.mubr.msk.f32.mxu1 %vm1070_vm1, %v1064_v13  ;;  %v1179_v24 = vmul.f32 %v6175_v14, %v6175_v14  ;;  %v750_v18 = vpop.permute.xlu1 %749 }
 0x10f   : > { %v6186_v23 = vadd.f32 %v970_v20, %v660_v3  ;;  %v1177_v26 = vmul.f32 %v6177_v17, %v6177_v17 }
 0x110   : > { %v1180_v25 = vmul.f32 %v6180_v19, %v6180_v19 }
 0x111   : > { %v1178_v27 = vmul.f32 %v6186_v23, %v6186_v23  ;;  %5373 = vmatmul.mubr.msk.f32.gmra.mrb[2].mxu1 %vm1070_vm1, %v1065_v21 }
 0x112   : > { %v5590_v28 = vpack.i.bf16 %v1180_v25, %v1179_v24  ;;  %5383 = vmatprep.mubr.msk.f32.mxu1 %vm1070_vm1, %v4923_v29 }
 0x113   : > { %v5343_v31 = vpop.f32.mrb[12].mxu0  ;;  %v5595_v32 = vpack.i.bf16 %v1178_v27, %v1177_v26 }
 0x114   : > { %v6201_v33 = vadd.f32 %v5343_v31, %v685_v30  ;;  %v983_v34 = vpop.f32.mrb[13].mxu0  ;;  %5591 = vrot.lane.b32.xlu1 %v5590_v28, %s5911_s28 }
 0x115   : > { %v6204_v36 = vadd.f32 %v983_v34, %v675_v16  ;;  %v5344_v37 = vpop.f32.mrb[14].mxu0  ;;  %5596 = vrot.lane.b32.xlu0 %v5595_v32, %s5911_s28 }
 0x116   : > { %v6207_v38 = vadd.f32 %v5344_v37, %v690_v35  ;;  %v986_v39 = vpop.f32.mrb[15].mxu0  ;;  %v1305_v41 = vmul.f32 %v6201_v33, %v6201_v33  ;;  %v1681_v35 = vld [vmem:[%s7880_s3 + $0x10] sm:$0xff] }
 0x117   : > { %v6209_v40 = vadd.f32 %v986_v39, %v680_v22  ;;  %v1303_v44 = vmul.f32 %v6204_v36, %v6204_v36  ;;  %v1682_v39 = vld [vmem:[%s7880_s3 + $0x18] sm:$0xff] }
 0x118   : > { %v1306_v42 = vmul.f32 %v6207_v38, %v6207_v38 }
 0x119   : > { %v1304_v45 = vmul.f32 %v6209_v40, %v6209_v40 }
 0x11a   : > { %v5600_v46 = vpack.i.bf16 %v1306_v42, %v1305_v41  ;;  %v1679_v42 = vld [vmem:[%s7880_s3] sm:$0xff] }
 0x11b   : > { %v5605_v48 = vpack.i.bf16 %v1304_v45, %v1303_v44  ;;  %v6219_v49 = vpop.f32.mrb[16].mxu0 }
 0x11c   : > { %5601 = vrot.lane.b32.xlu1 %v5600_v46, %s5912_s29  ;;  %v6221_v50 = vpop.f32.mrb[17].mxu0 }
 0x11d   : > { %5606 = vrot.lane.b32.xlu0 %v5605_v48, %s5912_s29  ;;  %v6223_v51 = vpop.f32.mrb[18].mxu0  ;;  %s5916_s29 = smov 4  }
 0x11e   : > { %7904 = vst [vmem:[#allocation2_spill] sm:$0xff] %v6223_v51  ;;  %v6225_v52 = vpop.f32.mrb[19].mxu0 }
 0x123   : > { %v5351_v55 = vpop.f32.mrb[20].mxu0 }
 0x124   : > { %v6227_v56 = vadd.f32 %v5351_v55, %v725_v53  ;;  %v1015_v57 = vpop.f32.mrb[21].mxu0 }
 0x125   : > { %v6229_v59 = vadd.f32 %v1015_v57, %v715_v43  ;;  %v5352_v60 = vpop.f32.mrb[22].mxu0 }
 0x126   : > { %v6231_v61 = vadd.f32 %v5352_v60, %v730_v54  ;;  %v1018_v62 = vpop.f32.mrb[23].mxu0  ;;  %v1431_v2 = vmul.f32 %v6227_v56, %v6227_v56 }
 0x127   : > { %v6233_v0 = vadd.f32 %v1018_v62, %v720_v47  ;;  %v1429_v4 = vmul.f32 %v6229_v59, %v6229_v59 }
 0x128   : > { %v1432_v3 = vmul.f32 %v6231_v61, %v6231_v61 }
 0x129   : > { %v1430_v9 = vmul.f32 %v6233_v0, %v6233_v0 }
 0x12a   : > { %v5610_v10 = vpack.i.bf16 %v1432_v3, %v1431_v2 }
 0x12b   : > { %v5355_v12 = vpop.f32.mrb[24].mxu0  ;;  %v5615_v13 = vpack.i.bf16 %v1430_v9, %v1429_v4 }
 0x12c   : > { %v6243_v15 = vadd.f32 %v5355_v12, %v745_v11  ;;  %v1031_v16 = vpop.f32.mrb[25].mxu0  ;;  %5611 = vrot.lane.b32.xlu1 %v5610_v10, %s5913_s30 }
 0x12d   : > { %v6246_v20 = vadd.f32 %v1031_v16, %v735_v58  ;;  %v5356_v21 = vpop.f32.mrb[26].mxu0  ;;  %5616 = vrot.lane.b32.xlu0 %v5615_v13, %s5913_s30  ;;  %v4924_v16 = vld [vmem:[%s7882_s5 + $0x28] sm:$0xff] }
 0x12e   : > { %v6249_v22 = vadd.f32 %v5356_v21, %v750_v18  ;;  %v1034_v24 = vpop.f32.mrb[27].mxu0  ;;  %v1557_v26 = vmul.f32 %v6243_v15, %v6243_v15  ;;  %v4925_v18 = vld [vmem:[%s7882_s5 + $0x30] sm:$0xff] }
 0x12f   : > { %v6251_v25 = vadd.f32 %v1034_v24, %v740_v63  ;;  %v1555_v28 = vmul.f32 %v6246_v20, %v6246_v20  ;;  %v1680_v63 = vld [vmem:[%s7880_s3 + $0x8] sm:$0xff]  ;;  %v4926_v24 = vld [vmem:[%s7882_s5 + $0x38] sm:$0xff] }
 0x130   : > { %v1558_v27 = vmul.f32 %v6249_v22, %v6249_v22 }
 0x131   : > { %v1556_v29 = vmul.f32 %v6251_v25, %v6251_v25 }
 0x132   : > { %v5620_v30 = vpack.i.bf16 %v1558_v27, %v1557_v26  ;;  %v4931_v26 = vld [vmem:[%s7882_s5 + $0x40] sm:$0xff] }
 0x133   : > { %v5625_v31 = vpack.i.bf16 %v1556_v29, %v1555_v28  ;;  %v4932_v28 = vld [vmem:[%s7882_s5 + $0x48] sm:$0xff]  ;;  %v4933_v29 = vld [vmem:[%s7882_s5 + $0x50] sm:$0xff] }
 0x134   : > { %5621 = vrot.lane.b32.xlu1 %v5620_v30, %s5914_s0 }
 0x135   : > { %5626 = vrot.lane.b32.xlu0 %v5625_v31, %s5914_s0 }
 0x17e   : > { %v1686_v32 = vpop.permute.xlu0 %1685 }
 0x17f   : > { %v6279_v45 = vmul.f32 %v1686_v32, %v1679_v42  ;;  %v4934_v32 = vld [vmem:[%s7882_s5 + $0x58] sm:$0xff] }
 0x180   : > { %v1691_v34 = vpop.permute.xlu1 %1690 }
 0x181   : > { %v6296_v2 = vmul.f32 %v1691_v34, %v1680_v63 }
 0x182   : > { %v1696_v37 = vpop.permute.xlu0 %1695 }
 0x183   : > { %v6269_v41 = vmul.f32 %v1696_v37, %v1681_v35  ;;  %v5635_v27 = vpack.i.bf16 %v6296_v2, %v6279_v45  ;;  %v4939_v37 = vld [vmem:[%s7882_s5 + $0x60] sm:$0xff] }
 0x184   : > { %v1701_v43 = vpop.permute.xlu1 %1700 }
 0x185   : > { %v6274_v44 = vmul.f32 %v1701_v43, %v1682_v39  ;;  %1813 = vrot.lane.b32.xlu1 %v6269_v41, %s5911_s28  ;;  %1715 = vrot.lane.b32.xlu0 %v6269_v41, %s5915_s25 }
 0x187   : > { %v5597_v46 = vpop.permute.xlu0 %5596  ;;  %v1808_v47 = vpack.c.bf16 %v6274_v44, %v6269_v41  ;;  %v6287_v60 = vpack.i.bf16 %v6274_v44, %v6269_v41 }
 0x188   : > { %v5599_v48 = vunpack.i.h.bf16 %v5597_v46  ;;  %v5598_v53 = vunpack.i.l.bf16 %v5597_v46  ;;  %v5592_v54 = vpop.permute.xlu1 %5591 }
 0x189   : > { %v5594_v55 = vunpack.i.h.bf16 %v5592_v54  ;;  %v5593_v57 = vunpack.i.l.bf16 %v5592_v54  ;;  %1717 = vrot.lane.b32.xlu1 %v6274_v44, %s5915_s25  ;;  %1711 = vrot.lane.b32.xlu0 %v6279_v45, %s5915_s25 }
 0x18a   : > { %v5491_v58 = vpack.c.bf16 %v5599_v48, %v5598_v53 }
 0x18b   : > { %v5495_v62 = vpack.c.bf16 %v5594_v55, %v5593_v57  ;;  %v5809_v57 = vld [vmem:[%s7878_s1 + $0x70] sm:$0xff]  }
 0x18c   : > { %5492 = vmatprep.subr.bf16.mxu1 %v5491_v58  ;;  %5357 = vmatprep.mubr.msk.bf16.mxu0 %vm852_vm0, %v5809_v57  ;;  %v584_v57 = vld [vmem:[%s7879_s2 + $0x20] sm:$0xff] }
 0x18d   : > { %5631 = vrot.lane.b32.xlu1 %v6287_v60, %s5916_s29  ;;  %1809 = vrot.lane.b32.xlu0 %v6279_v45, %s5911_s28 }
 0x18e   : > { %5494 = vmatpush3.bf16.msra.mxu1 %v5491_v58  ;;  %v5602_v3 = vpop.permute.xlu1 %5601 }
 0x18f   : > { %5496 = vmatprep.subr.bf16.mxu1 %v5495_v62  ;;  %v5607_v4 = vpop.permute.xlu0 %5606  ;;  %v5604_v11 = vunpack.i.h.bf16 %v5602_v3  ;;  %v5603_v12 = vunpack.i.l.bf16 %v5602_v3  ;;  %v5810_v3 = vld [vmem:[%s7878_s1 + $0x78] sm:$0xff]  }
 0x190   : > { %v5609_v9 = vunpack.i.h.bf16 %v5607_v4  ;;  %v5608_v10 = vunpack.i.l.bf16 %v5607_v4  ;;  %v4940_v4 = vld [vmem:[%s7882_s5 + $0x68] sm:$0xff]  ;;  %5358 = vmatmul.mubr.msk.bf16.gmra.mrb[28].mxu0 %vm852_vm0, %v5810_v3  ;;  %v587_v3 = vld [vmem:[%s7879_s2 + $0x38] sm:$0xff] }
 0x191   : > { %1713 = vrot.lane.b32.xlu1 %v6296_v2, %s5915_s25  ;;  %1832 = vrot.lane.b32.xlu0 %v6279_v45, %s5913_s30  ;;  %v5503_v21 = vpack.c.bf16 %v5604_v11, %v5603_v12  ;;  %v4942_v11 = vld [vmem:[%s7882_s5 + $0x78] sm:$0xff]  ;;  %v4947_v12 = vld [vmem:[%s7882_s5 + $0x80] sm:$0xff]  ;;  %s5919_s25 = smov 123  }
 0x192   : > { %5498 = vmatpush3.bf16.msra.mxu1 %v5495_v62  ;;  %v5499_v13 = vpack.c.bf16 %v5609_v9, %v5608_v10  ;;  %v4941_v9 = vld [vmem:[%s7882_s5 + $0x70] sm:$0xff] }
 0x194   : > { %5500 = vmatprep.subr.bf16.mxu1 %v5499_v13 }
 0x195   : > { %1811 = vrot.lane.b32.xlu1 %v6296_v2, %s5911_s28  ;;  %1757 = vrot.lane.b32.xlu0 %v6279_v45, %s5917_s23 }
 0x196   : > { %5384 = vmatmul.mubr.msk.f32.vlgmr.msra.gmra.mrb[4].mxu1 %vm1070_vm1, %v4924_v16  ;;  %v4948_v16 = vld [vmem:[%s7882_s5 + $0x88] sm:$0xff] }
 0x197   : > { %5502 = vmatpush3.bf16.msra.mxu1 %v5499_v13  ;;  %5386 = vmatprep.mubr.msk.f32.mxu1 %vm1070_vm1, %v4925_v18  ;;  %v1807_v13 = vpack.c.bf16 %v6296_v2, %v6279_v45  ;;  %v5814_v18 = vld [vmem:[%s7881_s4 + $0x8] ss:$12 sps:$4 sm:$0xff]  }
 0x198   : > { %5504 = vmatprep.subr.bf16.mxu1 %v5503_v21  ;;  %5435 = vmatprep.mubr.msk.bf16.mxu0 %vm1070_vm1, %v5814_v18 }
 0x199   : > { %1838 = vrot.lane.b32.xlu1 %v6274_v44, %s5913_s30  ;;  %1815 = vrot.lane.b32.xlu0 %v6274_v44, %s5911_s28 }
 0x19a   : > { %5387 = vmatmul.mubr.msk.f32.gmra.mrb[6].mxu1 %vm1070_vm1, %v4926_v24  ;;  %v5808_v24 = vld [vmem:[%s7881_s4 + $0x4] ss:$12 sps:$4 sm:$0xff]  }
 0x19b   : > { %5506 = vmatpush3.bf16.msra.mxu1 %v5503_v21  ;;  %5397 = vmatprep.mubr.msk.f32.mxu1 %vm1070_vm1, %v4931_v26  ;;  %v4950_v21 = vld [vmem:[%s7882_s5 + $0x98] sm:$0xff] }
 0x19d   : > { %1763 = vrot.lane.b32.xlu1 %v6274_v44, %s5917_s23  ;;  %5636 = vrot.lane.b32.xlu0 %v5635_v27, %s5916_s29  ;;  %s5924_s29 = smov 121  }
 0x19e   : > { %v5612_v30 = vpop.permute.xlu1 %5611  ;;  %5398 = vmatmul.mubr.msk.f32.vlgmr.msra.gmra.mrb[8].mxu1 %vm1070_vm1, %v4932_v28 }
 0x19f   : > { %v5617_v31 = vpop.permute.xlu0 %5616  ;;  %5400 = vmatprep.mubr.msk.f32.mxu1 %vm1070_vm1, %v4933_v29  ;;  %v5614_v39 = vunpack.i.h.bf16 %v5612_v30  ;;  %v5613_v42 = vunpack.i.l.bf16 %v5612_v30 }
 0x1a0   : > { %v5619_v34 = vunpack.i.h.bf16 %v5617_v31  ;;  %v5618_v35 = vunpack.i.l.bf16 %v5617_v31 }
 0x1a1   : > { %1834 = vrot.lane.b32.xlu1 %v6296_v2, %s5913_s30  ;;  %1836 = vrot.lane.b32.xlu0 %v6269_v41, %s5913_s30  ;;  %v5511_v46 = vpack.c.bf16 %v5614_v39, %v5613_v42  ;;  %s5918_s30 = smov 1  }
 0x1a2   : > { %v5507_v43 = vpack.c.bf16 %v5619_v34, %v5618_v35  ;;  %5401 = vmatmul.mubr.msk.f32.gmra.mrb[10].mxu1 %vm1070_vm1, %v4934_v32 }
 0x1a3   : > { %5411 = vmatprep.mubr.msk.f32.mxu1 %vm1070_vm1, %v4939_v37 }
 0x1a4   : > { %5508 = vmatprep.subr.bf16.mxu1 %v5507_v43 }
 0x1a5   : > { %1759 = vrot.lane.b32.xlu1 %v6296_v2, %s5917_s23  ;;  %1761 = vrot.lane.b32.xlu0 %v6269_v41, %s5917_s23 }
 0x1a6   : > { %5510 = vmatpush3.bf16.msra.mxu1 %v5507_v43  ;;  %v5622_v48 = vpop.permute.xlu1 %5621  ;;  %v2077_v43 = vld [vmem:[%s7883_s6 + $0x18] sm:$0xff] }
 0x1a7   : > { %5512 = vmatprep.subr.bf16.mxu1 %v5511_v46  ;;  %v5627_v53 = vpop.permute.xlu0 %5626  ;;  %v5624_v58 = vunpack.i.h.bf16 %v5622_v48  ;;  %v5623_v62 = vunpack.i.l.bf16 %v5622_v48  ;;  %v1728_v48 = vlaneseq }
 0x1a8   : > { %v5629_v54 = vunpack.i.h.bf16 %v5627_v53  ;;  %v5628_v55 = vunpack.i.l.bf16 %v5627_v53 }
 0x1a9   : > { %1788 = vrot.lane.b32.xlu1 %v6269_v41, %s5918_s30  ;;  %1784 = vrot.lane.b32.xlu0 %v6279_v45, %s5918_s30  ;;  %v5519_v10 = vpack.c.bf16 %v5624_v58, %v5623_v62  ;;  %v6432_v58 = vshrl.u32 %v1728_v48, 7 }
 0x1aa   : > { %5514 = vmatpush3.bf16.msra.mxu1 %v5511_v46  ;;  %v5515_v63 = vpack.c.bf16 %v5629_v54, %v5628_v55  ;;  %v2076_v46 = vld [vmem:[%s7883_s6 + $0x10] sm:$0xff]  ;;  %v585_v55 = vld [vmem:[%s7879_s2 + $0x28] sm:$0xff] }
 0x1ac   : > { %5516 = vmatprep.subr.bf16.mxu1 %v5515_v63 }
 0x1ad   : > { %1786 = vrot.lane.b32.xlu1 %v6296_v2, %s5918_s30  ;;  %5641 = vrot.lane.b32.xlu0 %v5635_v27, %s5914_s0 }
 0x1ae   : > { %5412 = vmatmul.mubr.msk.f32.vlgmr.msra.gmra.mrb[12].mxu1 %vm1070_vm1, %v4940_v4  ;;  %v586_v4 = vld [vmem:[%s7879_s2 + $0x30] sm:$0xff] }
 0x1af   : > { %5518 = vmatpush3.bf16.msra.mxu1 %v5515_v63  ;;  %5414 = vmatprep.mubr.msk.f32.mxu1 %vm1070_vm1, %v4941_v9  ;;  %v6441_v9 = vsub.s32 0, %v6432_v58 }
 0x1b0   : > { %5520 = vmatprep.subr.bf16.mxu1 %v5519_v10 }
 0x1b1   : > { %5646 = vrot.lane.b32.xlu1 %v6287_v60, %s5914_s0  ;;  %1790 = vrot.lane.b32.xlu0 %v6274_v44, %s5918_s30  ;;  %v4949_v60 = vld [vmem:[%s7882_s5 + $0x90] sm:$0xff]  ;;  %s5935_s0 = smov 113  }
 0x1b2   : > { %5415 = vmatmul.mubr.msk.f32.gmra.mrb[14].mxu1 %vm1070_vm1, %v4942_v11 }
 0x1b3   : > { %5522 = vmatpush3.bf16.msra.mxu1 %v5519_v10  ;;  %5425 = vmatprep.mubr.msk.f32.mxu1 %vm1070_vm1, %v4947_v12  ;;  %v1676_v12 = vld [vmem:[%s7889_s12] sm:$0x3] }
 0x1b4   : > { %5214 = vmatprep.subr.bf16.mxu1 %v1807_v13  ;;  %v6453_v18 = vrot.slane %v1676_v12, %v6441_v9 }
 0x1b5   : > { %1876 = vrot.lane.b32.xlu1 %v6296_v2, %s5919_s25  ;;  %1874 = vrot.lane.b32.xlu0 %v6279_v45, %s5919_s25  ;;  %v2075_v45 = vld [vmem:[%s7883_s6 + $0x8] sm:$0xff]  ;;  %v2074_v2 = vld [vmem:[%s7883_s6] sm:$0xff] }
 0x1b6   : > { %5426 = vmatmul.mubr.msk.f32.vlgmr.msra.gmra.mrb[16].mxu1 %vm1070_vm1, %v4948_v16  ;;  %v5920_v16 = vmov 1  }
 0x1b7   : > { %5428 = vmatprep.mubr.msk.f32.mxu1 %vm1070_vm1, %v4949_v60  ;;  %v6450_v60 = vsub.s32 1, %v6432_v58 }
 0x1b9   : > { %1880 = vrot.lane.b32.xlu1 %v6274_v44, %s5919_s25  ;;  %1878 = vrot.lane.b32.xlu0 %v6269_v41, %s5919_s25  ;;  %s5929_s25 = smov 119  }
 0x1ba   : > { %5429 = vmatmul.mubr.msk.f32.gmra.mrb[18].mxu1 %vm1070_vm1, %v4950_v21 }
 0x1bb   : > { %1973 = vmatprep.mubr.bf16.mxu1 %v5808_v24 }
 0x1bd   : > { %2085 = vperm.xlu1 %5589, %v2075_v45   ;;  %2080 = vperm.xlu0 %5588, %v2074_v2  }
 0x1e0   : > { %v5371_v26 = vpop.f32.mrb[0].mxu1 }
 0x1e1   : > { %v1155_v27 = vadd.f32 1e-08, %v5371_v26  ;;  %v1149_v28 = vpop.f32.mrb[1].mxu1 }
 0x1e2   : > { %v1150_v29 = vadd.f32 1e-08, %v1149_v28 }
 0x1e3   : > { %5861 = vrsqrt.f32 %v1155_v27 }
 0x1e4   : > { %5863 = vrsqrt.f32 %v1150_v29  ;;  %v5374_v30 = vpop.f32.mrb[2].mxu1 }
 0x1e5   : > { %v1165_v31 = vadd.f32 1e-08, %v5374_v30  ;;  %v1159_v32 = vpop.f32.mrb[3].mxu1  ;;  %v6464_v30 = vrot.slane %v1676_v12, %v6450_v60 }
 0x1e6   : > { %v1160_v34 = vadd.f32 1e-08, %v1159_v32 }
 0x1e7   : > { %5865 = vrsqrt.f32 %v1165_v31 }
 0x1e8   : > { %5867 = vrsqrt.f32 %v1160_v34 }
 0x1ed   : > { %v5862_v35 = vpop.eup %5861 }
 0x1ee   : > { %v5864_v37 = vpop.eup %5863  ;;  %2046 = vperm.xlu1 %5589, %v5862_v35  }
 0x1ef   : > { %2041 = vperm.xlu0 %5588, %v5864_v37  }
 0x1f1   : > { %v5866_v39 = vpop.eup %5865 }
 0x1f2   : > { %v5868_v42 = vpop.eup %5867  ;;  %2056 = vperm.xlu1 %5589, %v5866_v39  }
 0x1f3   : > { %2051 = vperm.xlu0 %5588, %v5868_v42  }
 0x1f6   : > { %2095 = vperm.xlu1 %5589, %v2077_v43  }
 0x1f7   : > { %v1814_v53 = vpop.permute.xlu1 %1813  ;;  %v1716_v54 = vpop.permute.xlu0 %1715  ;;  %2090 = vperm.xlu0 %5588, %v2076_v46  }
 0x1f8   : > { %v1726_v28 = vsel %vm1723_vm2, 0.0, %v1716_v54 }
 0x1f9   : > { %v1734_v35 = vmul.f32 %v6453_v18, %v1726_v28 }
 0x1fa   : > { %639 = vperm.xlu1 %5589, %v585_v55  }
 0x1fb   : > { %v1718_v62 = vpop.permute.xlu1 %1717  ;;  %v1712_v63 = vpop.permute.xlu0 %1711  ;;  %634 = vperm.xlu0 %5588, %v584_v57  }
 0x1fc   : > { %v1724_v13 = vsel %vm1723_vm2, 0.0, %v1712_v63  ;;  %v1727_v45 = vsel %vm1723_vm2, 0.0, %v1718_v62 }
 0x1fd   : > { %v1732_v26 = vmul.f32 %v6453_v18, %v1724_v13 }
 0x1fe   : > { %649 = vperm.xlu1 %5589, %v587_v3  }
 0x1ff   : > { %v6443_v10 = vpop.permute.xlu1 %5631  ;;  %v1810_v11 = vpop.permute.xlu0 %1809  ;;  %644 = vperm.xlu0 %5588, %v586_v4  }
 0x200   : > { %v1822_v29 = vsel %vm1821_vm3, %v1810_v11, 0.0  ;;  %v5633_v63 = vunpack.i.l.bf16 %v6443_v10 }
 0x201   : > { %v1826_v37 = vmul.f32 %v1822_v29, %v6464_v30 }
 0x202   : > { %5651 = vset.pattern.permute.xlu1 %v5920_v16 }
 0x203   : > { %v1714_v21 = vpop.permute.xlu1 %1713  ;;  %v1833_v24 = vpop.permute.xlu0 %1832  ;;  %2263 = vperm.xlu1 %5651, %v6186_v23   ;;  %5650 = vset.pattern.permute.xlu0 %v5920_v16  ;;  %v1735_v23 = vmul.f32 %v6453_v18, %v1727_v45 }
 0x204   : > { %v1725_v2 = vsel %vm1723_vm2, 0.0, %v1714_v21  ;;  %2258 = vperm.xlu0 %5650, %v6177_v17   ;;  %v1845_v3 = vsel %vm1844_vm6, %v1833_v24, 0.0 }
 0x205   : > { %v1733_v27 = vmul.f32 %v6453_v18, %v1725_v2  ;;  %v1737_v42 = vpack.c.bf16 %v1735_v23, %v1734_v35  ;;  %v1849_v21 = vmul.f32 %v1845_v3, %v6453_v18 }
 0x207   : > { %v1736_v31 = vpack.c.bf16 %v1733_v27, %v1732_v26  ;;  %v1812_v32 = vpop.permute.xlu1 %1811  ;;  %v1758_v34 = vpop.permute.xlu0 %1757  ;;  %2268 = vperm.xlu1 %5651, %v6175_v14  }
 0x208   : > { %v1823_v17 = vsel %vm1821_vm3, %v1812_v32, 0.0  ;;  %2273 = vperm.xlu0 %5650, %v6180_v19   ;;  %v1824_v19 = vsel %vm1821_vm3, %v1814_v53, 0.0  ;;  %v5634_v53 = vunpack.i.h.bf16 %v6443_v10  ;;  %v1770_v2 = vsel %vm1769_vm8, 0.0, %v1758_v34 }
 0x209   : > { %v1827_v39 = vmul.f32 %v1823_v17, %v6464_v30  ;;  %5215 = vmatpush3.bf16.msra.mxu1 %v1736_v31  ;;  %v1828_v62 = vmul.f32 %v1824_v19, %v6464_v30  ;;  %v1778_v17 = vmul.f32 %v6464_v30, %v1770_v2 }
 0x20a   : > { %5216 = vmatprep.subr.bf16.mxu1 %v1808_v47  ;;  %v4969_v24 = vpack.c.bf16 %v5634_v53, %v5633_v63 }
 0x20b   : > { %v1839_v43 = vpop.permute.xlu1 %1838  ;;  %v1816_v46 = vpop.permute.xlu0 %1815  ;;  %v1830_v48 = vpack.c.bf16 %v1827_v39, %v1826_v37 }
 0x20c   : > { %v1825_v14 = vsel %vm1821_vm3, %v1816_v46, 0.0  ;;  %v1848_v26 = vsel %vm1844_vm6, %v1839_v43, 0.0 }
 0x20d   : > { %5217 = vmatpush3.bf16.msra.mxu1 %v1737_v42  ;;  %v1829_v55 = vmul.f32 %v1825_v14, %v6464_v30  ;;  %v1852_v35 = vmul.f32 %v1848_v26, %v6453_v18 }
 0x20e   : > { %5218 = vmatprep.subr.bf16.mxu1 %v1830_v48 }
 0x20f   : > { %v1764_v41 = vpop.permute.xlu1 %1763  ;;  %v5637_v44 = vpop.permute.xlu0 %5636  ;;  %v1831_v13 = vpack.c.bf16 %v1829_v55, %v1828_v62 }
 0x210   : > { %v5639_v47 = vunpack.i.h.bf16 %v5637_v44  ;;  %v5638_v57 = vunpack.i.l.bf16 %v5637_v44  ;;  %v1773_v37 = vsel %vm1769_vm8, 0.0, %v1764_v41 }
 0x211   : > { %v1781_v14 = vmul.f32 %v6464_v30, %v1773_v37 }
 0x212   : > { %v4964_v4 = vpack.c.bf16 %v5639_v47, %v5638_v57 }
 0x213   : > { %v1835_v11 = vpop.permute.xlu1 %1834  ;;  %v1837_v12 = vpop.permute.xlu0 %1836 }
 0x214   : > { %v1846_v16 = vsel %vm1844_vm6, %v1835_v11, 0.0  ;;  %5219 = vmatpush3.bf16.msk.msra.mxu1 %vm4963_vm7, %v4964_v4  ;;  %v1847_v10 = vsel %vm1844_vm6, %v1837_v12, 0.0  ;;  %vm2296_vm6 = vcmask 72704  }
 0x215   : > { %v1850_v45 = vmul.f32 %v1846_v16, %v6453_v18  ;;  %5220 = vmatprep.subr.bf16.mxu1 %v1831_v13  ;;  %v1851_v23 = vmul.f32 %v1847_v10, %v6453_v18 }
 0x217   : > { %v1760_v27 = vpop.permute.xlu1 %1759  ;;  %v1762_v28 = vpop.permute.xlu0 %1761  ;;  %v1853_v29 = vpack.c.bf16 %v1850_v45, %v1849_v21  ;;  %v1854_v48 = vpack.c.bf16 %v1852_v35, %v1851_v23 }
 0x218   : > { %v1771_v31 = vsel %vm1769_vm8, 0.0, %v1760_v27  ;;  %v1772_v32 = vsel %vm1769_vm8, 0.0, %v1762_v28  ;;  %5221 = vmatpush3.bf16.msk.msra.mxu1 %vm4963_vm7, %v4969_v24  ;;  %vm2393_vm7 = vcmask 515072   ;;  %vm2323_vm8 = vcmask 64512  }
 0x219   : > { %v1779_v34 = vmul.f32 %v6464_v30, %v1771_v31  ;;  %5222 = vmatprep.subr.bf16.mxu1 %v1853_v29  ;;  %v1780_v42 = vmul.f32 %v6464_v30, %v1772_v32  ;;  %v5806_v31 = vld [vmem:[%s7881_s4] ss:$12 sps:$4 sm:$0xff]   ;;  %vm4997_vm10 = vmneg %vm2323_vm8 }
 0x21b   : > { %v1782_v39 = vpack.c.bf16 %v1779_v34, %v1778_v17  ;;  %v1789_v43 = vpop.permute.xlu1 %1788  ;;  %v1785_v46 = vpop.permute.xlu0 %1784  ;;  %v1783_v54 = vpack.c.bf16 %v1781_v14, %v1780_v42  ;;  %v5811_v17 = vld [vmem:[%s7881_s4 + $0x1c] ss:$12 sps:$4 sm:$0xff]   ;;  %v5813_v14 = vld [vmem:[%s7881_s4 + $0x18] ss:$12 sps:$4 sm:$0xff]  }
 0x21c   : > { %v1797_v19 = vsel %vm1796_vm9, 0.0, %v1785_v46  ;;  %v1799_v3 = vsel %vm1796_vm9, 0.0, %v1789_v43 }
 0x21d   : > { %5223 = vmatpush3.bf16.msra.mxu1 %v1782_v39  ;;  %v1801_v62 = vmul.f32 %v1797_v19, %v6453_v18  ;;  %v1803_v10 = vmul.f32 %v1799_v3, %v6453_v18  ;;  %v5815_v19 = vld [vmem:[%s7881_s4 + $0x20] ss:$12 sps:$4 sm:$0xff]  }
 0x21e   : > { %5224 = vmatprep.subr.bf16.mxu1 %v1854_v48 }
 0x21f   : > { %v1787_v55 = vpop.permute.xlu1 %1786  ;;  %v5642_v44 = vpop.permute.xlu0 %5641 }
 0x220   : > { %v1798_v47 = vsel %vm1796_vm9, 0.0, %v1787_v55  ;;  %v5644_v41 = vunpack.i.h.bf16 %v5642_v44  ;;  %v5643_v57 = vunpack.i.l.bf16 %v5642_v44 }
 0x221   : > { %v1802_v53 = vmul.f32 %v1798_v47, %v6453_v18  ;;  %5225 = vmatpush3.bf16.msra.mxu1 %v1783_v54 }
 0x222   : > { %v4972_v4 = vpack.c.bf16 %v5644_v41, %v5643_v57 }
 0x223   : > { %v1805_v11 = vpack.c.bf16 %v1802_v53, %v1801_v62  ;;  %v5647_v12 = vpop.permute.xlu1 %5646  ;;  %v1791_v13 = vpop.permute.xlu0 %1790 }
 0x224   : > { %v5649_v16 = vunpack.i.h.bf16 %v5647_v12  ;;  %v5648_v21 = vunpack.i.l.bf16 %v5647_v12  ;;  %v1800_v45 = vsel %vm1796_vm9, 0.0, %v1791_v13  ;;  %5226 = vmatprep.subr.msk.bf16.mxu1 %vm6519_vm11, %v4972_v4 }
 0x225   : > { %v1804_v24 = vmul.f32 %v1800_v45, %v6453_v18  ;;  %5227 = vmatpush3.bf16.msra.mxu1 %v1805_v11 }
 0x226   : > { %v4975_v2 = vpack.c.bf16 %v5649_v16, %v5648_v21 }
 0x227   : > { %v1806_v26 = vpack.c.bf16 %v1804_v24, %v1803_v10  ;;  %v1877_v27 = vpop.permute.xlu1 %1876  ;;  %v1875_v28 = vpop.permute.xlu0 %1874 }
 0x228   : > { %v1888_v29 = vsel %vm1886_vm12, %v1877_v27, 0.0  ;;  %v1887_v23 = vsel %vm1886_vm12, %v1875_v28, 0.0  ;;  %5228 = vmatprep.subr.msk.bf16.mxu1 %vm6519_vm11, %v4975_v2  ;;  %vm2416_vm11 = vcmask 465920  }
 0x229   : > { %v1892_v32 = vmul.f32 %v1888_v29, %v6464_v30  ;;  %v1891_v18 = vmul.f32 %v1887_v23, %v6464_v30  ;;  %5229 = vmatpush3.bf16.msra.mxu1 %v1806_v26 }
 0x22b   : > { %v1881_v34 = vpop.permute.xlu1 %1880  ;;  %v1879_v35 = vpop.permute.xlu0 %1878  ;;  %v1895_v37 = vpack.c.bf16 %v1892_v32, %v1891_v18 }
 0x22c   : > { %v1890_v39 = vsel %vm1886_vm12, %v1881_v34, 0.0  ;;  %v1889_v42 = vsel %vm1886_vm12, %v1879_v35, 0.0  ;;  %1974 = vmatmul.mubr.bf16.vlgmr.msra.gmra.mrb[20].mxu1 %v5806_v31  ;;  %vm2342_vm12 = vcmask 56320  }
 0x22d   : > { %v1894_v43 = vmul.f32 %v1890_v39, %v6464_v30  ;;  %v1893_v46 = vmul.f32 %v1889_v42, %v6464_v30  ;;  %5431 = vmatprep.subr.bf16.mxu0 %v1895_v37  ;;  %1981 = vmatprep.mubr.bf16.mxu1 %v5811_v17  ;;  %v7896_v39 = vmov 0.0  }
 0x22e   : > { %5432 = vmatpush3.bf16.msra.mxu0 %v1895_v37  ;;  %v5816_v37 = vld [vmem:[%s7887_s10] sm:$0xff]  }
 0x22f   : > { %v1896_v48 = vpack.c.bf16 %v1894_v43, %v1893_v46  ;;  %5447 = vmatprep.subr.bf16.mxu1 %v5816_v37 }
 0x230   : > { %5448 = vmatpush3.bf16.msra.mxu1 %v5816_v37 }
 0x231   : > { %5433 = vmatprep.subr.bf16.mxu0 %v1896_v48 }
 0x232   : > { %5434 = vmatpush3.bf16.msra.mxu0 %v1896_v48 }
 0x233   : > { %5439 = vmatprep.subr.bf16.mxu0 %v7896_v39 }
 0x234   : > { %1982 = vmatmul.mubr.bf16.gmra.mrb[24].mxu1 %v5813_v14 }
 0x235   : > { %5436 = vmatmul.mubr.msk.bf16.vlgmr.msra.gmra.mrb[32].mxu0 %vm1070_vm1, %v5815_v19 }
 0x23c   : > { %v6552_v54 = vpop.permute.xlu1 %2085  ;;  %v6556_v55 = vpop.permute.xlu0 %2080 }
 0x263   : > { %v6586_v29 = vpop.f32.mrb[28].mxu0 }
 0x264   : > { %7909 = vst [vmem:[#allocation3_spill] sm:$0xff] %v6586_v29  ;;  %v6588_v23 = vpop.f32.mrb[29].mxu0 }
 0x265   : > { %7910 = vst [vmem:[#allocation4_spill] sm:$0xff] %v6588_v23 }
 0x269   : > { %v6554_v30 = vpop.f32.mrb[4].mxu1 }
 0x26a   : > { %v6558_v44 = vpop.f32.mrb[5].mxu1 }
 0x26d   : > { %v6560_v47 = vpop.permute.xlu1 %2046  ;;  %v6562_v41 = vpop.f32.mrb[6].mxu1 }
 0x26e   : > { %v6564_v57 = vpop.permute.xlu0 %2041  ;;  %v6566_v62 = vpop.f32.mrb[7].mxu1 }
 0x271   : > { %v6568_v53 = vpop.permute.xlu1 %2056  ;;  %v6570_v63 = vpop.f32.mrb[8].mxu1 }
 0x272   : > { %v2052_v3 = vpop.permute.xlu0 %2051  ;;  %v6572_v4 = vpop.f32.mrb[9].mxu1 }
 0x275   : > { %v6574_v11 = vpop.permute.xlu1 %2095  ;;  %v6576_v12 = vpop.f32.mrb[10].mxu1 }
 0x276   : > { %v6578_v13 = vpop.permute.xlu0 %2090  ;;  %v6580_v16 = vpop.f32.mrb[11].mxu1 }
 0x279   : > { %v640_v21 = vpop.permute.xlu1 %639 }
 0x27a   : > { %v955_v45 = vadd.f32 %v6167_v8, %v640_v21  ;;  %v635_v10 = vpop.permute.xlu0 %634  ;;  %v6592_v8 = vpop.f32.mrb[30].mxu0 }
 0x27b   : > { %v952_v24 = vadd.f32 %v6163_v6, %v635_v10  ;;  %7911 = vst [vmem:[#allocation5_spill] sm:$0xff] %v6592_v8  ;;  %v6596_v6 = vpop.f32.mrb[31].mxu0 }
 0x27c   : > { %2122 = vperm.xlu0 %5650, %v955_v45   ;;  %7912 = vst [vmem:[#allocation6_spill] sm:$0xff] %v6596_v6 }
 0x27d   : > { %v650_v2 = vpop.permute.xlu1 %649  ;;  %2117 = vperm.xlu1 %5651, %v952_v24   ;;  %v2063_v24 = vld [vmem:[%s7884_s7] sm:$0x3] }
 0x27e   : > { %v963_v26 = vadd.f32 %v6165_v7, %v650_v2  ;;  %v645_v27 = vpop.permute.xlu0 %644 }
 0x27f   : > { %v960_v28 = vadd.f32 %v6161_v5, %v645_v27 }
 0x280   : > { %2132 = vperm.xlu0 %5650, %v963_v26  }
 0x281   : > { %2127 = vperm.xlu1 %5651, %v960_v28   ;;  %v6590_v31 = vpop.f32.mrb[12].mxu1 }
 0x282   : > { %v6594_v32 = vpop.f32.mrb[13].mxu1  ;;  %v6616_v21 = vpop.permute.xlu1 %2263 }
 0x283   : > { %v6618_v45 = vpop.permute.xlu0 %2258 }
 0x284   : > { %5673 = vset.pattern.permute.xlu0 %v7894_v1 }
 0x285   : > { %v6599_v7 = vpop.f32.mrb[14].mxu1  ;;  %5672 = vset.pattern.permute.xlu1 %v7894_v1  ;;  %v2068_v1 = vrot.slane %v2063_v24, %v6441_v9 }
 0x286   : > { %v6602_v5 = vpop.f32.mrb[15].mxu1 }
 0x289   : > { %v6604_v18 = vpop.f32.mrb[16].mxu1 }
 0x28a   : > { %7913 = vst [vmem:[#allocation7_spill] sm:$0xff] %v6604_v18  ;;  %v6606_v17 = vpop.f32.mrb[17].mxu1  ;;  %v2269_v18 = vpop.permute.xlu1 %2268 }
 0x28b   : > { %7914 = vst [vmem:[#allocation8_spill] sm:$0xff] %v6606_v17 }
 0x28d   : > { %v6608_v34 = vpop.f32.mrb[18].mxu1 }
 0x28e   : > { %7915 = vst [vmem:[#allocation9_spill] sm:$0xff] %v6608_v34  ;;  %v6610_v35 = vpop.f32.mrb[19].mxu1 }
 0x28f   : > { %7916 = vst [vmem:[#allocation10_spill] sm:$0xff] %v6610_v35  ;;  %v2274_v35 = vpop.permute.xlu0 %2273 }
 0x2ff   : > { %v5230_v42 = vpop.f32.mrb[20].mxu1 }
 0x300   : > { %v5231_v43 = vpop.f32.mrb[21].mxu1 }
 0x301   : > { %v5232_v46 = vadd.f32 %v5231_v43, %v5230_v42  ;;  %v5233_v48 = vpop.f32.mrb[22].mxu1 }
 0x302   : > { %v5234_v14 = vpop.f32.mrb[23].mxu1 }
 0x303   : > { %v5235_v19 = vadd.f32 %v5234_v14, %v5233_v48 }
 0x307   : > { %v5236_v10 = vpop.f32.mrb[24].mxu1 }
 0x308   : > { %v5237_v2 = vpop.f32.mrb[25].mxu1  ;;  %v5437_v26 = vpop.f32.mrb[32].mxu0 }
 0x309   : > { %v5238_v27 = vadd.f32 %v5237_v2, %v5236_v10  ;;  %v5239_v28 = vpop.f32.mrb[26].mxu1  ;;  %v2024_v37 = vpop.f32.mrb[33].mxu0 }
 0x30a   : > { %v2025_v42 = vadd.f32 %v5232_v46, %v2024_v37  ;;  %v5240_v43 = vpop.f32.mrb[27].mxu1  ;;  %v5438_v39 = vpop.f32.mrb[34].mxu0 }
 0x30b   : > { %v2033_v48 = vadd.f32 %v5437_v26, %v5238_v27  ;;  %v5241_v14 = vadd.f32 %v5240_v43, %v5239_v28  ;;  %v2027_v8 = vpop.f32.mrb[35].mxu0  ;;  %v2123_v28 = vpop.permute.xlu0 %2122 }
 0x30c   : > { %v2059_v29 = vmul.f32 %v6564_v57, %v2025_v42  ;;  %v2028_v6 = vadd.f32 %v5235_v19, %v2027_v8  ;;  %v2118_v37 = vpop.permute.xlu1 %2117 }
 0x30d   : > { %v2061_v23 = vmul.f32 %v2052_v3, %v2033_v48  ;;  %v2036_v34 = vadd.f32 %v5438_v39, %v5241_v14  ;;  %v5922_v3 = vmov 0.28284273   ;;  %v7917_v14 = vmov 0.0  }
 0x30e   : > { %v2070_v17 = vadd.f32 %v2068_v1, %v2059_v29  ;;  %v2060_v10 = vmul.f32 %v6560_v47, %v2028_v6  ;;  %5443 = vmatprep.mubr.msk.bf16.mxu0 %vm5926_vm5, %v7917_v14 }
 0x30f   : > { %v2072_v2 = vadd.f32 %v2068_v1, %v2061_v23  ;;  %v2062_v51 = vmul.f32 %v6568_v53, %v2036_v34 }
 0x310   : > { %v2098_v46 = vadd.f32 %v6556_v55, %v2070_v17  ;;  %v2071_v24 = vadd.f32 %v2068_v1, %v2060_v10  ;;  %v2128_v6 = vpop.permute.xlu1 %2127 }
 0x311   : > { %v2100_v26 = vadd.f32 %v6578_v13, %v2072_v2  ;;  %v2073_v27 = vadd.f32 %v2068_v1, %v2062_v51 }
 0x312   : > { %vm2102_vm13 = vcmp.ge.f32.partialorder %v2098_v46, 0.0  ;;  %v2099_v57 = vadd.f32 %v6552_v54, %v2071_v24  ;;  %v2133_v54 = vpop.permute.xlu0 %2132 }
 0x313   : > { %vm2104_vm14 = vcmp.ge.f32.partialorder %v2100_v26, 0.0  ;;  %v2106_v29 = vsel %vm2102_vm13, 1.4142135, %v5922_v3  ;;  %v2101_v47 = vadd.f32 %v6574_v11, %v2073_v27  ;;  %vm6756_vm13 = vmpackc.low %vm4997_vm10, %vm4997_vm10 }
 0x314   : > { %v2108_v23 = vsel %vm2104_vm14, 1.4142135, %v5922_v3  ;;  %v2110_v53 = vmul.f32 %v2106_v29, %v2098_v46  ;;  %vm2103_vm15 = vcmp.ge.f32.partialorder %v2099_v57, 0.0  ;;  %vm2439_vm14 = vcmask 457728  }
 0x315   : > { %v2112_v55 = vmul.f32 %v2108_v23, %v2100_v26  ;;  %vm2105_vm2 = vcmp.ge.f32.partialorder %v2101_v47, 0.0  ;;  %v2107_v13 = vsel %vm2103_vm15, 1.4142135, %v5922_v3  ;;  %v5819_v23 = vld [vmem:[%s7881_s4 + $0x34] ss:$12 sps:$4 sm:$0xff]   ;;  %vm2458_vm15 = vcmask 449536  }
 0x316   : > { %v2109_v1 = vsel %vm2105_vm2, 1.4142135, %v5922_v3  ;;  %v2111_v51 = vmul.f32 %v2107_v13, %v2099_v57  ;;  %v2135_v34 = vmul.f32 %v2118_v37, %v2110_v53  ;;  %v5016_v13 = vld [vmem:[%s7883_s6 + $0x20] sm:$0xff]  ;;  %vm6787_vm2 = vmpackc.low %vm2439_vm14, %vm2439_vm14 }
 0x317   : > { %v2113_v8 = vmul.f32 %v2109_v1, %v2101_v47  ;;  %v2137_v11 = vmul.f32 %v2128_v6, %v2112_v55  ;;  %v1276_v47 = vadd.f32 1e-08, %v6558_v44  ;;  %v1291_v44 = vadd.f32 1e-08, %v6562_v41  ;;  %v5018_v41 = vld [vmem:[%s7883_s6 + $0x30] sm:$0xff]  ;;  %v5019_v6 = vld [vmem:[%s7883_s6 + $0x38] sm:$0xff] }
 0x318   : > { %v2190_v17 = vpack.c.bf16 %v2111_v51, %v2110_v53  ;;  %v2136_v39 = vmul.f32 %v2123_v28, %v2111_v51  ;;  %v5820_v53 = vld [vmem:[%s7881_s4 + $0x38] ss:$12 sps:$4 sm:$0xff]  }
 0x319   : > { %v2191_v19 = vpack.c.bf16 %v2113_v8, %v2112_v55  ;;  %v2138_v42 = vmul.f32 %v2133_v54, %v2113_v8  ;;  %v5017_v8 = vld [vmem:[%s7883_s6 + $0x28] sm:$0xff]  ;;  %v5930_v54 = vmov 2  }
 0x31a   : > { %5449 = vmatprep.mubr.msk.bf16.mxu1 %vm2200_vm4, %v2190_v17  ;;  %v2139_v43 = vpack.c.bf16 %v2136_v39, %v2135_v34  ;;  %v7918_v17 = vmov 0  }
 0x31b   : > { %5450 = vmatmul.mubr.msk.bf16.vlgmr.msra.gmra.mrb[28].mxu1 %vm2200_vm4, %v2191_v19  ;;  %v2140_v48 = vpack.c.bf16 %v2138_v42, %v2137_v11 }
 0x31c   : > { %5440 = vmatpush3.bf16.msra.mxu0 %v2139_v43  ;;  %5457 = vmatprep.mubr.msk.bf16.mxu1 %vm1070_vm1, %v5820_v53 }
 0x31d   : > { %5441 = vmatprep.subr.bf16.mxu0 %v7917_v14 }
 0x320   : > { %5442 = vmatpush3.bf16.msra.mxu0 %v2140_v48 }
 0x3ee   : > { %v5451_v10 = vpop.f32.mrb[28].mxu1 }
 0x3ef   : > { %v6638_v2 = vmul.f32 %v5451_v10, %v2269_v18  ;;  %v2241_v46 = vpop.f32.mrb[29].mxu1 }
 0x3f0   : > { %v5452_v24 = vpop.f32.mrb[30].mxu1  ;;  %v2276_v28 = vmul.f32 %v6618_v45, %v2241_v46  ;;  %v1281_v45 = vadd.f32 1e-08, %v6554_v30  ;;  %v1286_v30 = vadd.f32 1e-08, %v6566_v62 }
 0x3f1   : > { %v6640_v26 = vmul.f32 %v5452_v24, %v2274_v35  ;;  %2385 = vrot.lane.b32.xlu0 %v6638_v2, %s5911_s28  ;;  %v2244_v27 = vpop.f32.mrb[31].mxu1  ;;  %2288 = vrot.lane.b32.xlu1 %v6638_v2, %s5923_s27 }
 0x3f2   : > { %v2277_v37 = vmul.f32 %v6616_v21, %v2244_v27  ;;  %v2114_v21 = vld [vmem:[%s7885_s8] sm:$0x3]  ;;  %5869 = vrsqrt.f32 %v1281_v45 }
 0x3f3   : > { %v5652_v18 = vpack.i.bf16 %v6640_v26, %v6638_v2  ;;  %v2380_v57 = vpack.c.bf16 %v6640_v26, %v6638_v2  ;;  %5444 = vmatmul.mubr.msk.bf16.vlgmr.msra.gmra.mrb[36].mxu0 %vm1070_vm1, %v2114_v21  ;;  %5871 = vrsqrt.f32 %v1276_v47 }
 0x3f4   : > { %v2379_v35 = vpack.c.bf16 %v2277_v37, %v2276_v28  ;;  %v5657_v29 = vpack.i.bf16 %v2277_v37, %v2276_v28  ;;  %2546 = vmatprep.mubr.bf16.mxu0 %v5819_v23  ;;  %5873 = vrsqrt.f32 %v1286_v30 }
 0x3f5   : > { %2408 = vrot.lane.b32.xlu1 %v6638_v2, %s5924_s29  ;;  %2290 = vrot.lane.b32.xlu0 %v6640_v26, %s5923_s27  ;;  %5875 = vrsqrt.f32 %v1291_v44 }
 0x3f6   : > { %5252 = vmatprep.subr.bf16.mxu0 %v2379_v35 }
 0x3f9   : > { %2284 = vrot.lane.b32.xlu1 %v2276_v28, %s5923_s27  ;;  %5653 = vrot.lane.b32.xlu0 %v5652_v18, %s5925_s17 }
 0x3fc   : > { %v5870_v62 = vpop.eup %5869 }
 0x3fd   : > { %2381 = vrot.lane.b32.xlu1 %v2276_v28, %s5911_s28  ;;  %2410 = vrot.lane.b32.xlu0 %v6640_v26, %s5924_s29  ;;  %v5872_v55 = vpop.eup %5871 }
 0x3fe   : > { %v5874_v1 = vpop.eup %5873 }
 0x3ff   : > { %v5876_v51 = vpop.eup %5875 }
 0x401   : > { %2404 = vrot.lane.b32.xlu1 %v2276_v28, %s5924_s29  ;;  %2286 = vrot.lane.b32.xlu0 %v2277_v37, %s5923_s27 }
 0x405   : > { %2330 = vrot.lane.b32.xlu1 %v2276_v28, %s5927_s19  ;;  %2383 = vrot.lane.b32.xlu0 %v2277_v37, %s5911_s28 }
 0x409   : > { %2387 = vrot.lane.b32.xlu1 %v6640_v26, %s5911_s28  ;;  %2336 = vrot.lane.b32.xlu0 %v6640_v26, %s5927_s19 }
 0x40d   : > { %5658 = vrot.lane.b32.xlu1 %v5657_v29, %s5925_s17  ;;  %2406 = vrot.lane.b32.xlu0 %v2277_v37, %s5924_s29 }
 0x411   : > { %2334 = vrot.lane.b32.xlu1 %v6638_v2, %s5927_s19  ;;  %2332 = vrot.lane.b32.xlu0 %v2277_v37, %s5927_s19 }
 0x415   : > { %2357 = vrot.lane.b32.xlu1 %v2276_v28, %s5918_s30  ;;  %2361 = vrot.lane.b32.xlu0 %v6638_v2, %s5918_s30 }
 0x419   : > { %2363 = vrot.lane.b32.xlu1 %v6640_v26, %s5918_s30  ;;  %2359 = vrot.lane.b32.xlu0 %v2277_v37, %s5918_s30 }
 0x41d   : > { %5668 = vrot.lane.b32.xlu1 %v5657_v29, %s7898_s24  ;;  %2446 = vrot.lane.b32.xlu0 %v2276_v28, %s5929_s25 }
 0x421   : > { %2448 = vrot.lane.b32.xlu1 %v2277_v37, %s5929_s25  ;;  %5663 = vrot.lane.b32.xlu0 %v5652_v18, %s7898_s24  ;;  %s5933_s24 = smov 15  }
 0x425   : > { %2450 = vrot.lane.b32.xlu1 %v6638_v2, %s5929_s25  ;;  %2452 = vrot.lane.b32.xlu0 %v6640_v26, %s5929_s25 }
 0x429   : > { %2614 = vperm.xlu1 %5672, %v5872_v55   ;;  %2619 = vperm.xlu0 %5673, %v5870_v62  }
 0x42d   : > { %2624 = vperm.xlu1 %5672, %v5874_v1   ;;  %2655 = vperm.xlu0 %5673, %v5016_v13  }
 0x431   : > { %2629 = vperm.xlu1 %5672, %v5876_v51   ;;  %2665 = vperm.xlu0 %5673, %v5018_v41  }
 0x435   : > { %2660 = vperm.xlu1 %5672, %v5017_v8   ;;  %5674 = vset.pattern.permute.xlu0 %v5930_v54 }
 0x436   : > { %2691 = vperm.xlu0 %5674, %v6204_v36  }
 0x439   : > { %2670 = vperm.xlu1 %5672, %v5019_v6  }
 0x43a   : > { %2706 = vperm.xlu0 %5674, %v6207_v38   ;;  %v1677_v38 = vld [vmem:[%s7890_s13] sm:$0x3] }
 0x43b   : > { %v6741_v29 = vrot.slane %v1677_v38, %v6450_v60 }
 0x43d   : > { %5675 = vset.pattern.permute.xlu1 %v5930_v54 }
 0x43e   : > { %2696 = vperm.xlu1 %5675, %v6209_v40   ;;  %5697 = vset.pattern.permute.xlu0 %v7918_v17 }
 0x442   : > { %2701 = vperm.xlu1 %5675, %v6201_v33   ;;  %v6732_v33 = vrot.slane %v1677_v38, %v6441_v9 }
 0x446   : > { %5696 = vset.pattern.permute.xlu1 %v7918_v17 }
 0x463   : > { %v2289_v34 = vpop.permute.xlu1 %2288  ;;  %v2386_v39 = vpop.permute.xlu0 %2385 }
 0x464   : > { %v2299_v18 = vsel %vm2296_vm6, 0.0, %v2289_v34  ;;  %v2396_v8 = vsel %vm2393_vm7, %v2386_v39, 0.0 }
 0x465   : > { %v2307_v53 = vmul.f32 %v6732_v33, %v2299_v18 }
 0x467   : > { %v6723_v19 = vpop.permute.xlu1 %2408  ;;  %v2291_v36 = vpop.permute.xlu0 %2290 }
 0x468   : > { %v2300_v24 = vsel %vm2296_vm6, 0.0, %v2291_v36 }
 0x469   : > { %v2308_v21 = vmul.f32 %v6732_v33, %v2300_v24 }
 0x46b   : > { %v2285_v11 = vpop.permute.xlu1 %2284  ;;  %v6725_v42 = vpop.permute.xlu0 %5653  ;;  %v2310_v55 = vpack.c.bf16 %v2308_v21, %v2307_v53 }
 0x46c   : > { %v2297_v40 = vsel %vm2296_vm6, 0.0, %v2285_v11  ;;  %v5656_v39 = vunpack.i.h.bf16 %v6725_v42 }
 0x46d   : > { %v2305_v28 = vmul.f32 %v6732_v33, %v2297_v40 }
 0x46f   : > { %v2382_v43 = vpop.permute.xlu1 %2381  ;;  %v2411_v48 = vpop.permute.xlu0 %2410 }
 0x470   : > { %v2394_v35 = vsel %vm2393_vm7, %v2382_v43, 0.0  ;;  %v5655_v43 = vunpack.i.l.bf16 %v6725_v42  ;;  %v2419_v42 = vsel %vm2416_vm11, %v6723_v19, 0.0 }
 0x471   : > { %v2398_v44 = vmul.f32 %v2394_v35, %v6741_v29 }
 0x473   : > { %v2405_v10 = vpop.permute.xlu1 %2404  ;;  %v2287_v46 = vpop.permute.xlu0 %2286 }
 0x474   : > { %v2298_v27 = vsel %vm2296_vm6, 0.0, %v2287_v46  ;;  %v2417_v38 = vsel %vm2416_vm11, %v2405_v10, 0.0  ;;  %v5005_v10 = vpack.c.bf16 %v5656_v39, %v5655_v43 }
 0x475   : > { %v2306_v37 = vmul.f32 %v6732_v33, %v2298_v27  ;;  %v2421_v35 = vmul.f32 %v2417_v38, %v6732_v33 }
 0x477   : > { %v2309_v45 = vpack.c.bf16 %v2306_v37, %v2305_v28  ;;  %v2331_v47 = vpop.permute.xlu1 %2330  ;;  %v2384_v23 = vpop.permute.xlu0 %2383  ;;  %v2420_v37 = vsel %vm2416_vm11, %v2411_v48, 0.0 }
 0x478   : > { %v2395_v30 = vsel %vm2393_vm7, %v2384_v23, 0.0  ;;  %v2343_v21 = vsel %vm2342_vm12, 0.0, %v2331_v47  ;;  %v2424_v23 = vmul.f32 %v2420_v37, %v6732_v33  ;;  %v2423_v47 = vmul.f32 %v2419_v42, %v6732_v33 }
 0x479   : > { %v2399_v62 = vmul.f32 %v2395_v30, %v6741_v29  ;;  %5253 = vmatpush3.bf16.msra.mxu0 %v2309_v45 }
 0x47a   : > { %5254 = vmatprep.subr.bf16.mxu0 %v2380_v57  ;;  %v2400_v57 = vmul.f32 %v2396_v8, %v6741_v29  ;;  %v2426_v8 = vpack.c.bf16 %v2424_v23, %v2423_v47 }
 0x47b   : > { %v2388_v13 = vpop.permute.xlu1 %2387  ;;  %v2337_v1 = vpop.permute.xlu0 %2336  ;;  %v2402_v41 = vpack.c.bf16 %v2399_v62, %v2398_v44  ;;  %v2351_v62 = vmul.f32 %v6741_v29, %v2343_v21 }
 0x47c   : > { %v2397_v51 = vsel %vm2393_vm7, %v2388_v13, 0.0 }
 0x47d   : > { %5255 = vmatpush3.bf16.msra.mxu0 %v2310_v55  ;;  %v2401_v54 = vmul.f32 %v2397_v51, %v6741_v29  ;;  %v2346_v55 = vsel %vm2342_vm12, 0.0, %v2337_v1 }
 0x47e   : > { %5256 = vmatprep.subr.bf16.mxu0 %v2402_v41 }
 0x47f   : > { %v5659_v6 = vpop.permute.xlu1 %5658  ;;  %v2407_v34 = vpop.permute.xlu0 %2406  ;;  %v2403_v28 = vpack.c.bf16 %v2401_v54, %v2400_v57  ;;  %v2354_v54 = vmul.f32 %v6741_v29, %v2346_v55 }
 0x480   : > { %v5661_v36 = vunpack.i.h.bf16 %v5659_v6  ;;  %v5660_v2 = vunpack.i.l.bf16 %v5659_v6  ;;  %v2418_v26 = vsel %vm2416_vm11, %v2407_v34, 0.0 }
 0x481   : > { %v2422_v46 = vmul.f32 %v2418_v26, %v6732_v33 }
 0x482   : > { %v5000_v40 = vpack.c.bf16 %v5661_v36, %v5660_v2 }
 0x483   : > { %v2335_v24 = vpop.permute.xlu1 %2334  ;;  %v2333_v27 = vpop.permute.xlu0 %2332  ;;  %v2425_v44 = vpack.c.bf16 %v2422_v46, %v2421_v35 }
 0x484   : > { %v2344_v18 = vsel %vm2342_vm12, 0.0, %v2333_v27  ;;  %5257 = vmatpush3.bf16.msk.msra.mxu0 %vm6756_vm13, %v5000_v40  ;;  %v2345_v48 = vsel %vm2342_vm12, 0.0, %v2335_v24  ;;  %v5901_v40 = vld [vmem:[%s7887_s10] sm:$0xff]  }
 0x485   : > { %5258 = vmatprep.subr.bf16.mxu0 %v2403_v28  ;;  %v2352_v45 = vmul.f32 %v6741_v29, %v2344_v18  ;;  %v2353_v19 = vmul.f32 %v6741_v29, %v2345_v48 }
 0x487   : > { %v2358_v30 = vpop.permute.xlu1 %2357  ;;  %v2362_v53 = vpop.permute.xlu0 %2361  ;;  %v2355_v13 = vpack.c.bf16 %v2352_v45, %v2351_v62  ;;  %v2356_v34 = vpack.c.bf16 %v2354_v54, %v2353_v19 }
 0x488   : > { %5259 = vmatpush3.bf16.msk.msra.mxu0 %vm6756_vm13, %v5005_v10  ;;  %v2369_v36 = vsel %vm1796_vm9, 0.0, %v2358_v30  ;;  %v2371_v46 = vsel %vm1796_vm9, 0.0, %v2362_v53 }
 0x489   : > { %5260 = vmatprep.subr.bf16.mxu0 %v2425_v44  ;;  %v2373_v38 = vmul.f32 %v2369_v36, %v6732_v33  ;;  %v2375_v45 = vmul.f32 %v2371_v46, %v6732_v33 }
 0x48b   : > { %v2364_v41 = vpop.permute.xlu1 %2363  ;;  %v2360_v51 = vpop.permute.xlu0 %2359 }
 0x48c   : > { %v2370_v6 = vsel %vm1796_vm9, 0.0, %v2360_v51  ;;  %5261 = vmatpush3.bf16.msra.mxu0 %v2355_v13  ;;  %v2372_v57 = vsel %vm1796_vm9, 0.0, %v2364_v41  ;;  %v5817_v13 = vld [vmem:[%s7881_s4 + $0x30] ss:$12 sps:$4 sm:$0xff]  }
 0x48d   : > { %5262 = vmatprep.subr.bf16.mxu0 %v2426_v8  ;;  %v2374_v2 = vmul.f32 %v2370_v6, %v6732_v33  ;;  %v2376_v28 = vmul.f32 %v2372_v57, %v6732_v33  ;;  %v5822_v8 = vld [vmem:[%s7881_s4 + $0x4c] ss:$12 sps:$4 sm:$0xff]   ;;  %v5821_v6 = vld [vmem:[%s7881_s4 + $0x50] ss:$12 sps:$4 sm:$0xff]  }
 0x48f   : > { %v5669_v1 = vpop.permute.xlu1 %5668  ;;  %v2447_v26 = vpop.permute.xlu0 %2446  ;;  %v2377_v37 = vpack.c.bf16 %v2374_v2, %v2373_v38  ;;  %v2378_v53 = vpack.c.bf16 %v2376_v28, %v2375_v45 }
 0x490   : > { %v5671_v39 = vunpack.i.h.bf16 %v5669_v1  ;;  %v5670_v43 = vunpack.i.l.bf16 %v5669_v1  ;;  %5263 = vmatpush3.bf16.msra.mxu0 %v2356_v34  ;;  %v2459_v27 = vsel %vm2458_vm15, %v2447_v26, 0.0  ;;  %v5824_v34 = vld [vmem:[%s7881_s4 + $0x48] ss:$12 sps:$4 sm:$0xff]  }
 0x491   : > { %v2463_v23 = vmul.f32 %v2459_v27, %v6741_v29 }
 0x492   : > { %v5008_v24 = vpack.c.bf16 %v5671_v39, %v5670_v43 }
 0x493   : > { %v2449_v18 = vpop.permute.xlu1 %2448  ;;  %v5664_v35 = vpop.permute.xlu0 %5663 }
 0x494   : > { %v2460_v21 = vsel %vm2458_vm15, %v2449_v18, 0.0  ;;  %v5666_v42 = vunpack.i.h.bf16 %v5664_v35  ;;  %v5665_v10 = vunpack.i.l.bf16 %v5664_v35  ;;  %5264 = vmatprep.subr.msk.bf16.mxu0 %vm6787_vm2, %v5008_v24  ;;  %v5015_v35 = vld [vmem:[%s7884_s7 + $0x2] sm:$0x3] }
 0x495   : > { %v2464_v48 = vmul.f32 %v2460_v21, %v6741_v29  ;;  %5265 = vmatpush3.bf16.msra.mxu0 %v2377_v37 }
 0x496   : > { %v5011_v30 = vpack.c.bf16 %v5666_v42, %v5665_v10 }
 0x497   : > { %v2451_v44 = vpop.permute.xlu1 %2450  ;;  %v2453_v62 = vpop.permute.xlu0 %2452  ;;  %v2467_v47 = vpack.c.bf16 %v2464_v48, %v2463_v23  ;;  %v2642_v48 = vrot.slane %v5015_v35, %v6441_v9 }
 0x498   : > { %v2461_v55 = vsel %vm2458_vm15, %v2451_v44, 0.0  ;;  %v2462_v19 = vsel %vm2458_vm15, %v2453_v62, 0.0  ;;  %5266 = vmatprep.subr.msk.bf16.mxu0 %vm6787_vm2, %v5011_v30 }
 0x499   : > { %v2465_v41 = vmul.f32 %v2461_v55, %v6741_v29  ;;  %v2466_v51 = vmul.f32 %v2462_v19, %v6741_v29  ;;  %5267 = vmatpush3.bf16.msra.mxu0 %v2378_v53  ;;  %5453 = vmatprep.subr.bf16.mxu1 %v2467_v47 }
 0x49a   : > { %5454 = vmatpush3.bf16.msra.mxu1 %v2467_v47 }
 0x49b   : > { %v2468_v54 = vpack.c.bf16 %v2466_v51, %v2465_v41 }
 0x49c   : > { %2547 = vmatmul.mubr.bf16.vlgmr.msra.gmra.mrb[40].mxu0 %v5817_v13 }
 0x49d   : > { %5455 = vmatprep.subr.bf16.mxu1 %v2468_v54  ;;  %2554 = vmatprep.mubr.bf16.mxu0 %v5822_v8 }
 0x49e   : > { %5456 = vmatpush3.bf16.msra.mxu1 %v2468_v54 }
 0x4a1   : > { %5458 = vmatmul.mubr.msk.bf16.vlgmr.msra.gmra.mrb[32].mxu1 %vm1070_vm1, %v5821_v6 }
 0x4a4   : > { %2555 = vmatmul.mubr.bf16.gmra.mrb[44].mxu0 %v5824_v34 }
 0x4a8   : > { %v2615_v57 = vpop.permute.xlu1 %2614  ;;  %v2620_v43 = vpop.permute.xlu0 %2619 }
 0x4ac   : > { %v2625_v39 = vpop.permute.xlu1 %2624  ;;  %v2656_v42 = vpop.permute.xlu0 %2655 }
 0x4b0   : > { %v2630_v46 = vpop.permute.xlu1 %2629  ;;  %v2666_v54 = vpop.permute.xlu0 %2665 }
 0x4b4   : > { %v2661_v45 = vpop.permute.xlu1 %2660 }
 0x4b5   : > { %v2692_v35 = vpop.permute.xlu0 %2691 }
 0x4c6   : > { %v6819_v36 = vpop.f32.mrb[36].mxu0 }
 0x4c7   : > { %v5445_v2 = vpop.f32.mrb[37].mxu0 }
 0x4c8   : > { %v2187_v1 = vpop.f32.mrb[38].mxu0  ;;  %v2671_v2 = vpop.permute.xlu1 %2670 }
 0x4c9   : > { %v5446_v26 = vpop.f32.mrb[39].mxu0 }
 0x56f   : > { %v5268_v38 = vpop.f32.mrb[40].mxu0 }
 0x570   : > { %v5269_v24 = vpop.f32.mrb[41].mxu0 }
 0x571   : > { %v5270_v27 = vadd.f32 %v5269_v24, %v5268_v38  ;;  %v5271_v28 = vpop.f32.mrb[42].mxu0 }
 0x572   : > { %v5272_v37 = vpop.f32.mrb[43].mxu0 }
 0x573   : > { %v5273_v18 = vadd.f32 %v5272_v37, %v5271_v28 }
 0x574   : > { %v5459_v21 = vpop.f32.mrb[32].mxu1 }
 0x575   : > { %v2597_v10 = vpop.f32.mrb[33].mxu1 }
 0x576   : > { %v2598_v23 = vadd.f32 %v5270_v27, %v2597_v10  ;;  %v5460_v30 = vpop.f32.mrb[34].mxu1 }
 0x577   : > { %v5274_v53 = vpop.f32.mrb[44].mxu0  ;;  %v2600_v44 = vpop.f32.mrb[35].mxu1 }
 0x578   : > { %v2632_v62 = vmul.f32 %v2615_v57, %v2598_v23  ;;  %v2601_v47 = vadd.f32 %v5273_v18, %v2600_v44  ;;  %v5275_v55 = vpop.f32.mrb[45].mxu0 }
 0x579   : > { %v5276_v19 = vadd.f32 %v5275_v55, %v5274_v53  ;;  %v5277_v13 = vpop.f32.mrb[46].mxu0 }
 0x57a   : > { %v2644_v41 = vadd.f32 %v2642_v48, %v2632_v62  ;;  %v2633_v51 = vmul.f32 %v2620_v43, %v2601_v47  ;;  %v5278_v8 = vpop.f32.mrb[47].mxu0 }
 0x57b   : > { %v2606_v6 = vadd.f32 %v5459_v21, %v5276_v19  ;;  %v5279_v34 = vadd.f32 %v5278_v8, %v5277_v13  ;;  %v2697_v21 = vpop.permute.xlu1 %2696 }
 0x57c   : > { %v2673_v1 = vadd.f32 %v2656_v42, %v2644_v41  ;;  %v2645_v26 = vadd.f32 %v2642_v48, %v2633_v51 }
 0x57d   : > { %v2634_v38 = vmul.f32 %v2625_v39, %v2606_v6  ;;  %v2609_v24 = vadd.f32 %v5460_v30, %v5279_v34  ;;  %v1407_v6 = vadd.f32 1e-08, %v6570_v63  ;;  %v5827_v34 = vld [vmem:[%s7881_s4 + $0x64] ss:$12 sps:$4 sm:$0xff]   ;;  %v1417_v63 = vadd.f32 1e-08, %v6576_v12 }
 0x57e   : > { %vm2677_vm8 = vcmp.ge.f32.partialorder %v2673_v1, 0.0  ;;  %v2674_v27 = vadd.f32 %v2661_v45, %v2645_v26  ;;  %2964 = vmatprep.mubr.bf16.mxu1 %v5827_v34  ;;  %v5053_v26 = vld [vmem:[%s7883_s6 + $0x40] sm:$0xff]  ;;  %v5055_v12 = vld [vmem:[%s7883_s6 + $0x50] sm:$0xff] }
 0x57f   : > { %v2681_v28 = vsel %vm2677_vm8, 1.4142135, %v5922_v3  ;;  %v2646_v57 = vadd.f32 %v2642_v48, %v2634_v38  ;;  %v2635_v37 = vmul.f32 %v2630_v46, %v2609_v24  ;;  %v2702_v19 = vpop.permute.xlu1 %2701  ;;  %v5054_v24 = vld [vmem:[%s7883_s6 + $0x48] sm:$0xff] }
 0x580   : > { %v2685_v18 = vmul.f32 %v2681_v28, %v2673_v1  ;;  %vm2678_vm10 = vcmp.ge.f32.partialorder %v2674_v27, 0.0  ;;  %v5056_v28 = vld [vmem:[%s7883_s6 + $0x58] sm:$0xff] }
 0x581   : > { %v2682_v43 = vsel %vm2678_vm10, 1.4142135, %v5922_v3  ;;  %v2675_v10 = vadd.f32 %v2666_v54, %v2646_v57  ;;  %v2647_v23 = vadd.f32 %v2642_v48, %v2635_v37  ;;  %v2707_v48 = vpop.permute.xlu0 %2706  ;;  %v1402_v54 = vadd.f32 1e-08, %v6572_v4  ;;  %v5828_v4 = vld [vmem:[%s7881_s4 + $0x68] ss:$12 sps:$4 sm:$0xff]  }
 0x582   : > { %v2709_v53 = vmul.f32 %v2692_v35, %v2685_v18  ;;  %v2686_v44 = vmul.f32 %v2682_v43, %v2674_v27  ;;  %5465 = vmatprep.mubr.msk.bf16.mxu0 %vm1070_vm1, %v5828_v4  ;;  %v5931_v57 = vmov 3   ;;  %vm3605_vm10 = vcmask 1039360  }
 0x583   : > { %vm2679_vm14 = vcmp.ge.f32.partialorder %v2675_v10, 0.0  ;;  %v2676_v42 = vadd.f32 %v2671_v2, %v2647_v23  ;;  %5877 = vrsqrt.f32 %v1402_v54  ;;  %v1412_v2 = vadd.f32 1e-08, %v6580_v16 }
 0x584   : > { %v2710_v39 = vmul.f32 %v2697_v21, %v2686_v44  ;;  %v2683_v30 = vsel %vm2679_vm14, 1.4142135, %v5922_v3  ;;  %2717 = vrot.lane.b32.xlu1 %v2709_v53, %s5923_s27  ;;  %5879 = vrsqrt.f32 %v1407_v6  ;;  %vm3650_vm14 = vcmask 924672  }
 0x585   : > { %v2687_v45 = vmul.f32 %v2683_v30, %v2675_v10  ;;  %vm2680_vm8 = vcmp.ge.f32.partialorder %v2676_v42, 0.0  ;;  %5881 = vrsqrt.f32 %v1412_v2 }
 0x586   : > { %v2684_v46 = vsel %vm2680_vm8, 1.4142135, %v5922_v3  ;;  %2719 = vrot.lane.b32.xlu0 %v2710_v39, %s5923_s27  ;;  %v2801_v62 = vpack.c.bf16 %v2710_v39, %v2709_v53  ;;  %v5676_v47 = vpack.i.bf16 %v2710_v39, %v2709_v53  ;;  %5883 = vrsqrt.f32 %v1417_v63 }
 0x587   : > { %v2688_v55 = vmul.f32 %v2684_v46, %v2676_v42  ;;  %v6832_v13 = vmul.f32 %v2702_v19, %v2687_v45  ;;  %vm3695_vm8 = vcmask 916480  }
 0x588   : > { %2803 = vrot.lane.b32.xlu1 %v2709_v53, %s5911_s28  ;;  %5284 = vmatprep.subr.bf16.mxu1 %v2801_v62 }
 0x589   : > { %v6834_v41 = vmul.f32 %v2707_v48, %v2688_v55 }
 0x58a   : > { %2805 = vrot.lane.b32.xlu0 %v2710_v39, %s5911_s28 }
 0x58b   : > { %v5686_v51 = vpack.i.bf16 %v6834_v41, %v6832_v13  ;;  %v2802_v8 = vpack.c.bf16 %v6834_v41, %v6832_v13 }
 0x58c   : > { %2825 = vrot.lane.b32.xlu1 %v2709_v53, %s5924_s29 }
 0x58d   : > { %v5878_v16 = vpop.eup %5877 }
 0x58e   : > { %2827 = vrot.lane.b32.xlu0 %v2710_v39, %s5924_s29  ;;  %v5880_v1 = vpop.eup %5879 }
 0x58f   : > { %v5882_v38 = vpop.eup %5881 }
 0x590   : > { %2757 = vrot.lane.b32.xlu1 %v2709_v53, %s5927_s19  ;;  %v5884_v27 = vpop.eup %5883 }
 0x592   : > { %2759 = vrot.lane.b32.xlu0 %v2710_v39, %s5927_s19 }
 0x594   : > { %5677 = vrot.lane.b32.xlu1 %v5676_v47, %s5925_s17 }
 0x596   : > { %2807 = vrot.lane.b32.xlu0 %v6832_v13, %s5911_s28 }
 0x598   : > { %2721 = vrot.lane.b32.xlu1 %v6832_v13, %s5923_s27 }
 0x59a   : > { %2723 = vrot.lane.b32.xlu0 %v6834_v41, %s5923_s27  ;;  %s7923_s27 = smov 120  }
 0x59c   : > { %2829 = vrot.lane.b32.xlu1 %v6832_v13, %s5924_s29 }
 0x59e   : > { %2781 = vrot.lane.b32.xlu0 %v2710_v39, %s5918_s30 }
 0x5a0   : > { %2761 = vrot.lane.b32.xlu1 %v6832_v13, %s5927_s19 }
 0x5a2   : > { %2867 = vrot.lane.b32.xlu0 %v2710_v39, %s5929_s25 }
 0x5a4   : > { %2809 = vrot.lane.b32.xlu1 %v6834_v41, %s5911_s28 }
 0x5a6   : > { %5687 = vrot.lane.b32.xlu0 %v5686_v51, %s5925_s17  ;;  %s5932_s17 = smov 17  }
 0x5a8   : > { %2779 = vrot.lane.b32.xlu1 %v2709_v53, %s5918_s30 }
 0x5aa   : > { %2831 = vrot.lane.b32.xlu0 %v6834_v41, %s5924_s29  ;;  %s5934_s29 = smov 16  }
 0x5ac   : > { %2865 = vrot.lane.b32.xlu1 %v2709_v53, %s5929_s25 }
 0x5ae   : > { %2763 = vrot.lane.b32.xlu0 %v6834_v41, %s5927_s19  ;;  %s7900_s19 = smov 112  }
 0x5b0   : > { %5682 = vrot.lane.b32.xlu1 %v5676_v47, %s7923_s27 }
 0x5b2   : > { %2783 = vrot.lane.b32.xlu0 %v6832_v13, %s5918_s30 }
 0x5b4   : > { %2785 = vrot.lane.b32.xlu1 %v6834_v41, %s5918_s30 }
 0x5b6   : > { %2869 = vrot.lane.b32.xlu0 %v6832_v13, %s5929_s25 }
 0x5b8   : > { %2871 = vrot.lane.b32.xlu1 %v6834_v41, %s5929_s25 }
 0x5ba   : > { %5692 = vrot.lane.b32.xlu0 %v5686_v51, %s7923_s27  ;;  %s534_s27 = scalar_lea.vmem %s7893_s16, %s5153_s18  ;;  %s5937_s18 = smov 111  }
 0x5bc   : > { %3032 = vperm.xlu1 %5696, %v5878_v16  }
 0x5be   : > { %3037 = vperm.xlu0 %5697, %v5880_v1  }
 0x5c0   : > { %3073 = vperm.xlu1 %5696, %v5053_v26  }
 0x5c2   : > { %3042 = vperm.xlu0 %5697, %v5882_v38  }
 0x5c4   : > { %3078 = vperm.xlu1 %5696, %v5054_v24  }
 0x5c6   : > { %3083 = vperm.xlu0 %5697, %v5055_v12  }
 0x5c8   : > { %3047 = vperm.xlu1 %5696, %v5884_v27  }
 0x5ca   : > { %5698 = vset.pattern.permute.xlu0 %v5931_v57 }
 0x5cb   : > { %3345 = vperm.xlu0 %5698, %v6229_v59  }
 0x5cc   : > { %3088 = vperm.xlu1 %5696, %v5056_v28  }
 0x5cf   : > { %3360 = vperm.xlu0 %5698, %v6231_v61  }
 0x5d0   : > { %5699 = vset.pattern.permute.xlu1 %v5931_v57 }
 0x5d1   : > { %3350 = vperm.xlu1 %5699, %v6233_v0  }
 0x5d3   : > { %5741 = vset.pattern.permute.xlu0 %v7918_v17 }
 0x5d5   : > { %3355 = vperm.xlu1 %5699, %v6227_v56  }
 0x5d9   : > { %5740 = vset.pattern.permute.xlu1 %v7918_v17 }
 0x5f6   : > { %v2718_v37 = vpop.permute.xlu1 %2717 }
 0x5f7   : > { %v2729_v18 = vsel %vm2296_vm6, 0.0, %v2718_v37 }
 0x5f8   : > { %v2720_v35 = vpop.permute.xlu0 %2719  ;;  %v2733_v59 = vmul.f32 %v2729_v18, %v6732_v33 }
 0x5f9   : > { %v2730_v43 = vsel %vm2296_vm6, 0.0, %v2720_v35 }
 0x5fa   : > { %v2734_v61 = vmul.f32 %v2730_v43, %v6732_v33  ;;  %v2804_v10 = vpop.permute.xlu1 %2803 }
 0x5fb   : > { %v2815_v62 = vsel %vm2393_vm7, %v2804_v10, 0.0 }
 0x5fc   : > { %v2737_v23 = vpack.c.bf16 %v2734_v61, %v2733_v59  ;;  %v2806_v21 = vpop.permute.xlu0 %2805  ;;  %v2819_v51 = vmul.f32 %v2815_v62, %v6741_v29 }
 0x5fd   : > { %v2816_v30 = vsel %vm2393_vm7, %v2806_v21, 0.0 }
 0x5fe   : > { %v2826_v0 = vpop.permute.xlu1 %2825  ;;  %5285 = vmatpush3.bf16.msra.mxu1 %v2737_v23  ;;  %v2820_v55 = vmul.f32 %v2816_v30, %v6741_v29 }
 0x5ff   : > { %5286 = vmatprep.subr.bf16.mxu1 %v2802_v8  ;;  %v2837_v24 = vsel %vm2416_vm11, %v2826_v0, 0.0 }
 0x600   : > { %v2828_v56 = vpop.permute.xlu0 %2827  ;;  %v2823_v2 = vpack.c.bf16 %v2820_v55, %v2819_v51  ;;  %v2841_v61 = vmul.f32 %v2837_v24, %v6732_v33 }
 0x601   : > { %v2838_v1 = vsel %vm2416_vm11, %v2828_v56, 0.0 }
 0x602   : > { %v2758_v53 = vpop.permute.xlu1 %2757  ;;  %v2842_v27 = vmul.f32 %v2838_v1, %v6732_v33 }
 0x603   : > { %v2769_v10 = vsel %vm2342_vm12, 0.0, %v2758_v53 }
 0x604   : > { %v2760_v44 = vpop.permute.xlu0 %2759  ;;  %v2773_v30 = vmul.f32 %v2769_v10, %v6741_v29 }
 0x605   : > { %v2770_v28 = vsel %vm2342_vm12, 0.0, %v2760_v44  ;;  %v2845_v44 = vpack.c.bf16 %v2842_v27, %v2841_v61 }
 0x606   : > { %v5678_v42 = vpop.permute.xlu1 %5677  ;;  %v2774_v0 = vmul.f32 %v2770_v28, %v6741_v29 }
 0x607   : > { %v5680_v8 = vunpack.i.h.bf16 %v5678_v42  ;;  %v5679_v54 = vunpack.i.l.bf16 %v5678_v42 }
 0x608   : > { %v2808_v39 = vpop.permute.xlu0 %2807  ;;  %v2777_v55 = vpack.c.bf16 %v2774_v0, %v2773_v30 }
 0x609   : > { %v5037_v63 = vpack.c.bf16 %v5680_v8, %v5679_v54  ;;  %v2817_v26 = vsel %vm2393_vm7, %v2808_v39, 0.0 }
 0x60a   : > { %v2722_v45 = vpop.permute.xlu1 %2721  ;;  %v2821_v37 = vmul.f32 %v2817_v26, %v6741_v29 }
 0x60b   : > { %v2731_v46 = vsel %vm2296_vm6, 0.0, %v2722_v45 }
 0x60c   : > { %v2724_v47 = vpop.permute.xlu0 %2723  ;;  %v2735_v19 = vmul.f32 %v2731_v46, %v6732_v33 }
 0x60d   : > { %v2732_v48 = vsel %vm2296_vm6, 0.0, %v2724_v47 }
 0x60e   : > { %v2736_v13 = vmul.f32 %v2732_v48, %v6732_v33  ;;  %v2830_v41 = vpop.permute.xlu1 %2829 }
 0x60f   : > { %v2839_v56 = vsel %vm2416_vm11, %v2830_v41, 0.0 }
 0x610   : > { %v2738_v6 = vpack.c.bf16 %v2736_v13, %v2735_v19  ;;  %v2782_v34 = vpop.permute.xlu0 %2781  ;;  %v2843_v53 = vmul.f32 %v2839_v56, %v6732_v33 }
 0x612   : > { %v2762_v4 = vpop.permute.xlu1 %2761  ;;  %5287 = vmatpush3.bf16.msra.mxu1 %v2738_v6 }
 0x613   : > { %5288 = vmatprep.subr.bf16.mxu1 %v2823_v2  ;;  %v2771_v48 = vsel %vm2342_vm12, 0.0, %v2762_v4 }
 0x614   : > { %v2868_v16 = vpop.permute.xlu0 %2867  ;;  %v2775_v6 = vmul.f32 %v2771_v48, %v6741_v29  ;;  %v7003_v48 = vld [vmem:[%s7888_s11 + $0x14] ss:$8 sps:$4 sm:$0xff]  }
 0x615   : > { %v2878_v45 = vsel %vm2458_vm15, %v2868_v16, 0.0  ;;  %v2792_v16 = vsel %vm1796_vm9, 0.0, %v2782_v34 }
 0x616   : > { %v2810_v38 = vpop.permute.xlu1 %2809  ;;  %5289 = vmatpush3.bf16.msk.msra.mxu1 %vm6756_vm13, %v5037_v63  ;;  %v2882_v13 = vmul.f32 %v2878_v45, %v6741_v29  ;;  %v2796_v28 = vmul.f32 %v2792_v16, %v6732_v33  ;;  %v5052_v16 = vld [vmem:[%s7884_s7 + $0x4] sm:$0x3] }
 0x617   : > { %v2818_v12 = vsel %vm2393_vm7, %v2810_v38, 0.0 }
 0x618   : > { %v2822_v18 = vmul.f32 %v2818_v12, %v6741_v29  ;;  %v5688_v35 = vpop.permute.xlu0 %5687 }
 0x619   : > { %v5690_v43 = vunpack.i.h.bf16 %v5688_v35  ;;  %v5689_v59 = vunpack.i.l.bf16 %v5688_v35 }
 0x61a   : > { %v2780_v23 = vpop.permute.xlu1 %2779  ;;  %v2824_v21 = vpack.c.bf16 %v2822_v18, %v2821_v37 }
 0x61b   : > { %v5042_v42 = vpack.c.bf16 %v5690_v43, %v5689_v59  ;;  %v2791_v11 = vsel %vm1796_vm9, 0.0, %v2780_v23 }
 0x61c   : > { %v2832_v39 = vpop.permute.xlu0 %2831  ;;  %5290 = vmatprep.subr.bf16.mxu1 %v2824_v21  ;;  %v2795_v38 = vmul.f32 %v2791_v11, %v6732_v33 }
 0x61d   : > { %v2840_v46 = vsel %vm2416_vm11, %v2832_v39, 0.0  ;;  %5291 = vmatpush3.bf16.msk.msra.mxu1 %vm6756_vm13, %v5042_v42  ;;  %vm3395_vm13 = vcmask 138240  }
 0x61e   : > { %v2844_v62 = vmul.f32 %v2840_v46, %v6732_v33  ;;  %v2866_v47 = vpop.permute.xlu1 %2865  ;;  %5292 = vmatprep.subr.bf16.mxu1 %v2845_v44  ;;  %v2799_v18 = vpack.c.bf16 %v2796_v28, %v2795_v38 }
 0x61f   : > { %v2877_v19 = vsel %vm2458_vm15, %v2866_v47, 0.0  ;;  %v6991_v47 = vld [vmem:[%s7888_s11 + $0x4] ss:$8 sps:$4 sm:$0xff]  }
 0x620   : > { %v2881_v41 = vmul.f32 %v2877_v19, %v6741_v29  ;;  %v2764_v51 = vpop.permute.xlu0 %2763  ;;  %v2846_v8 = vpack.c.bf16 %v2844_v62, %v2843_v53  ;;  %v5829_v53 = vld [vmem:[%s7881_s4 + $0x80] ss:$12 sps:$4 sm:$0xff]   ;;  %v5832_v62 = vld [vmem:[%s7881_s4 + $0x78] ss:$12 sps:$4 sm:$0xff]  }
 0x621   : > { %v2772_v54 = vsel %vm2342_vm12, 0.0, %v2764_v51  ;;  %5293 = vmatpush3.bf16.msra.mxu1 %v2777_v55  ;;  %v6996_v55 = vld [vmem:[%s7888_s11] ss:$8 sps:$4 sm:$0xff]   ;;  %v7008_v19 = vld [vmem:[%s7888_s11 + $0x10] ss:$8 sps:$4 sm:$0xff]  }
 0x622   : > { %v2776_v2 = vmul.f32 %v2772_v54, %v6741_v29  ;;  %v5683_v63 = vpop.permute.xlu1 %5682  ;;  %5294 = vmatprep.subr.bf16.mxu1 %v2846_v8  ;;  %v2885_v4 = vpack.c.bf16 %v2882_v13, %v2881_v41  ;;  %v7015_v13 = vld [vmem:[%s7888_s11 + $0x24] ss:$8 sps:$4 sm:$0xff]   ;;  %v7020_v41 = vld [vmem:[%s7888_s11 + $0x20] ss:$8 sps:$4 sm:$0xff]   ;;  %v7027_v51 = vld [vmem:[%s7888_s11 + $0x34] ss:$8 sps:$4 sm:$0xff]  }
 0x623   : > { %v5685_v1 = vunpack.i.h.bf16 %v5683_v63  ;;  %v5684_v26 = vunpack.i.l.bf16 %v5683_v63  ;;  %v7032_v8 = vld [vmem:[%s7888_s11 + $0x30] ss:$8 sps:$4 sm:$0xff]  }
 0x624   : > { %v2778_v24 = vpack.c.bf16 %v2776_v2, %v2775_v6  ;;  %v2784_v12 = vpop.permute.xlu0 %2783  ;;  %5461 = vmatprep.subr.bf16.mxu0 %v2885_v4 }
 0x625   : > { %v5045_v27 = vpack.c.bf16 %v5685_v1, %v5684_v26  ;;  %5462 = vmatpush3.bf16.msra.mxu0 %v2885_v4  ;;  %v2793_v61 = vsel %vm1796_vm9, 0.0, %v2784_v12 }
 0x626   : > { %v2786_v37 = vpop.permute.xlu1 %2785  ;;  %5295 = vmatpush3.bf16.msra.mxu1 %v2778_v24  ;;  %v2797_v44 = vmul.f32 %v2793_v61, %v6732_v33 }
 0x627   : > { %5296 = vmatprep.subr.msk.bf16.mxu1 %vm6787_vm2, %v5045_v27  ;;  %v2794_v34 = vsel %vm1796_vm9, 0.0, %v2786_v37  ;;  %v3060_v37 = vrot.slane %v5052_v16, %v6441_v9 }
 0x628   : > { %v2870_v35 = vpop.permute.xlu0 %2869  ;;  %v2798_v23 = vmul.f32 %v2794_v34, %v6732_v33  ;;  %v5830_v33 = vld [vmem:[%s7881_s4 + $0x7c] ss:$12 sps:$4 sm:$0xff]  }
 0x629   : > { %v2879_v43 = vsel %vm2458_vm15, %v2870_v35, 0.0 }
 0x62a   : > { %v2872_v59 = vpop.permute.xlu1 %2871  ;;  %5297 = vmatpush3.bf16.msra.mxu1 %v2799_v18  ;;  %v2883_v21 = vmul.f32 %v2879_v43, %v6741_v29  ;;  %v2800_v46 = vpack.c.bf16 %v2798_v23, %v2797_v44 }
 0x62b   : > { %v2880_v10 = vsel %vm2458_vm15, %v2872_v59, 0.0  ;;  %vm5085_vm15 = vmneg %vm2200_vm4 }
 0x62c   : > { %v2884_v0 = vmul.f32 %v2880_v10, %v6741_v29  ;;  %v5693_v56 = vpop.permute.xlu0 %5692  ;;  %v5825_v29 = vld [vmem:[%s7881_s4 + $0x60] ss:$12 sps:$4 sm:$0xff]  }
 0x62d   : > { %v5695_v42 = vunpack.i.h.bf16 %v5693_v56  ;;  %v5694_v39 = vunpack.i.l.bf16 %v5693_v56 }
 0x62e   : > { %v2886_v30 = vpack.c.bf16 %v2884_v0, %v2883_v21 }
 0x62f   : > { %v5048_v45 = vpack.c.bf16 %v5695_v42, %v5694_v39 }
 0x630   : > { %5463 = vmatprep.subr.bf16.mxu0 %v2886_v30 }
 0x631   : > { %5298 = vmatprep.subr.msk.bf16.mxu1 %vm6787_vm2, %v5048_v45  ;;  %5464 = vmatpush3.bf16.msra.mxu0 %v2886_v30  ;;  %vm7300_vm2 = vmpackc.low %vm5085_vm15, %vm5085_vm15 }
 0x632   : > { %5299 = vmatpush3.bf16.msra.mxu1 %v2800_v46  ;;  %5469 = vmatprep.subr.bf16.mxu0 %v7917_v14 }
 0x633   : > { %3290 = vmatprep.subr.bf16.mxu1 %v6991_v47 }
 0x634   : > { %5466 = vmatmul.mubr.msk.bf16.vlgmr.msra.gmra.mrb[48].mxu0 %vm1070_vm1, %v5829_v53 }
 0x635   : > { %2965 = vmatmul.mubr.bf16.vlgmr.msra.gmra.mrb[36].mxu1 %v5825_v29  ;;  %5470 = vmatpush3.bf16.msra.mxu0 %v5901_v40 }
 0x636   : > { %2972 = vmatprep.mubr.bf16.mxu1 %v5830_v33  ;;  %5471 = vmatprep.mubr.msk.bf16.mxu0 %vm5926_vm5, %v7917_v14 }
 0x637   : > { %5475 = vmatprep.subr.bf16.mxu0 %v7917_v14  ;;  %3291 = vmatpush1.bf16.msra.mxu1 %v6996_v55 }
 0x638   : > { %3292 = vmatprep.subr.bf16.mxu1 %v7003_v48 }
 0x63b   : > { %3293 = vmatpush1.bf16.msra.mxu1 %v7008_v19  ;;  %v3033_v11 = vpop.permute.xlu1 %3032 }
 0x63c   : > { %3294 = vmatprep.subr.bf16.mxu1 %v7015_v13 }
 0x63d   : > { %2973 = vmatmul.mubr.bf16.gmra.mrb[40].mxu1 %v5832_v62  ;;  %v3038_v18 = vpop.permute.xlu0 %3037 }
 0x63e   : > { %3322 = vmatprep.mubr.bf16.mxu1 %v7918_v17 }
 0x63f   : > { %3295 = vmatpush1.bf16.msra.mxu1 %v7020_v41  ;;  %v3074_v54 = vpop.permute.xlu1 %3073 }
 0x640   : > { %3296 = vmatprep.subr.bf16.mxu1 %v7027_v51 }
 0x641   : > { %v3043_v39 = vpop.permute.xlu0 %3042 }
 0x643   : > { %3297 = vmatpush1.bf16.msra.mxu1 %v7032_v8  ;;  %v3079_v43 = vpop.permute.xlu1 %3078 }
 0x647   : > { %v3048_v53 = vpop.permute.xlu1 %3047 }
 0x707   : > { %v5467_v6 = vpop.f32.mrb[48].mxu0 }
 0x708   : > { %v5300_v2 = vpop.f32.mrb[36].mxu1  ;;  %v3015_v63 = vpop.f32.mrb[49].mxu0 }
 0x709   : > { %v5301_v4 = vpop.f32.mrb[37].mxu1  ;;  %v5468_v1 = vpop.f32.mrb[50].mxu0 }
 0x70a   : > { %v5302_v26 = vadd.f32 %v5301_v4, %v5300_v2  ;;  %v5303_v38 = vpop.f32.mrb[38].mxu1  ;;  %v3018_v24 = vpop.f32.mrb[51].mxu0 }
 0x70b   : > { %v5304_v12 = vpop.f32.mrb[39].mxu1 }
 0x70c   : > { %v5305_v27 = vadd.f32 %v5304_v12, %v5303_v38  ;;  %v3016_v28 = vadd.f32 %v5302_v26, %v3015_v63  ;;  %v3084_v63 = vpop.permute.xlu0 %3083  ;;  %v3089_v38 = vpop.permute.xlu1 %3088 }
 0x70e   : > { %v3050_v35 = vmul.f32 %v3033_v11, %v3016_v28  ;;  %v3019_v34 = vadd.f32 %v5305_v27, %v3018_v24 }
 0x710   : > { %v3062_v59 = vadd.f32 %v3060_v37, %v3050_v35  ;;  %v3051_v61 = vmul.f32 %v3038_v18, %v3019_v34  ;;  %v5306_v10 = vpop.f32.mrb[40].mxu1  ;;  %v3346_v18 = vpop.permute.xlu0 %3345 }
 0x711   : > { %v5307_v23 = vpop.f32.mrb[41].mxu1 }
 0x712   : > { %v3091_v21 = vadd.f32 %v3074_v54, %v3062_v59  ;;  %v3063_v0 = vadd.f32 %v3060_v37, %v3051_v61  ;;  %v5308_v56 = vadd.f32 %v5307_v23, %v5306_v10  ;;  %v5309_v42 = vpop.f32.mrb[42].mxu1 }
 0x713   : > { %v5310_v44 = vpop.f32.mrb[43].mxu1 }
 0x714   : > { %vm3095_vm6 = vcmp.ge.f32.partialorder %v3091_v21, 0.0  ;;  %v3092_v30 = vadd.f32 %v3079_v43, %v3063_v0  ;;  %v3024_v45 = vadd.f32 %v5467_v6, %v5308_v56  ;;  %v5311_v46 = vadd.f32 %v5310_v44, %v5309_v42 }
 0x715   : > { %v3099_v29 = vsel %vm3095_vm6, 1.4142135, %v5922_v3  ;;  %vm7406_vm6 = vmpackc.low %vm3695_vm8, %vm3695_vm8 }
 0x716   : > { %v7045_v33 = vmul.f32 %v3099_v29, %v3091_v21  ;;  %vm3096_vm7 = vcmp.ge.f32.partialorder %v3092_v30, 0.0  ;;  %v3052_v40 = vmul.f32 %v3043_v39, %v3024_v45  ;;  %v3027_v62 = vadd.f32 %v5468_v1, %v5311_v46  ;;  %v3351_v21 = vpop.permute.xlu1 %3350 }
 0x717   : > { %v3100_v11 = vsel %vm3096_vm7, 1.4142135, %v5922_v3  ;;  %vm3732_vm7 = vcmask 908288  }
 0x718   : > { %3230 = vst.msk [vmem:[%s534_s27] sm:$0xff] %vm852_vm0, %v7045_v33  ;;  %v7050_v54 = vmul.f32 %v3100_v11, %v3092_v30  ;;  %v3064_v6 = vadd.f32 %v3060_v37, %v3052_v40  ;;  %v3053_v2 = vmul.f32 %v3048_v53, %v3027_v62  ;;  %v3361_v62 = vpop.permute.xlu0 %3360 }
 0x71a   : > { %3231 = vst.msk [vmem:[%s534_s27 + $0x8] sm:$0xff] %vm852_vm0, %v7050_v54  ;;  %v3234_v4 = vpack.c.bf16 %v7050_v54, %v7045_v33  ;;  %v3093_v16 = vadd.f32 %v3084_v63, %v3064_v6  ;;  %v3065_v26 = vadd.f32 %v3060_v37, %v3053_v2  ;;  %v3356_v46 = vpop.permute.xlu1 %3355  ;;  %v5847_v63 = vld [vmem:[%s7881_s4 + $0x94] ss:$12 sps:$4 sm:$0xff]  }
 0x71c   : > { %vm3097_vm11 = vcmp.ge.f32.partialorder %v3093_v16, 0.0  ;;  %v3094_v1 = vadd.f32 %v3089_v38, %v3065_v26  ;;  %5069 = vmatmul.mubr.msk.bf16.vlgmr.msra.gmra.mrb[44].mxu1 %vm852_vm0, %v3234_v4  ;;  %v1528_v4 = vadd.f32 1e-08, %v6594_v32  ;;  %v1538_v26 = vadd.f32 1e-08, %v6602_v5  ;;  %v596_v32 = vld [vmem:[%s7879_s2 + $0x80] sm:$0xff] }
 0x71d   : > { %v3101_v24 = vsel %vm3097_vm11, 1.4142135, %v5922_v3  ;;  %3332 = vmatprep.mubr.bf16.mxu1 %v7918_v17  ;;  %v1543_v38 = vadd.f32 1e-08, %v6599_v7 }
 0x71e   : > { %v7059_v12 = vmul.f32 %v3101_v24, %v3093_v16  ;;  %vm3098_vm12 = vcmp.ge.f32.partialorder %v3094_v1, 0.0  ;;  %v1533_v16 = vadd.f32 1e-08, %v6590_v31  ;;  %5885 = vrsqrt.f32 %v1528_v4  ;;  %v597_v31 = vld [vmem:[%s7879_s2 + $0x88] sm:$0xff] }
 0x71f   : > { %v3102_v27 = vsel %vm3098_vm12, 1.4142135, %v5922_v3 }
 0x720   : > { %3232 = vst.msk [vmem:[%s534_s27 + $0x10] sm:$0xff] %vm852_vm0, %v7059_v12  ;;  %v7064_v28 = vmul.f32 %v3102_v27, %v3094_v1  ;;  %5887 = vrsqrt.f32 %v1533_v16  ;;  %v598_v1 = vld [vmem:[%s7879_s2 + $0x90] sm:$0xff] }
 0x721   : > { %5889 = vrsqrt.f32 %v1538_v26 }
 0x722   : > { %3233 = vst.msk [vmem:[%s534_s27 + $0x18] sm:$0xff] %vm852_vm0, %v7064_v28  ;;  %v3235_v37 = vpack.c.bf16 %v7064_v28, %v7059_v12  ;;  %5891 = vrsqrt.f32 %v1543_v38 }
 0x724   : > { %5070 = vmatmul.mubr.msk.bf16.gmra.mrb[48].mxu1 %vm852_vm0, %v3235_v37  ;;  %v3419_v37 = vsub.s32 2, %v6432_v58 }
 0x725   : > { %3838 = vmatprep.mubr.bf16.mxu1 %v5847_v63 }
 0x728   : > { %v5886_v24 = vpop.eup %5885 }
 0x72a   : > { %v5888_v7 = vpop.eup %5887 }
 0x7ef   : > { %v3324_v35 = vpop.f32.mrb[44].mxu1 }
 0x7f0   : > { %v7071_v34 = vmul.f32 %v3346_v18, %v3324_v35  ;;  %v3326_v43 = vpop.f32.mrb[45].mxu1 }
 0x7f1   : > { %v7073_v59 = vmul.f32 %v3346_v18, %v3326_v43  ;;  %v3328_v61 = vpop.f32.mrb[46].mxu1  ;;  %v7219_v18 = vld [vmem:[%s7891_s14] sm:$0xf] }
 0x7f2   : > { %3379 = vrot.lane.b32.xlu1 %v7071_v34, %s5932_s17  ;;  %v3330_v10 = vpop.f32.mrb[47].mxu1  ;;  %v7085_v42 = vmul.f32 %v3351_v21, %v3328_v61  ;;  %v5890_v61 = vpop.eup %5889 }
 0x7f3   : > { %3381 = vrot.lane.b32.xlu0 %v7073_v59, %s5932_s17  ;;  %v5700_v56 = vpack.i.bf16 %v7073_v59, %v7071_v34  ;;  %v7087_v39 = vmul.f32 %v3351_v21, %v3330_v10  ;;  %v3416_v10 = vrot.slane %v7219_v18, %v6441_v9  ;;  %v599_v21 = vld [vmem:[%s7879_s2 + $0x98] sm:$0xff]  ;;  %v5892_v63 = vpop.eup %5891 }
 0x7f5   : > { %v5705_v45 = vpack.i.bf16 %v7087_v39, %v7085_v42 }
 0x7f6   : > { %3479 = vrot.lane.b32.xlu1 %v7071_v34, %s5933_s24 }
 0x7f7   : > { %3481 = vrot.lane.b32.xlu0 %v7073_v59, %s5933_s24  ;;  %v3334_v23 = vpop.f32.mrb[48].mxu1 }
 0x7f8   : > { %v3336_v0 = vpop.f32.mrb[49].mxu1  ;;  %v7101_v53 = vmul.f32 %v3356_v46, %v3334_v23  ;;  %v3420_v23 = vrot.slane %v7219_v18, %v3419_v37 }
 0x7f9   : > { %v3338_v44 = vpop.f32.mrb[50].mxu1  ;;  %v7103_v29 = vmul.f32 %v3356_v46, %v3336_v0 }
 0x7fa   : > { %5701 = vrot.lane.b32.xlu1 %v5700_v56, %s5934_s29  ;;  %v3340_v30 = vpop.f32.mrb[51].mxu1  ;;  %v7118_v11 = vmul.f32 %v3361_v62, %v3338_v44 }
 0x7fb   : > { %3385 = vrot.lane.b32.xlu0 %v7087_v39, %s5932_s17  ;;  %v5710_v40 = vpack.i.bf16 %v7103_v29, %v7101_v53  ;;  %v7120_v6 = vmul.f32 %v3361_v62, %v3340_v30  ;;  %v7237_v30 = vrot.slane %v3416_v10, %v6441_v9  ;;  %v5107_v10 = vld [vmem:[%s7883_s6 + $0x78] sm:$0xff] }
 0x7fd   : > { %v5715_v2 = vpack.i.bf16 %v7120_v6, %v7118_v11 }
 0x7fe   : > { %3383 = vrot.lane.b32.xlu1 %v7085_v42, %s5932_s17 }
 0x7ff   : > { %5706 = vrot.lane.b32.xlu0 %v5705_v45, %s5934_s29 }
 0x802   : > { %3483 = vrot.lane.b32.xlu1 %v7085_v42, %s5933_s24 }
 0x803   : > { %3485 = vrot.lane.b32.xlu0 %v7087_v39, %s5933_s24 }
 0x806   : > { %3387 = vrot.lane.b32.xlu1 %v7101_v53, %s5932_s17 }
 0x807   : > { %3389 = vrot.lane.b32.xlu0 %v7103_v29, %s5932_s17 }
 0x80a   : > { %3487 = vrot.lane.b32.xlu1 %v7101_v53, %s5933_s24 }
 0x80b   : > { %3489 = vrot.lane.b32.xlu0 %v7103_v29, %s5933_s24 }
 0x80e   : > { %5711 = vrot.lane.b32.xlu1 %v5710_v40, %s5934_s29 }
 0x80f   : > { %3543 = vrot.lane.b32.xlu0 %v7073_v59, %s5918_s30 }
 0x812   : > { %3391 = vrot.lane.b32.xlu1 %v7118_v11, %s5932_s17 }
 0x813   : > { %3393 = vrot.lane.b32.xlu0 %v7120_v6, %s5932_s17 }
 0x816   : > { %3541 = vrot.lane.b32.xlu1 %v7071_v34, %s5918_s30 }
 0x817   : > { %3547 = vrot.lane.b32.xlu0 %v7087_v39, %s5918_s30 }
 0x81a   : > { %3545 = vrot.lane.b32.xlu1 %v7085_v42, %s5918_s30 }
 0x81b   : > { %3551 = vrot.lane.b32.xlu0 %v7103_v29, %s5918_s30 }
 0x81e   : > { %3491 = vrot.lane.b32.xlu1 %v7118_v11, %s5933_s24 }
 0x81f   : > { %5716 = vrot.lane.b32.xlu0 %v5715_v2, %s5934_s29 }
 0x822   : > { %3549 = vrot.lane.b32.xlu1 %v7101_v53, %s5918_s30 }
 0x823   : > { %3493 = vrot.lane.b32.xlu0 %v7120_v6, %s5933_s24 }
 0x826   : > { %3553 = vrot.lane.b32.xlu1 %v7118_v11, %s5918_s30 }
 0x827   : > { %3595 = vrot.lane.b32.xlu0 %v7087_v39, %s5911_s28 }
 0x82a   : > { %3591 = vrot.lane.b32.xlu1 %v7073_v59, %s5911_s28 }
 0x82b   : > { %3555 = vrot.lane.b32.xlu0 %v7120_v6, %s5918_s30 }
 0x82e   : > { %3589 = vrot.lane.b32.xlu1 %v7071_v34, %s5911_s28 }
 0x82f   : > { %3593 = vrot.lane.b32.xlu0 %v7085_v42, %s5911_s28 }
 0x832   : > { %3599 = vrot.lane.b32.xlu1 %v7103_v29, %s5911_s28 }
 0x833   : > { %3601 = vrot.lane.b32.xlu0 %v7118_v11, %s5911_s28 }
 0x836   : > { %3597 = vrot.lane.b32.xlu1 %v7101_v53, %s5911_s28 }
 0x837   : > { %3640 = vrot.lane.b32.xlu0 %v7087_v39, %s5935_s0 }
 0x83a   : > { %3636 = vrot.lane.b32.xlu1 %v7073_v59, %s5935_s0 }
 0x83b   : > { %3603 = vrot.lane.b32.xlu0 %v7120_v6, %s5911_s28 }
 0x83e   : > { %3634 = vrot.lane.b32.xlu1 %v7071_v34, %s5935_s0 }
 0x83f   : > { %3638 = vrot.lane.b32.xlu0 %v7085_v42, %s5935_s0 }
 0x842   : > { %3644 = vrot.lane.b32.xlu1 %v7103_v29, %s5935_s0 }
 0x843   : > { %3648 = vrot.lane.b32.xlu0 %v7120_v6, %s5935_s0 }
 0x846   : > { %3642 = vrot.lane.b32.xlu1 %v7101_v53, %s5935_s0 }
 0x847   : > { %3646 = vrot.lane.b32.xlu0 %v7118_v11, %s5935_s0 }
 0x84a   : > { %5721 = vrot.lane.b32.xlu1 %v5700_v56, %s7900_s19  ;;  %v5104_v56 = vld [vmem:[%s7883_s6 + $0x60] sm:$0xff] }
 0x84b   : > { %5726 = vrot.lane.b32.xlu0 %v5705_v45, %s7900_s19  ;;  %v7240_v45 = vrot.slane %v3420_v23, %v6441_v9 }
 0x84e   : > { %5731 = vrot.lane.b32.xlu1 %v5710_v40, %s7900_s19 }
 0x84f   : > { %5736 = vrot.lane.b32.xlu0 %v5715_v2, %s7900_s19  ;;  %v5106_v2 = vld [vmem:[%s7883_s6 + $0x70] sm:$0xff]  ;;  %s5152_s19 = sshll.u32 %s7939_s22, 3 }
 0x852   : > { %3718 = vrot.lane.b32.xlu1 %v7073_v59, %s5937_s18 }
 0x853   : > { %3722 = vrot.lane.b32.xlu0 %v7087_v39, %s5937_s18 }
 0x856   : > { %3716 = vrot.lane.b32.xlu1 %v7071_v34, %s5937_s18 }
 0x857   : > { %3720 = vrot.lane.b32.xlu0 %v7085_v42, %s5937_s18 }
 0x85a   : > { %3726 = vrot.lane.b32.xlu1 %v7103_v29, %s5937_s18 }
 0x85b   : > { %3730 = vrot.lane.b32.xlu0 %v7120_v6, %s5937_s18 }
 0x85e   : > { %3724 = vrot.lane.b32.xlu1 %v7101_v53, %s5937_s18 }
 0x85f   : > { %3728 = vrot.lane.b32.xlu0 %v7118_v11, %s5937_s18 }
 0x862   : > { %694 = vperm.xlu1 %5740, %v596_v32  }
 0x863   : > { %699 = vperm.xlu0 %5741, %v597_v31  }
 0x864   : > { %v3380_v5 = vpop.permute.xlu1 %3379 }
 0x865   : > { %v3382_v27 = vpop.permute.xlu0 %3381  ;;  %v3408_v46 = vsel %vm3395_vm13, 0.0, %v3380_v5 }
 0x866   : > { %3914 = vperm.xlu1 %5740, %v5886_v24   ;;  %v3396_v40 = vsel %vm3395_vm13, %v3380_v5, %v3382_v27  ;;  %v3431_v32 = vmul.f32 %v7237_v30, %v3408_v46 }
 0x867   : > { %704 = vperm.xlu0 %5741, %v598_v1   ;;  %v3432_v31 = vmul.f32 %v7240_v45, %v3396_v40  ;;  %v5105_v1 = vld [vmem:[%s7883_s6 + $0x68] sm:$0xff] }
 0x868   : > { %v7221_v35 = vpop.permute.xlu1 %3479 }
 0x869   : > { %v7223_v43 = vpop.permute.xlu0 %3481 }
 0x86a   : > { %3919 = vperm.xlu1 %5740, %v5888_v7  }
 0x86b   : > { %3924 = vperm.xlu0 %5741, %v5890_v61   ;;  %v5938_v61 = vmov 4  }
 0x86c   : > { %v7231_v0 = vpop.permute.xlu1 %5701 }
 0x86d   : > { %v3386_v44 = vpop.permute.xlu0 %3385 }
 0x86e   : > { %709 = vperm.xlu1 %5740, %v599_v21  }
 0x86f   : > { %3968 = vperm.xlu0 %5741, %v5104_v56  }
 0x870   : > { %v3384_v62 = vpop.permute.xlu1 %3383 }
 0x871   : > { %v3397_v4 = vsel %vm3395_vm13, %v3384_v62, %v3386_v44  ;;  %v3409_v16 = vsel %vm3395_vm13, 0.0, %v3384_v62  ;;  %v7249_v26 = vpop.permute.xlu0 %5706 }
 0x872   : > { %v3433_v38 = vmul.f32 %v7237_v30, %v3409_v16  ;;  %v3434_v5 = vmul.f32 %v7240_v45, %v3397_v4  ;;  %3929 = vperm.xlu1 %5740, %v5892_v63   ;;  %v5708_v62 = vunpack.i.l.bf16 %v7249_v26  ;;  %v2141_v16 = vld [vmem:[%s7886_s9] sm:$0x7] }
 0x873   : > { %3978 = vperm.xlu0 %5741, %v5106_v2  }
 0x874   : > { %v3439_v24 = vpack.c.bf16 %v3433_v38, %v3431_v32  ;;  %v7258_v27 = vpop.permute.xlu1 %3483  ;;  %v3440_v37 = vpack.c.bf16 %v3434_v5, %v3432_v31  ;;  %v5704_v32 = vunpack.i.h.bf16 %v7231_v0 }
 0x875   : > { %v3486_v7 = vpop.permute.xlu0 %3485 }
 0x876   : > { %3806 = vmatprep.subr.bf16.mxu1 %v3440_v37  ;;  %3973 = vperm.xlu1 %5740, %v5105_v1  }
 0x877   : > { %3807 = vmatpush1.bf16.msra.mxu1 %v3439_v24  ;;  %5742 = vset.pattern.permute.xlu0 %v5938_v61 }
 0x878   : > { %v3388_v23 = vpop.permute.xlu1 %3387  ;;  %4020 = vperm.xlu0 %5742, %v6246_v20   ;;  %v5709_v20 = vunpack.i.h.bf16 %v7249_v26 }
 0x879   : > { %v3390_v21 = vpop.permute.xlu0 %3389  ;;  %v3410_v63 = vsel %vm3395_vm13, 0.0, %v3388_v23 }
 0x87a   : > { %3983 = vperm.xlu1 %5740, %v5107_v10   ;;  %v3398_v2 = vsel %vm3395_vm13, %v3388_v23, %v3390_v21  ;;  %v3435_v1 = vmul.f32 %v7237_v30, %v3410_v63  ;;  %v3460_v37 = vsel %vm2200_vm4, %v5708_v62, %v5709_v20 }
 0x87b   : > { %v3436_v38 = vmul.f32 %v7240_v45, %v3398_v2 }
 0x87c   : > { %v7264_v56 = vpop.permute.xlu1 %3487  ;;  %4035 = vperm.xlu0 %5742, %v6249_v22  }
 0x87d   : > { %v7267_v44 = vpop.permute.xlu0 %3489 }
 0x87e   : > { %5743 = vset.pattern.permute.xlu1 %v5938_v61  ;;  %v3517_v61 = vsub.s32 3, %v6432_v58 }
 0x87f   : > { %4025 = vperm.xlu1 %5743, %v6251_v25  }
 0x880   : > { %v7270_v46 = vpop.permute.xlu1 %5711  ;;  %5745 = vset.pattern.permute.xlu0 %v5931_v57  ;;  %v3518_v63 = vrot.slane %v7219_v18, %v3517_v61 }
 0x881   : > { %v7273_v40 = vpop.permute.xlu0 %3543 }
 0x883   : > { %4030 = vperm.xlu1 %5743, %v6243_v15   ;;  %v5703_v15 = vunpack.i.l.bf16 %v7231_v0 }
 0x884   : > { %v3392_v22 = vpop.permute.xlu1 %3391 }
 0x885   : > { %v3411_v4 = vsel %vm3395_vm13, 0.0, %v3392_v22  ;;  %v3394_v25 = vpop.permute.xlu0 %3393  ;;  %v3459_v21 = vsel %vm2200_vm4, %v5703_v15, %v5704_v32  ;;  %v5088_v58 = vpack.c.bf16 %v5708_v62, %v5703_v15  ;;  %v5714_v32 = vunpack.i.h.bf16 %v7270_v46 }
 0x886   : > { %v3437_v31 = vmul.f32 %v7237_v30, %v3411_v4  ;;  %v3399_v26 = vsel %vm3395_vm13, %v3392_v22, %v3394_v25  ;;  %v3476_v2 = vpack.c.bf16 %v3460_v37, %v3459_v21  ;;  %v3514_v25 = vrot.slane %v7219_v18, %v6450_v60 }
 0x887   : > { %v3438_v5 = vmul.f32 %v7240_v45, %v3399_v26  ;;  %5744 = vset.pattern.permute.xlu1 %v7918_v17  ;;  %v7313_v26 = vrot.slane %v3518_v63, %v6450_v60  ;;  %v3495_v62 = vsel %vm1821_vm3, %v7221_v35, %v7223_v43 }
 0x888   : > { %2144 = vperm.xlu1 %5744, %v2141_v16   ;;  %v7292_v24 = vpop.permute.xlu1 %3541  ;;  %v3441_v23 = vpack.c.bf16 %v3437_v31, %v3435_v1  ;;  %v3496_v16 = vsel %vm1821_vm3, %v7258_v27, %v3486_v7  ;;  %v5713_v31 = vunpack.i.l.bf16 %v7270_v46  ;;  %v3508_v7 = vsel %vm1821_vm3, 0.0, %v7258_v27 }
 0x889   : > { %v3548_v0 = vpop.permute.xlu0 %3547  ;;  %v3442_v10 = vpack.c.bf16 %v3438_v5, %v3436_v38  ;;  %v3532_v5 = vmul.f32 %v7313_v26, %v3496_v16  ;;  %v7322_v46 = vrot.slane %v3514_v25, %v6450_v60  ;;  %v3530_v43 = vmul.f32 %v7313_v26, %v3495_v62 }
 0x88a   : > { %v3461_v37 = vsel %vm2200_vm4, %v5713_v31, %v5714_v32  ;;  %v3497_v27 = vsel %vm1821_vm3, %v7264_v56, %v7267_v44  ;;  %v3509_v44 = vsel %vm1821_vm3, 0.0, %v7264_v56  ;;  %v3569_v56 = vsel %vm1796_vm9, 0.0, %v7292_v24 }
 0x88b   : > { %3808 = vmatprep.subr.bf16.mxu1 %v3442_v10  ;;  %v3507_v10 = vsel %vm1821_vm3, 0.0, %v7221_v35  ;;  %v3538_v32 = vpack.c.bf16 %v3532_v5, %v3530_v43 }
 0x88c   : > { %v3546_v22 = vpop.permute.xlu1 %3545  ;;  %3809 = vmatpush1.bf16.msra.mxu1 %v3441_v23  ;;  %5746 = vset.pattern.permute.xlu1 %v5931_v57  ;;  %v3529_v35 = vmul.f32 %v7322_v46, %v3507_v10 }
 0x88d   : > { %3810 = vmatprep.subr.bf16.mxu1 %v3476_v2  ;;  %v3552_v4 = vpop.permute.xlu0 %3551  ;;  %v3531_v2 = vmul.f32 %v7322_v46, %v3508_v7 }
 0x890   : > { %v3492_v57 = vpop.permute.xlu1 %3491  ;;  %5089 = vmatpush1.bf16.msk.msra.mxu1 %vm7300_vm2, %v5088_v58 }
 0x891   : > { %v5717_v38 = vpop.permute.xlu0 %5716  ;;  %v3510_v25 = vsel %vm1821_vm3, 0.0, %v3492_v57 }
 0x892   : > { %v5719_v18 = vunpack.i.h.bf16 %v5717_v38  ;;  %v5718_v15 = vunpack.i.l.bf16 %v5717_v38  ;;  %v3558_v38 = vsel %vm1796_vm9, %v3546_v22, %v3548_v0  ;;  %v3535_v7 = vmul.f32 %v7322_v46, %v3510_v25 }
 0x893   : > { %v3570_v0 = vsel %vm1796_vm9, 0.0, %v3546_v22  ;;  %v3576_v5 = vmul.f32 %v3558_v38, %v7240_v45  ;;  %v3573_v25 = vmul.f32 %v3569_v56, %v7237_v30 }
 0x894   : > { %v3550_v1 = vpop.permute.xlu1 %3549  ;;  %v3462_v61 = vsel %vm2200_vm4, %v5718_v15, %v5719_v18  ;;  %v5093_v63 = vpack.c.bf16 %v5718_v15, %v5713_v31  ;;  %v3534_v31 = vmul.f32 %v7313_v26, %v3497_v27  ;;  %v3557_v15 = vsel %vm1796_vm9, %v7292_v24, %v7273_v40 }
 0x895   : > { %v3494_v23 = vpop.permute.xlu0 %3493  ;;  %v3478_v21 = vpack.c.bf16 %v3462_v61, %v3461_v37  ;;  %v3533_v61 = vmul.f32 %v7322_v46, %v3509_v44  ;;  %v3574_v43 = vmul.f32 %v3557_v15, %v7240_v45  ;;  %v3575_v40 = vmul.f32 %v3570_v0, %v7237_v30 }
 0x896   : > { %v3498_v58 = vsel %vm1821_vm3, %v3492_v57, %v3494_v23  ;;  %v3537_v57 = vpack.c.bf16 %v3531_v2, %v3529_v35  ;;  %v3559_v2 = vsel %vm1796_vm9, %v3550_v1, %v3552_v4  ;;  %v3571_v24 = vsel %vm1796_vm9, 0.0, %v3550_v1 }
 0x897   : > { %v3536_v16 = vmul.f32 %v7313_v26, %v3498_v58  ;;  %3812 = vmatprep.subr.bf16.mxu1 %v3478_v21  ;;  %v3539_v21 = vpack.c.bf16 %v3535_v7, %v3533_v61  ;;  %v3582_v58 = vpack.c.bf16 %v3576_v5, %v3574_v43  ;;  %v3581_v38 = vpack.c.bf16 %v3575_v40, %v3573_v25 }
 0x898   : > { %v3554_v62 = vpop.permute.xlu1 %3553  ;;  %5094 = vmatpush1.bf16.msk.msra.mxu1 %vm7300_vm2, %v5093_v63  ;;  %v3586_v7 = vpack.c.bf16 %v7087_v39, %v7073_v59  ;;  %v3585_v61 = vpack.c.bf16 %v7085_v42, %v7071_v34  ;;  %v3588_v59 = vpack.c.bf16 %v7120_v6, %v7103_v29 }
 0x899   : > { %v3596_v18 = vpop.permute.xlu0 %3595  ;;  %3814 = vmatprep.subr.bf16.mxu1 %v3538_v32  ;;  %v3540_v37 = vpack.c.bf16 %v3536_v16, %v3534_v31  ;;  %v3572_v27 = vsel %vm1796_vm9, 0.0, %v3554_v62  ;;  %v3578_v32 = vmul.f32 %v3559_v2, %v7240_v45  ;;  %v3577_v31 = vmul.f32 %v3571_v24, %v7237_v30 }
 0x89a   : > { %v3579_v4 = vmul.f32 %v3572_v27, %v7237_v30  ;;  %v3587_v2 = vpack.c.bf16 %v7118_v11, %v7101_v53 }
 0x89c   : > { %v3592_v10 = vpop.permute.xlu1 %3591  ;;  %3815 = vmatpush1.bf16.msra.mxu1 %v3537_v57  ;;  %v3583_v15 = vpack.c.bf16 %v3579_v4, %v3577_v31 }
 0x89d   : > { %v3556_v23 = vpop.permute.xlu0 %3555  ;;  %3816 = vmatprep.subr.bf16.mxu1 %v3540_v37  ;;  %v3618_v1 = vsel %vm3605_vm10, %v3592_v10, 0.0  ;;  %v3619_v37 = vsel %vm3605_vm10, %v3596_v18, 0.0 }
 0x89e   : > { %v3560_v22 = vsel %vm1796_vm9, %v3554_v62, %v3556_v23  ;;  %v3623_v56 = vmul.f32 %v3618_v1, %v7313_v26  ;;  %v3625_v40 = vmul.f32 %v3619_v37, %v7313_v26 }
 0x89f   : > { %v3580_v63 = vmul.f32 %v3560_v22, %v7240_v45 }
 0x8a0   : > { %v3590_v16 = vpop.permute.xlu1 %3589  ;;  %3817 = vmatpush1.bf16.msra.mxu1 %v3539_v21  ;;  %v3631_v22 = vpack.c.bf16 %v3625_v40, %v3623_v56 }
 0x8a1   : > { %v3594_v35 = vpop.permute.xlu0 %3593  ;;  %3818 = vmatprep.subr.bf16.mxu1 %v3582_v58  ;;  %v3584_v44 = vpack.c.bf16 %v3580_v63, %v3578_v32  ;;  %v3606_v43 = vsel %vm3605_vm10, %v3590_v16, %v3592_v10 }
 0x8a2   : > { %v3607_v23 = vsel %vm3605_vm10, %v3594_v35, %v3596_v18  ;;  %v3622_v34 = vmul.f32 %v3606_v43, %v7322_v46 }
 0x8a3   : > { %v3624_v42 = vmul.f32 %v3607_v23, %v7322_v46 }
 0x8a4   : > { %v3600_v62 = vpop.permute.xlu1 %3599  ;;  %3819 = vmatpush1.bf16.msra.mxu1 %v3581_v38 }
 0x8a5   : > { %v3602_v57 = vpop.permute.xlu0 %3601  ;;  %3820 = vmatprep.subr.bf16.mxu1 %v3584_v44  ;;  %v3620_v10 = vsel %vm3605_vm10, %v3600_v62, 0.0  ;;  %v3630_v25 = vpack.c.bf16 %v3624_v42, %v3622_v34 }
 0x8a6   : > { %v3627_v53 = vmul.f32 %v3620_v10, %v7313_v26 }
 0x8a8   : > { %v3598_v0 = vpop.permute.xlu1 %3597  ;;  %3821 = vmatpush1.bf16.msra.mxu1 %v3583_v15 }
 0x8a9   : > { %v3641_v5 = vpop.permute.xlu0 %3640  ;;  %3822 = vmatprep.subr.bf16.mxu1 %v3586_v7  ;;  %v3608_v11 = vsel %vm3605_vm10, %v3598_v0, %v3600_v62 }
 0x8aa   : > { %v3664_v16 = vsel %vm3650_vm14, %v3641_v5, 0.0  ;;  %v3626_v44 = vmul.f32 %v3608_v11, %v7322_v46 }
 0x8ab   : > { %v3670_v62 = vmul.f32 %v3664_v16, %v7240_v45 }
 0x8ac   : > { %v3637_v39 = vpop.permute.xlu1 %3636  ;;  %3823 = vmatpush1.bf16.msra.mxu1 %v3585_v61 }
 0x8ad   : > { %v3604_v21 = vpop.permute.xlu0 %3603  ;;  %3824 = vmatprep.subr.bf16.mxu1 %v3588_v59  ;;  %v3663_v27 = vsel %vm3650_vm14, %v3637_v39, 0.0 }
 0x8ae   : > { %v3621_v18 = vsel %vm3605_vm10, %v3604_v21, 0.0  ;;  %v3609_v29 = vsel %vm3605_vm10, %v3602_v57, %v3604_v21  ;;  %v3668_v32 = vmul.f32 %v3663_v27, %v7240_v45 }
 0x8af   : > { %v3629_v6 = vmul.f32 %v3621_v18, %v7313_v26  ;;  %v3628_v24 = vmul.f32 %v3609_v29, %v7322_v46 }
 0x8b0   : > { %v3635_v63 = vpop.permute.xlu1 %3634  ;;  %3825 = vmatpush1.bf16.msra.mxu1 %v3587_v2  ;;  %v3676_v56 = vpack.c.bf16 %v3670_v62, %v3668_v32 }
 0x8b1   : > { %v3639_v58 = vpop.permute.xlu0 %3638  ;;  %3826 = vmatprep.subr.bf16.mxu1 %v3631_v22  ;;  %v3651_v35 = vsel %vm3650_vm14, %v3635_v63, %v3637_v39  ;;  %v3633_v4 = vpack.c.bf16 %v3629_v6, %v3627_v53  ;;  %v3632_v7 = vpack.c.bf16 %v3628_v24, %v3626_v44 }
 0x8b2   : > { %v3652_v38 = vsel %vm3650_vm14, %v3639_v58, %v3641_v5  ;;  %v3667_v1 = vmul.f32 %v3651_v35, %v7237_v30 }
 0x8b3   : > { %v3669_v0 = vmul.f32 %v3652_v38, %v7237_v30 }
 0x8b4   : > { %v3645_v31 = vpop.permute.xlu1 %3644  ;;  %3827 = vmatpush1.bf16.msra.mxu1 %v3630_v25 }
 0x8b5   : > { %v3665_v57 = vsel %vm3650_vm14, %v3645_v31, 0.0  ;;  %v3649_v15 = vpop.permute.xlu0 %3648  ;;  %3828 = vmatprep.subr.bf16.mxu1 %v3633_v4  ;;  %v3675_v39 = vpack.c.bf16 %v3669_v0, %v3667_v1 }
 0x8b6   : > { %v3666_v37 = vsel %vm3650_vm14, %v3649_v15, 0.0  ;;  %v3672_v5 = vmul.f32 %v3665_v57, %v7240_v45 }
 0x8b7   : > { %v3674_v61 = vmul.f32 %v3666_v37, %v7240_v45 }
 0x8b8   : > { %v3643_v43 = vpop.permute.xlu1 %3642  ;;  %3829 = vmatpush1.bf16.msra.mxu1 %v3632_v7 }
 0x8b9   : > { %v3653_v23 = vsel %vm3650_vm14, %v3643_v43, %v3645_v31  ;;  %v3647_v59 = vpop.permute.xlu0 %3646  ;;  %3830 = vmatprep.subr.bf16.mxu1 %v3676_v56  ;;  %v3678_v34 = vpack.c.bf16 %v3674_v61, %v3672_v5  ;;  %v5845_v61 = vld [vmem:[%s7881_s4 + $0x90] ss:$12 sps:$4 sm:$0xff]   ;;  %v5848_v43 = vld [vmem:[%s7881_s4 + $0xac] ss:$12 sps:$4 sm:$0xff]  }
 0x8ba   : > { %v3671_v40 = vmul.f32 %v3653_v23, %v7237_v30  ;;  %v3654_v21 = vsel %vm3650_vm14, %v3647_v59, %v3649_v15 }
 0x8bb   : > { %v3673_v2 = vmul.f32 %v3654_v21, %v7237_v30 }
 0x8bc   : > { %v5722_v42 = vpop.permute.xlu1 %5721  ;;  %3831 = vmatpush1.bf16.msra.mxu1 %v3675_v39 }
 0x8bd   : > { %v3677_v10 = vpack.c.bf16 %v3673_v2, %v3671_v40  ;;  %v5724_v18 = vunpack.i.h.bf16 %v5722_v42  ;;  %v5723_v29 = vunpack.i.l.bf16 %v5722_v42  ;;  %v5727_v6 = vpop.permute.xlu0 %5726  ;;  %3832 = vmatprep.subr.bf16.mxu1 %v3678_v34 }
 0x8be   : > { %v5729_v22 = vunpack.i.h.bf16 %v5727_v6  ;;  %v5728_v27 = vunpack.i.l.bf16 %v5727_v6 }
 0x8bf   : > { %v3696_v63 = vsel %vm3695_vm8, %v5723_v29, %v5724_v18 }
 0x8c0   : > { %v5096_v11 = vpack.c.bf16 %v5729_v22, %v5724_v18  ;;  %v3697_v58 = vsel %vm3695_vm8, %v5728_v27, %v5729_v22  ;;  %v5732_v25 = vpop.permute.xlu1 %5731  ;;  %3833 = vmatpush1.bf16.msra.mxu1 %v3677_v10  ;;  %v5850_v27 = vld [vmem:[%s7881_s4 + $0xa8] ss:$12 sps:$4 sm:$0xff]  }
 0x8c1   : > { %v5734_v16 = vunpack.i.h.bf16 %v5732_v25  ;;  %v5733_v24 = vunpack.i.l.bf16 %v5732_v25  ;;  %v5737_v32 = vpop.permute.xlu0 %5736  ;;  %v3712_v35 = vpack.c.bf16 %v3697_v58, %v3696_v63 }
 0x8c2   : > { %v5739_v38 = vunpack.i.h.bf16 %v5737_v32  ;;  %v5738_v4 = vunpack.i.l.bf16 %v5737_v32  ;;  %5097 = vmatprep.subr.msk.bf16.mxu1 %vm7406_vm6, %v5096_v11 }
 0x8c3   : > { %v3698_v44 = vsel %vm3695_vm8, %v5733_v24, %v5734_v16 }
 0x8c4   : > { %v5099_v31 = vpack.c.bf16 %v5739_v38, %v5734_v16  ;;  %v3699_v62 = vsel %vm3695_vm8, %v5738_v4, %v5739_v38  ;;  %v3719_v57 = vpop.permute.xlu1 %3718  ;;  %3835 = vmatpush1.bf16.msra.mxu1 %v3712_v35  ;;  %v5851_v38 = vld [vmem:[%s7881_s4 + $0x98] ss:$12 sps:$4 sm:$0xff]   ;;  %v5852_v4 = vld [vmem:[%s7881_s4 + $0xb0] ss:$12 sps:$4 sm:$0xff]  }
 0x8c5   : > { %v3745_v15 = vsel %vm3732_vm7, %v3719_v57, 0.0  ;;  %v3723_v7 = vpop.permute.xlu0 %3722  ;;  %v3714_v1 = vpack.c.bf16 %v3699_v62, %v3698_v44 }
 0x8c6   : > { %v3750_v0 = vmul.f32 %v3745_v15, %v7313_v26  ;;  %v3746_v37 = vsel %vm3732_vm7, %v3723_v7, 0.0  ;;  %5100 = vmatprep.subr.msk.bf16.mxu1 %vm7406_vm6, %v5099_v31 }
 0x8c7   : > { %v3752_v5 = vmul.f32 %v3746_v37, %v7313_v26 }
 0x8c8   : > { %v3717_v56 = vpop.permute.xlu1 %3716  ;;  %3837 = vmatpush1.bf16.msra.mxu1 %v3714_v1 }
 0x8c9   : > { %v3733_v23 = vsel %vm3732_vm7, %v3717_v56, %v3719_v57  ;;  %v3721_v59 = vpop.permute.xlu0 %3720  ;;  %v3758_v39 = vpack.c.bf16 %v3752_v5, %v3750_v0 }
 0x8ca   : > { %v3749_v40 = vmul.f32 %v3733_v23, %v7322_v46  ;;  %v3734_v21 = vsel %vm3732_vm7, %v3721_v59, %v3723_v7 }
 0x8cb   : > { %v3751_v2 = vmul.f32 %v3734_v21, %v7322_v46  ;;  %3839 = vmatmul.mubr.bf16.vlgmr.msra.gmra.mrb[52].mxu1 %v5845_v61  ;;  %3859 = vmatprep.subr.bf16.mxu1 %v3758_v39 }
 0x8cc   : > { %v3727_v34 = vpop.permute.xlu1 %3726  ;;  %3848 = vmatprep.mubr.bf16.mxu1 %v5848_v43 }
 0x8cd   : > { %v3757_v42 = vpack.c.bf16 %v3751_v2, %v3749_v40  ;;  %v3747_v10 = vsel %vm3732_vm7, %v3727_v34, 0.0  ;;  %v3731_v18 = vpop.permute.xlu0 %3730 }
 0x8ce   : > { %v3754_v29 = vmul.f32 %v3747_v10, %v7313_v26  ;;  %v3748_v6 = vsel %vm3732_vm7, %v3731_v18, 0.0 }
 0x8cf   : > { %v3756_v22 = vmul.f32 %v3748_v6, %v7313_v26  ;;  %3860 = vmatpush1.bf16.msra.mxu1 %v3757_v42 }
 0x8d0   : > { %v3725_v63 = vpop.permute.xlu1 %3724 }
 0x8d1   : > { %v3735_v11 = vsel %vm3732_vm7, %v3725_v63, %v3727_v34  ;;  %v3729_v58 = vpop.permute.xlu0 %3728  ;;  %v3760_v25 = vpack.c.bf16 %v3756_v22, %v3754_v29 }
 0x8d2   : > { %v3753_v16 = vmul.f32 %v3735_v11, %v7322_v46  ;;  %v3736_v24 = vsel %vm3732_vm7, %v3729_v58, %v3731_v18  ;;  %v5058_v18 = vld [vmem:[%s7885_s8 + $0x2] sm:$0x3] }
 0x8d3   : > { %v3755_v32 = vmul.f32 %v3736_v24, %v7322_v46  ;;  %3849 = vmatmul.mubr.bf16.gmra.mrb[56].mxu1 %v5850_v27  ;;  %3861 = vmatprep.subr.bf16.mxu1 %v3760_v25 }
 0x8d4   : > { %3891 = vmatprep.mubr.bf16.mxu1 %v7918_v17 }
 0x8d5   : > { %v3759_v35 = vpack.c.bf16 %v3755_v32, %v3753_v16 }
 0x8d7   : > { %3862 = vmatpush1.bf16.msra.mxu1 %v3759_v35 }
 0x8d8   : > { %4655 = vmatprep.subr.bf16.mxu1 %v6991_v47 }
 0x8db   : > { %5101 = vmatmul.mubr.msk.bf16.vlgmr.msra.gmra.mrb[52].mxu1 %vm1070_vm1, %v5851_v38 }
 0x8dc   : > { %3901 = vmatprep.mubr.bf16.mxu1 %v7918_v17  ;;  %4656 = vmatpush1.bf16.msra.mxu1 %v6996_v55 }
 0x8dd   : > { %4657 = vmatprep.subr.bf16.mxu1 %v7003_v48 }
 0x8e0   : > { %4658 = vmatpush1.bf16.msra.mxu1 %v7008_v19 }
 0x8e1   : > { %v695_v44 = vpop.permute.xlu1 %694  ;;  %4659 = vmatprep.subr.bf16.mxu1 %v7015_v13 }
 0x8e2   : > { %v1000_v31 = vadd.f32 %v6221_v50, %v695_v44  ;;  %v700_v47 = vpop.permute.xlu0 %699 }
 0x8e3   : > { %v1003_v62 = vadd.f32 %v6225_v52, %v700_v47  ;;  %5102 = vmatmul.mubr.msk.bf16.gmra.mrb[56].mxu1 %vm1070_vm1, %v5852_v4  ;;  %v7928_v52 = vld [vmem:[#allocation2_spill] sm:$0xff] }
 0x8e4   : > { %3155 = vperm.xlu0 %5745, %v1000_v31   ;;  %4660 = vmatpush1.bf16.msra.mxu1 %v7020_v41 }
 0x8e5   : > { %v3915_v55 = vpop.permute.xlu1 %3914  ;;  %3160 = vperm.xlu1 %5746, %v1003_v62   ;;  %4661 = vmatprep.subr.bf16.mxu1 %v7027_v51 }
 0x8e6   : > { %v705_v48 = vpop.permute.xlu0 %704  ;;  %4687 = vmatprep.mubr.bf16.mxu1 %v7918_v17 }
 0x8e7   : > { %v1008_v19 = vadd.f32 %v6219_v49, %v705_v48 }
 0x8e8   : > { %4662 = vmatpush1.bf16.msra.mxu1 %v7032_v8 }
 0x8e9   : > { %v3920_v50 = vpop.permute.xlu1 %3919  ;;  %3165 = vperm.xlu1 %5746, %v1008_v19  }
 0x8ea   : > { %v3925_v37 = vpop.permute.xlu0 %3924 }
 0x8ed   : > { %v710_v13 = vpop.permute.xlu1 %709  ;;  %5787 = vset.pattern.permute.xlu1 %v7918_v17 }
 0x8ee   : > { %v1011_v57 = vadd.f32 %v7928_v52, %v710_v13  ;;  %v3969_v5 = vpop.permute.xlu0 %3968 }
 0x8f0   : > { %3170 = vperm.xlu0 %5745, %v1011_v57  }
 0x8f1   : > { %v7466_v41 = vpop.permute.xlu1 %3929 }
 0x8f2   : > { %v7479_v61 = vpop.permute.xlu0 %3978 }
 0x8f4   : > { %5788 = vset.pattern.permute.xlu0 %v7918_v17 }
 0x8f5   : > { %v3974_v51 = vpop.permute.xlu1 %3973 }
 0x8f7   : > { %v4021_v56 = vpop.permute.xlu0 %4020 }
 0x8f9   : > { %v7469_v15 = vpop.permute.xlu1 %3983 }
 0x8fb   : > { %v7481_v43 = vpop.permute.xlu0 %4035 }
 0x8fe   : > { %v7471_v7 = vpop.permute.xlu1 %4025 }
 0x902   : > { %v7473_v49 = vpop.permute.xlu1 %4030 }
 0x907   : > { %v2145_v8 = vpop.permute.xlu1 %2144 }
 0x908   : > { %v2185_v1 = vadd.f32 %v6819_v36, %v2145_v8 }
 0x90a   : > { %v3107_v0 = vpack.c.bf16 %v2185_v1, %v2185_v1 }
 0x90c   : > { %5472 = vmatmul.mubr.msk.bf16.vlgmr.msra.gmra.mrb[52].mxu0 %vm2200_vm4, %v3107_v0 }
 0x90d   : > { %5479 = vmatprep.mubr.msk.bf16.mxu0 %vm5926_vm5, %v7917_v14 }
 0x963   : > { %v3156_v23 = vpop.permute.xlu0 %3155 }
 0x964   : > { %v3173_v59 = vmul.f32 %v3156_v23, %v7045_v33  ;;  %v3161_v39 = vpop.permute.xlu1 %3160  ;;  %v5103_v33 = vld [vmem:[%s7884_s7 + $0x6] sm:$0x3] }
 0x965   : > { %v3174_v40 = vmul.f32 %v3161_v39, %v7050_v54  ;;  %v3950_v29 = vrot.slane %v5103_v33, %v6450_v60 }
 0x967   : > { %v3177_v36 = vpack.c.bf16 %v3174_v40, %v3173_v59 }
 0x968   : > { %v3166_v21 = vpop.permute.xlu1 %3165 }
 0x969   : > { %5476 = vmatpush3.bf16.msra.mxu0 %v3177_v36  ;;  %v3175_v34 = vmul.f32 %v3166_v21, %v7059_v12 }
 0x96a   : > { %5477 = vmatprep.subr.bf16.mxu0 %v7917_v14  ;;  %v3946_v14 = vrot.slane %v5103_v33, %v6441_v9 }
 0x96f   : > { %v3171_v2 = vpop.permute.xlu0 %3170 }
 0x970   : > { %v3176_v42 = vmul.f32 %v3171_v2, %v7064_v28 }
 0x972   : > { %v3178_v10 = vpack.c.bf16 %v3176_v42, %v3175_v34 }
 0x974   : > { %5478 = vmatpush3.bf16.msra.mxu0 %v3178_v10 }
 0x977   : > { %5480 = vmatmul.mubr.msk.bf16.vlgmr.msra.gmra.mrb[52].mxu0 %vm1070_vm1, %v5058_v18 }
 0x9ae   : > { %v3893_v54 = vpop.f32.mrb[52].mxu1 }
 0x9af   : > { %v3932_v12 = vmul.f32 %v3915_v55, %v3893_v54  ;;  %v3895_v6 = vpop.f32.mrb[53].mxu1 }
 0x9b0   : > { %v3933_v28 = vmul.f32 %v3915_v55, %v3895_v6  ;;  %v3897_v22 = vpop.f32.mrb[54].mxu1 }
 0x9b1   : > { %v3953_v27 = vadd.f32 %v3946_v14, %v3932_v12  ;;  %v3934_v63 = vmul.f32 %v3920_v50, %v3897_v22  ;;  %v3899_v11 = vpop.f32.mrb[55].mxu1 }
 0x9b2   : > { %v3954_v58 = vadd.f32 %v3950_v29, %v3933_v28  ;;  %v3935_v25 = vmul.f32 %v3920_v50, %v3899_v11  ;;  %v7930_v11 = vld [vmem:[#allocation8_spill] sm:$0xff] }
 0x9b3   : > { %v3986_v16 = vadd.f32 %v3969_v5, %v3953_v27  ;;  %v3955_v24 = vadd.f32 %v3946_v14, %v3934_v63  ;;  %v5855_v63 = vld [vmem:[%s7881_s4 + $0xc4] ss:$12 sps:$4 sm:$0xff]  }
 0x9b4   : > { %v3987_v32 = vadd.f32 %v3969_v5, %v3954_v58  ;;  %v3956_v35 = vadd.f32 %v3950_v29, %v3935_v25  ;;  %4471 = vmatprep.mubr.bf16.mxu0 %v5855_v63  ;;  %v1654_v58 = vadd.f32 1e-08, %v7930_v11  ;;  %v7931_v25 = vld [vmem:[#allocation10_spill] sm:$0xff] }
 0x9b5   : > { %vm3994_vm5 = vcmp.ge.f32.partialorder %v3986_v16, 0.0  ;;  %v3988_v38 = vadd.f32 %v3974_v51, %v3955_v24  ;;  %v7932_v24 = vld [vmem:[#allocation7_spill] sm:$0xff] }
 0x9b6   : > { %v4002_v4 = vsel %vm3994_vm5, 1.4142135, %v5922_v3  ;;  %vm3995_vm11 = vcmp.ge.f32.partialorder %v3987_v32, 0.0  ;;  %v3989_v44 = vadd.f32 %v3974_v51, %v3956_v35  ;;  %v3903_v31 = vpop.f32.mrb[56].mxu1  ;;  %5893 = vrsqrt.f32 %v1654_v58  ;;  %v608_v35 = vld [vmem:[%s7879_s2 + $0xe0] sm:$0xff] }
 0x9b7   : > { %v4010_v47 = vmul.f32 %v4002_v4, %v3986_v16  ;;  %v4003_v62 = vsel %vm3995_vm11, 1.4142135, %v5922_v3  ;;  %v3936_v55 = vmul.f32 %v3925_v37, %v3903_v31  ;;  %v3905_v48 = vpop.f32.mrb[57].mxu1  ;;  %vm3996_vm12 = vcmp.ge.f32.partialorder %v3988_v38, 0.0  ;;  %v7933_v4 = vld [vmem:[#allocation9_spill] sm:$0xff]  ;;  %v610_v31 = vld [vmem:[%s7879_s2 + $0xf0] sm:$0xff] }
 0x9b8   : > { %v4011_v19 = vmul.f32 %v4003_v62, %v3987_v32  ;;  %vm3997_vm15 = vcmp.ge.f32.partialorder %v3989_v44, 0.0  ;;  %v3937_v50 = vmul.f32 %v3925_v37, %v3905_v48  ;;  %v3907_v13 = vpop.f32.mrb[58].mxu1  ;;  %v4004_v1 = vsel %vm3996_vm12, 1.4142135, %v5922_v3  ;;  %v611_v48 = vld [vmem:[%s7879_s2 + $0xf8] sm:$0xff] }
 0x9b9   : > { %v7499_v52 = vmul.f32 %v4021_v56, %v4010_v47  ;;  %v3909_v57 = vpop.f32.mrb[59].mxu1  ;;  %v4005_v51 = vsel %vm3997_vm15, 1.4142135, %v5922_v3  ;;  %v3957_v0 = vadd.f32 %v3946_v14, %v3936_v55  ;;  %v4012_v23 = vmul.f32 %v4004_v1, %v3988_v38  ;;  %v609_v38 = vld [vmem:[%s7879_s2 + $0xe8] sm:$0xff]  ;;  %v5141_v1 = vld [vmem:[%s7883_s6 + $0x80] sm:$0xff] }
 0x9ba   : > { %v7501_v8 = vmul.f32 %v4021_v56, %v4011_v19  ;;  %v3958_v5 = vadd.f32 %v3950_v29, %v3937_v50  ;;  %v4013_v37 = vmul.f32 %v4005_v51, %v3989_v44  ;;  %v3938_v21 = vmul.f32 %v7466_v41, %v3907_v13 }
 0x9bb   : > { %4054 = vrot.lane.b32.xlu1 %v7499_v52, %s5932_s17  ;;  %v3990_v59 = vadd.f32 %v7479_v61, %v3957_v0  ;;  %v7520_v40 = vmul.f32 %v7471_v7, %v4012_v23  ;;  %v1664_v16 = vadd.f32 1e-08, %v7931_v25  ;;  %v1659_v32 = vadd.f32 1e-08, %v7932_v24 }
 0x9bc   : > { %4056 = vrot.lane.b32.xlu0 %v7501_v8, %s5932_s17  ;;  %v3991_v56 = vadd.f32 %v7479_v61, %v3958_v5  ;;  %v7517_v39 = vpack.i.bf16 %v7501_v8, %v7499_v52  ;;  %v7523_v36 = vmul.f32 %v7471_v7, %v4013_v37  ;;  %v3939_v61 = vmul.f32 %v7466_v41, %v3909_v57 }
 0x9bd   : > { %vm3998_vm5 = vcmp.ge.f32.partialorder %v3990_v59, 0.0  ;;  %v3959_v42 = vadd.f32 %v3946_v14, %v3938_v21  ;;  %5895 = vrsqrt.f32 %v1664_v16  ;;  %v1669_v44 = vadd.f32 1e-08, %v7933_v4 }
 0x9be   : > { %vm3999_vm11 = vcmp.ge.f32.partialorder %v3991_v56, 0.0  ;;  %v4006_v2 = vsel %vm3998_vm5, 1.4142135, %v5922_v3  ;;  %v5752_v34 = vpack.i.bf16 %v7523_v36, %v7520_v40  ;;  %v3960_v10 = vadd.f32 %v3950_v29, %v3939_v61 }
 0x9bf   : > { %4134 = vrot.lane.b32.xlu1 %v7499_v52, %s5933_s24  ;;  %v4007_v7 = vsel %vm3999_vm11, 1.4142135, %v5922_v3  ;;  %v4014_v18 = vmul.f32 %v4006_v2, %v3990_v59  ;;  %v3992_v41 = vadd.f32 %v7469_v15, %v3959_v42  ;;  %5897 = vrsqrt.f32 %v1659_v32  ;;  %v5059_v59 = vld [vmem:[%s7886_s9 + $0x4] sm:$0x7] }
 0x9c0   : > { %4136 = vrot.lane.b32.xlu0 %v7501_v8, %s5933_s24  ;;  %v4015_v33 = vmul.f32 %v4007_v7, %v3991_v56  ;;  %v3993_v54 = vadd.f32 %v7469_v15, %v3960_v10  ;;  %v5894_v55 = vpop.eup %5893  ;;  %5899 = vrsqrt.f32 %v1669_v44  ;;  %v5142_v10 = vld [vmem:[%s7883_s6 + $0x88] sm:$0xff] }
 0x9c1   : > { %v7545_v14 = vmul.f32 %v7473_v49, %v4014_v18  ;;  %vm4000_vm12 = vcmp.ge.f32.partialorder %v3992_v41, 0.0 }
 0x9c2   : > { %v7548_v12 = vmul.f32 %v7473_v49, %v4015_v33  ;;  %vm4001_vm15 = vcmp.ge.f32.partialorder %v3993_v54, 0.0  ;;  %v4008_v29 = vsel %vm4000_vm12, 1.4142135, %v5922_v3 }
 0x9c3   : > { %5748 = vrot.lane.b32.xlu1 %v7517_v39, %s5934_s29  ;;  %v4009_v15 = vsel %vm4001_vm15, 1.4142135, %v5922_v3  ;;  %v4016_v49 = vmul.f32 %v4008_v29, %v3992_v41 }
 0x9c4   : > { %4060 = vrot.lane.b32.xlu0 %v7523_v36, %s5932_s17  ;;  %v5757_v6 = vpack.i.bf16 %v7548_v12, %v7545_v14  ;;  %v4017_v28 = vmul.f32 %v4009_v15, %v3993_v54  ;;  %v5144_v54 = vld [vmem:[%s7883_s6 + $0x98] sm:$0xff]  ;;  %v5143_v15 = vld [vmem:[%s7883_s6 + $0x90] sm:$0xff] }
 0x9c5   : > { %v7566_v22 = vmul.f32 %v7481_v43, %v4016_v49 }
 0x9c6   : > { %v7569_v27 = vmul.f32 %v7481_v43, %v4017_v28  ;;  %v5939_v28 = vmov 5  }
 0x9c7   : > { %4058 = vrot.lane.b32.xlu1 %v7520_v40, %s5932_s17  ;;  %v5896_v13 = vpop.eup %5895 }
 0x9c8   : > { %5753 = vrot.lane.b32.xlu0 %v5752_v34, %s5934_s29  ;;  %v5762_v43 = vpack.i.bf16 %v7569_v27, %v7566_v22 }
 0x9c9   : > { %v5898_v51 = vpop.eup %5897 }
 0x9ca   : > { %v5900_v56 = vpop.eup %5899 }
 0x9cb   : > { %4138 = vrot.lane.b32.xlu1 %v7520_v40, %s5933_s24 }
 0x9cc   : > { %4140 = vrot.lane.b32.xlu0 %v7523_v36, %s5933_s24 }
 0x9cf   : > { %4062 = vrot.lane.b32.xlu1 %v7545_v14, %s5932_s17 }
 0x9d0   : > { %4064 = vrot.lane.b32.xlu0 %v7548_v12, %s5932_s17 }
 0x9d3   : > { %4142 = vrot.lane.b32.xlu1 %v7545_v14, %s5933_s24 }
 0x9d4   : > { %4144 = vrot.lane.b32.xlu0 %v7548_v12, %s5933_s24 }
 0x9d7   : > { %5758 = vrot.lane.b32.xlu1 %v5757_v6, %s5934_s29 }
 0x9d8   : > { %4180 = vrot.lane.b32.xlu0 %v7501_v8, %s5918_s30 }
 0x9db   : > { %4066 = vrot.lane.b32.xlu1 %v7566_v22, %s5932_s17 }
 0x9dc   : > { %4068 = vrot.lane.b32.xlu0 %v7569_v27, %s5932_s17 }
 0x9df   : > { %4178 = vrot.lane.b32.xlu1 %v7499_v52, %s5918_s30 }
 0x9e0   : > { %4184 = vrot.lane.b32.xlu0 %v7523_v36, %s5918_s30 }
 0x9e3   : > { %4182 = vrot.lane.b32.xlu1 %v7520_v40, %s5918_s30 }
 0x9e4   : > { %4188 = vrot.lane.b32.xlu0 %v7548_v12, %s5918_s30 }
 0x9e7   : > { %4146 = vrot.lane.b32.xlu1 %v7566_v22, %s5933_s24 }
 0x9e8   : > { %5763 = vrot.lane.b32.xlu0 %v5762_v43, %s5934_s29 }
 0x9eb   : > { %4186 = vrot.lane.b32.xlu1 %v7545_v14, %s5918_s30 }
 0x9ec   : > { %4148 = vrot.lane.b32.xlu0 %v7569_v27, %s5933_s24 }
 0x9ef   : > { %4190 = vrot.lane.b32.xlu1 %v7566_v22, %s5918_s30 }
 0x9f0   : > { %4232 = vrot.lane.b32.xlu0 %v7523_v36, %s5911_s28 }
 0x9f3   : > { %4228 = vrot.lane.b32.xlu1 %v7501_v8, %s5911_s28 }
 0x9f4   : > { %4192 = vrot.lane.b32.xlu0 %v7569_v27, %s5918_s30  ;;  %s7929_s30 = smov 112  }
 0x9f7   : > { %4226 = vrot.lane.b32.xlu1 %v7499_v52, %s5911_s28 }
 0x9f8   : > { %4230 = vrot.lane.b32.xlu0 %v7520_v40, %s5911_s28 }
 0x9fb   : > { %4236 = vrot.lane.b32.xlu1 %v7548_v12, %s5911_s28 }
 0x9fc   : > { %4238 = vrot.lane.b32.xlu0 %v7566_v22, %s5911_s28 }
 0x9ff   : > { %4234 = vrot.lane.b32.xlu1 %v7545_v14, %s5911_s28 }
 0xa00   : > { %4276 = vrot.lane.b32.xlu0 %v7523_v36, %s5935_s0 }
 0xa03   : > { %4272 = vrot.lane.b32.xlu1 %v7501_v8, %s5935_s0 }
 0xa04   : > { %4240 = vrot.lane.b32.xlu0 %v7569_v27, %s5911_s28  ;;  %s529_s28 = scalar_lea.vmem %s7892_s15, %s5152_s19 }
 0xa07   : > { %4270 = vrot.lane.b32.xlu1 %v7499_v52, %s5935_s0 }
 0xa08   : > { %4274 = vrot.lane.b32.xlu0 %v7520_v40, %s5935_s0 }
 0xa0b   : > { %4280 = vrot.lane.b32.xlu1 %v7548_v12, %s5935_s0 }
 0xa0c   : > { %4284 = vrot.lane.b32.xlu0 %v7569_v27, %s5935_s0 }
 0xa0f   : > { %4278 = vrot.lane.b32.xlu1 %v7545_v14, %s5935_s0 }
 0xa10   : > { %4282 = vrot.lane.b32.xlu0 %v7566_v22, %s5935_s0 }
 0xa13   : > { %5768 = vrot.lane.b32.xlu1 %v7517_v39, %s7929_s30 }
 0xa14   : > { %5773 = vrot.lane.b32.xlu0 %v5752_v34, %s7929_s30 }
 0xa17   : > { %5778 = vrot.lane.b32.xlu1 %v5757_v6, %s7929_s30 }
 0xa18   : > { %5783 = vrot.lane.b32.xlu0 %v5762_v43, %s7929_s30 }
 0xa1b   : > { %4352 = vrot.lane.b32.xlu1 %v7501_v8, %s5937_s18 }
 0xa1c   : > { %4356 = vrot.lane.b32.xlu0 %v7523_v36, %s5937_s18 }
 0xa1f   : > { %4350 = vrot.lane.b32.xlu1 %v7499_v52, %s5937_s18 }
 0xa20   : > { %4354 = vrot.lane.b32.xlu0 %v7520_v40, %s5937_s18 }
 0xa23   : > { %4360 = vrot.lane.b32.xlu1 %v7548_v12, %s5937_s18 }
 0xa24   : > { %4364 = vrot.lane.b32.xlu0 %v7569_v27, %s5937_s18 }
 0xa27   : > { %4358 = vrot.lane.b32.xlu1 %v7545_v14, %s5937_s18 }
 0xa28   : > { %4362 = vrot.lane.b32.xlu0 %v7566_v22, %s5937_s18 }
 0xa2b   : > { %754 = vperm.xlu1 %5787, %v608_v35  }
 0xa2c   : > { %759 = vperm.xlu0 %5788, %v609_v38  }
 0xa2d   : > { %v4055_v47 = vpop.permute.xlu1 %4054 }
 0xa2e   : > { %v4057_v62 = vpop.permute.xlu0 %4056  ;;  %v4082_v5 = vsel %vm3395_vm13, 0.0, %v4055_v47 }
 0xa2f   : > { %764 = vperm.xlu1 %5787, %v610_v31   ;;  %v4070_v23 = vsel %vm3395_vm13, %v4055_v47, %v4057_v62  ;;  %v4086_v2 = vmul.f32 %v4082_v5, %v7237_v30 }
 0xa30   : > { %4547 = vperm.xlu0 %5788, %v5894_v55   ;;  %v4087_v34 = vmul.f32 %v4070_v23, %v7240_v45 }
 0xa31   : > { %v7668_v19 = vpop.permute.xlu1 %4134 }
 0xa32   : > { %v7670_v50 = vpop.permute.xlu0 %4136 }
 0xa33   : > { %769 = vperm.xlu1 %5787, %v611_v48  }
 0xa34   : > { %4557 = vperm.xlu0 %5788, %v5896_v13  }
 0xa35   : > { %v7672_v57 = vpop.permute.xlu1 %5748 }
 0xa36   : > { %v4061_v0 = vpop.permute.xlu0 %4060  ;;  %v5751_v55 = vunpack.i.h.bf16 %v7672_v57  ;;  %v5750_v48 = vunpack.i.l.bf16 %v7672_v57 }
 0xa37   : > { %4552 = vperm.xlu1 %5787, %v5898_v51  }
 0xa38   : > { %4601 = vperm.xlu0 %5788, %v5141_v1  }
 0xa39   : > { %v4059_v37 = vpop.permute.xlu1 %4058 }
 0xa3a   : > { %v4071_v39 = vsel %vm3395_vm13, %v4059_v37, %v4061_v0  ;;  %v4083_v21 = vsel %vm3395_vm13, 0.0, %v4059_v37  ;;  %v5754_v61 = vpop.permute.xlu0 %5753 }
 0xa3b   : > { %v4088_v7 = vmul.f32 %v4083_v21, %v7237_v30  ;;  %v4089_v42 = vmul.f32 %v4071_v39, %v7240_v45  ;;  %4562 = vperm.xlu1 %5787, %v5900_v56   ;;  %v5756_v32 = vunpack.i.h.bf16 %v5754_v61  ;;  %v5755_v35 = vunpack.i.l.bf16 %v5754_v61 }
 0xa3c   : > { %3183 = vperm.xlu0 %5788, %v5059_v59   ;;  %v4114_v21 = vsel %vm2200_vm4, %v5750_v48, %v5751_v55 }
 0xa3d   : > { %v4094_v18 = vpack.c.bf16 %v4088_v7, %v4086_v2  ;;  %v4139_v33 = vpop.permute.xlu1 %4138  ;;  %v4095_v41 = vpack.c.bf16 %v4089_v42, %v4087_v34  ;;  %v4115_v37 = vsel %vm2200_vm4, %v5755_v35, %v5756_v32  ;;  %v5125_v34 = vpack.c.bf16 %v5755_v35, %v5750_v48 }
 0xa3e   : > { %v4141_v29 = vpop.permute.xlu0 %4140  ;;  %v4131_v57 = vpack.c.bf16 %v4115_v37, %v4114_v21 }
 0xa3f   : > { %4439 = vmatprep.subr.bf16.mxu0 %v4095_v41  ;;  %4606 = vperm.xlu1 %5787, %v5142_v10   ;;  %v4151_v7 = vsel %vm1821_vm3, %v4139_v33, %v4141_v29 }
 0xa40   : > { %4440 = vmatpush1.bf16.msra.mxu0 %v4094_v18  ;;  %4616 = vperm.xlu0 %5788, %v5144_v54   ;;  %v4150_v54 = vsel %vm1821_vm3, %v7668_v19, %v7670_v50 }
 0xa41   : > { %v4063_v49 = vpop.permute.xlu1 %4062  ;;  %v4167_v32 = vmul.f32 %v4150_v54, %v7313_v26 }
 0xa42   : > { %v4065_v6 = vpop.permute.xlu0 %4064  ;;  %v4084_v31 = vsel %vm3395_vm13, 0.0, %v4063_v49 }
 0xa43   : > { %4611 = vperm.xlu1 %5787, %v5143_v15   ;;  %v4072_v38 = vsel %vm3395_vm13, %v4063_v49, %v4065_v6  ;;  %v4090_v5 = vmul.f32 %v4084_v31, %v7237_v30  ;;  %v4163_v6 = vsel %vm1821_vm3, 0.0, %v4139_v33 }
 0xa44   : > { %5790 = vset.pattern.permute.xlu0 %v5939_v28  ;;  %v4091_v51 = vmul.f32 %v4072_v38, %v7240_v45  ;;  %v4168_v50 = vmul.f32 %v4163_v6, %v7322_v46 }
 0xa45   : > { %v7697_v43 = vpop.permute.xlu1 %4142 }
 0xa46   : > { %v4145_v63 = vpop.permute.xlu0 %4144 }
 0xa47   : > { %5789 = vset.pattern.permute.xlu1 %v5939_v28  ;;  %v4169_v28 = vmul.f32 %v4151_v7, %v7313_v26 }
 0xa49   : > { %v5759_v11 = vpop.permute.xlu1 %5758 }
 0xa4a   : > { %v7699_v58 = vpop.f32.mrb[52].mxu0  ;;  %v7701_v25 = vpop.permute.xlu0 %4180  ;;  %v5761_v42 = vunpack.i.h.bf16 %v5759_v11  ;;  %v5760_v10 = vunpack.i.l.bf16 %v5759_v11 }
 0xa4b   : > { %v5481_v16 = vpop.f32.mrb[53].mxu0 }
 0xa4c   : > { %v3226_v24 = vpop.f32.mrb[54].mxu0  ;;  %v4116_v29 = vsel %vm2200_vm4, %v5760_v10, %v5761_v42 }
 0xa4d   : > { %v5482_v4 = vpop.f32.mrb[55].mxu0  ;;  %v4067_v44 = vpop.permute.xlu1 %4066  ;;  %v4162_v24 = vsel %vm1821_vm3, 0.0, %v7668_v19 }
 0xa4e   : > { %v4085_v47 = vsel %vm3395_vm13, 0.0, %v4067_v44  ;;  %v4069_v62 = vpop.permute.xlu0 %4068  ;;  %v4152_v4 = vsel %vm1821_vm3, %v7697_v43, %v4145_v63  ;;  %v4166_v19 = vmul.f32 %v4162_v24, %v7322_v46  ;;  %v4164_v63 = vsel %vm1821_vm3, 0.0, %v7697_v43 }
 0xa4f   : > { %v4092_v13 = vmul.f32 %v4085_v47, %v7237_v30  ;;  %v4073_v1 = vsel %vm3395_vm13, %v4067_v44, %v4069_v62  ;;  %v4175_v62 = vpack.c.bf16 %v4169_v28, %v4167_v32  ;;  %v4170_v20 = vmul.f32 %v4164_v63, %v7322_v46 }
 0xa50   : > { %v4093_v0 = vmul.f32 %v4073_v1, %v7240_v45 }
 0xa51   : > { %v4179_v23 = vpop.permute.xlu1 %4178  ;;  %v4096_v39 = vpack.c.bf16 %v4092_v13, %v4090_v5  ;;  %v4171_v13 = vmul.f32 %v4152_v4, %v7313_v26 }
 0xa52   : > { %v4185_v59 = vpop.permute.xlu0 %4184  ;;  %v4097_v56 = vpack.c.bf16 %v4093_v0, %v4091_v51  ;;  %v4174_v51 = vpack.c.bf16 %v4168_v50, %v4166_v19  ;;  %v4194_v0 = vsel %vm1796_vm9, %v4179_v23, %v7701_v25  ;;  %v4206_v43 = vsel %vm1796_vm9, 0.0, %v4179_v23 }
 0xa53   : > { %v4211_v21 = vmul.f32 %v4194_v0, %v7240_v45 }
 0xa54   : > { %4441 = vmatprep.subr.bf16.mxu0 %v4097_v56 }
 0xa55   : > { %v4183_v61 = vpop.permute.xlu1 %4182  ;;  %4442 = vmatpush1.bf16.msra.mxu0 %v4096_v39 }
 0xa56   : > { %4443 = vmatprep.subr.bf16.mxu0 %v4131_v57  ;;  %v4189_v2 = vpop.permute.xlu0 %4188  ;;  %v4195_v55 = vsel %vm1796_vm9, %v4183_v61, %v4185_v59  ;;  %v4207_v37 = vsel %vm1796_vm9, 0.0, %v4183_v61 }
 0xa57   : > { %v4213_v59 = vmul.f32 %v4195_v55, %v7240_v45  ;;  %v4224_v55 = vpack.c.bf16 %v7566_v22, %v7545_v14 }
 0xa59   : > { %v4147_v18 = vpop.permute.xlu1 %4146  ;;  %5126 = vmatpush1.bf16.msk.msra.mxu0 %vm7300_vm2, %v5125_v34  ;;  %v4212_v34 = vmul.f32 %v4207_v37, %v7237_v30 }
 0xa5a   : > { %v5764_v41 = vpop.permute.xlu0 %5763  ;;  %v4165_v31 = vsel %vm1821_vm3, 0.0, %v4147_v18 }
 0xa5b   : > { %v5766_v15 = vunpack.i.h.bf16 %v5764_v41  ;;  %v5765_v49 = vunpack.i.l.bf16 %v5764_v41  ;;  %v4172_v5 = vmul.f32 %v4165_v31, %v7322_v46  ;;  %v4210_v41 = vmul.f32 %v4206_v43, %v7237_v30 }
 0xa5d   : > { %v4187_v16 = vpop.permute.xlu1 %4186  ;;  %v4117_v11 = vsel %vm2200_vm4, %v5765_v49, %v5766_v15  ;;  %v5130_v33 = vpack.c.bf16 %v5765_v49, %v5760_v10  ;;  %v4176_v25 = vpack.c.bf16 %v4172_v5, %v4170_v20  ;;  %v4218_v6 = vpack.c.bf16 %v4212_v34, %v4210_v41 }
 0xa5e   : > { %v4149_v35 = vpop.permute.xlu0 %4148  ;;  %v4133_v38 = vpack.c.bf16 %v4117_v11, %v4116_v29  ;;  %v4196_v7 = vsel %vm1796_vm9, %v4187_v16, %v4189_v2  ;;  %v4208_v23 = vsel %vm1796_vm9, 0.0, %v4187_v16 }
 0xa5f   : > { %v4153_v44 = vsel %vm1821_vm3, %v4147_v18, %v4149_v35  ;;  %v4219_v18 = vpack.c.bf16 %v4213_v59, %v4211_v21  ;;  %v4215_v15 = vmul.f32 %v4196_v7, %v7240_v45  ;;  %v4214_v29 = vmul.f32 %v4208_v23, %v7237_v30 }
 0xa60   : > { %v4173_v47 = vmul.f32 %v4153_v44, %v7313_v26  ;;  %4445 = vmatprep.subr.bf16.mxu0 %v4133_v38  ;;  %v4223_v35 = vpack.c.bf16 %v7523_v36, %v7501_v8  ;;  %v4225_v8 = vpack.c.bf16 %v7569_v27, %v7548_v12 }
 0xa61   : > { %v4191_v48 = vpop.permute.xlu1 %4190  ;;  %5131 = vmatpush1.bf16.msk.msra.mxu0 %vm7300_vm2, %v5130_v33  ;;  %v4222_v33 = vpack.c.bf16 %v7520_v40, %v7499_v52 }
 0xa62   : > { %v4233_v1 = vpop.permute.xlu0 %4232  ;;  %4447 = vmatprep.subr.bf16.mxu0 %v4175_v62  ;;  %v4177_v56 = vpack.c.bf16 %v4173_v47, %v4171_v13  ;;  %v4209_v42 = vsel %vm1796_vm9, 0.0, %v4191_v48 }
 0xa63   : > { %v4216_v2 = vmul.f32 %v4209_v42, %v7237_v30  ;;  %v4255_v4 = vsel %vm3605_vm10, %v4233_v1, 0.0 }
 0xa64   : > { %v4261_v62 = vmul.f32 %v4255_v4, %v7313_v26 }
 0xa65   : > { %v4229_v39 = vpop.permute.xlu1 %4228  ;;  %4448 = vmatpush1.bf16.msra.mxu0 %v4174_v51  ;;  %v4220_v32 = vpack.c.bf16 %v4216_v2, %v4214_v29 }
 0xa66   : > { %v4193_v57 = vpop.permute.xlu0 %4192  ;;  %4449 = vmatprep.subr.bf16.mxu0 %v4177_v56  ;;  %v4254_v16 = vsel %vm3605_vm10, %v4229_v39, 0.0 }
 0xa67   : > { %v4197_v61 = vsel %vm1796_vm9, %v4191_v48, %v4193_v57  ;;  %v4259_v44 = vmul.f32 %v4254_v16, %v7313_v26 }
 0xa68   : > { %v4217_v10 = vmul.f32 %v4197_v61, %v7240_v45 }
 0xa69   : > { %v4227_v54 = vpop.permute.xlu1 %4226  ;;  %4450 = vmatpush1.bf16.msra.mxu0 %v4176_v25  ;;  %v4267_v27 = vpack.c.bf16 %v4261_v62, %v4259_v44 }
 0xa6a   : > { %v4231_v49 = vpop.permute.xlu0 %4230  ;;  %4451 = vmatprep.subr.bf16.mxu0 %v4219_v18  ;;  %v4221_v28 = vpack.c.bf16 %v4217_v10, %v4215_v15  ;;  %v4242_v31 = vsel %vm3605_vm10, %v4227_v54, %v4229_v39 }
 0xa6b   : > { %v4243_v47 = vsel %vm3605_vm10, %v4231_v49, %v4233_v1  ;;  %v4258_v52 = vmul.f32 %v4242_v31, %v7322_v46 }
 0xa6c   : > { %v4260_v40 = vmul.f32 %v4243_v47, %v7322_v46 }
 0xa6d   : > { %v4237_v11 = vpop.permute.xlu1 %4236  ;;  %4452 = vmatpush1.bf16.msra.mxu0 %v4218_v6 }
 0xa6e   : > { %v4239_v24 = vpop.permute.xlu0 %4238  ;;  %4453 = vmatprep.subr.bf16.mxu0 %v4221_v28  ;;  %v4256_v48 = vsel %vm3605_vm10, %v4237_v11, 0.0  ;;  %v4266_v5 = vpack.c.bf16 %v4260_v40, %v4258_v52 }
 0xa6f   : > { %v4263_v0 = vmul.f32 %v4256_v48, %v7313_v26 }
 0xa71   : > { %v4235_v38 = vpop.permute.xlu1 %4234  ;;  %4454 = vmatpush1.bf16.msra.mxu0 %v4220_v32 }
 0xa72   : > { %v4277_v50 = vpop.permute.xlu0 %4276  ;;  %4455 = vmatprep.subr.bf16.mxu0 %v4223_v35  ;;  %v4244_v14 = vsel %vm3605_vm10, %v4235_v38, %v4237_v11 }
 0xa73   : > { %v4299_v37 = vsel %vm3650_vm14, %v4277_v50, 0.0  ;;  %v4262_v21 = vmul.f32 %v4244_v14, %v7322_v46  ;;  %v5853_v14 = vld [vmem:[%s7881_s4 + $0xc0] ss:$12 sps:$4 sm:$0xff]  }
 0xa74   : > { %v4305_v34 = vmul.f32 %v4299_v37, %v7240_v45 }
 0xa75   : > { %v4273_v36 = vpop.permute.xlu1 %4272  ;;  %4456 = vmatpush1.bf16.msra.mxu0 %v4222_v33 }
 0xa76   : > { %v4241_v19 = vpop.permute.xlu0 %4240  ;;  %4457 = vmatprep.subr.bf16.mxu0 %v4225_v8  ;;  %v4298_v1 = vsel %vm3650_vm14, %v4273_v36, 0.0 }
 0xa77   : > { %v4257_v63 = vsel %vm3605_vm10, %v4241_v19, 0.0  ;;  %v4245_v13 = vsel %vm3605_vm10, %v4239_v24, %v4241_v19  ;;  %v4303_v56 = vmul.f32 %v4298_v1, %v7240_v45 }
 0xa78   : > { %v4265_v12 = vmul.f32 %v4257_v63, %v7313_v26  ;;  %v4264_v59 = vmul.f32 %v4245_v13, %v7322_v46 }
 0xa79   : > { %v4271_v51 = vpop.permute.xlu1 %4270  ;;  %4458 = vmatpush1.bf16.msra.mxu0 %v4224_v55  ;;  %v4311_v23 = vpack.c.bf16 %v4305_v34, %v4303_v56 }
 0xa7a   : > { %v4275_v22 = vpop.permute.xlu0 %4274  ;;  %4459 = vmatprep.subr.bf16.mxu0 %v4267_v27  ;;  %v4286_v20 = vsel %vm3650_vm14, %v4271_v51, %v4273_v36  ;;  %v4269_v43 = vpack.c.bf16 %v4265_v12, %v4263_v0  ;;  %v4268_v61 = vpack.c.bf16 %v4264_v59, %v4262_v21 }
 0xa7b   : > { %v4287_v39 = vsel %vm3650_vm14, %v4275_v22, %v4277_v50  ;;  %v4302_v42 = vmul.f32 %v4286_v20, %v7237_v30 }
 0xa7c   : > { %v4304_v10 = vmul.f32 %v4287_v39, %v7237_v30 }
 0xa7d   : > { %v4281_v57 = vpop.permute.xlu1 %4280  ;;  %4460 = vmatpush1.bf16.msra.mxu0 %v4266_v5  ;;  %v5856_v5 = vld [vmem:[%s7881_s4 + $0xdc] ss:$12 sps:$4 sm:$0xff]  }
 0xa7e   : > { %v4300_v25 = vsel %vm3650_vm14, %v4281_v57, 0.0  ;;  %v4285_v7 = vpop.permute.xlu0 %4284  ;;  %4461 = vmatprep.subr.bf16.mxu0 %v4269_v43  ;;  %v4310_v2 = vpack.c.bf16 %v4304_v10, %v4302_v42  ;;  %v5858_v42 = vld [vmem:[%s7881_s4 + $0xd8] ss:$12 sps:$4 sm:$0xff]  }
 0xa7f   : > { %v4301_v18 = vsel %vm3650_vm14, %v4285_v7, 0.0  ;;  %v4307_v41 = vmul.f32 %v4300_v25, %v7240_v45 }
 0xa80   : > { %v4309_v54 = vmul.f32 %v4301_v18, %v7240_v45 }
 0xa81   : > { %v4279_v15 = vpop.permute.xlu1 %4278  ;;  %4462 = vmatpush1.bf16.msra.mxu0 %v4268_v61 }
 0xa82   : > { %v4288_v49 = vsel %vm3650_vm14, %v4279_v15, %v4281_v57  ;;  %v4283_v6 = vpop.permute.xlu0 %4282  ;;  %4463 = vmatprep.subr.bf16.mxu0 %v4311_v23  ;;  %v4313_v24 = vpack.c.bf16 %v4309_v54, %v4307_v41 }
 0xa83   : > { %v4306_v28 = vmul.f32 %v4288_v49, %v7237_v30  ;;  %v4289_v29 = vsel %vm3650_vm14, %v4283_v6, %v4285_v7  ;;  %v5859_v6 = vld [vmem:[%s7881_s4 + $0xc8] ss:$12 sps:$4 sm:$0xff]  }
 0xa84   : > { %v4308_v11 = vmul.f32 %v4289_v29, %v7237_v30 }
 0xa85   : > { %v5769_v32 = vpop.permute.xlu1 %5768  ;;  %4464 = vmatpush1.bf16.msra.mxu0 %v4310_v2  ;;  %v5860_v2 = vld [vmem:[%s7881_s4 + $0xe0] ss:$12 sps:$4 sm:$0xff]  }
 0xa86   : > { %v4312_v35 = vpack.c.bf16 %v4308_v11, %v4306_v28  ;;  %v5771_v16 = vunpack.i.h.bf16 %v5769_v32  ;;  %v5770_v45 = vunpack.i.l.bf16 %v5769_v32  ;;  %v5774_v38 = vpop.permute.xlu0 %5773  ;;  %4465 = vmatprep.subr.bf16.mxu0 %v4313_v24  ;;  %v7935_v24 = vld [vmem:[#allocation6_spill] sm:$0xff] }
 0xa87   : > { %v5776_v50 = vunpack.i.h.bf16 %v5774_v38  ;;  %v5775_v4 = vunpack.i.l.bf16 %v5774_v38 }
 0xa88   : > { %v4330_v33 = vsel %vm3695_vm8, %v5770_v45, %v5771_v16 }
 0xa89   : > { %v5133_v44 = vpack.c.bf16 %v5776_v50, %v5771_v16  ;;  %v4331_v31 = vsel %vm3695_vm8, %v5775_v4, %v5776_v50  ;;  %v5779_v47 = vpop.permute.xlu1 %5778  ;;  %4466 = vmatpush1.bf16.msra.mxu0 %v4312_v35  ;;  %v7936_v16 = vld [vmem:[#allocation3_spill] sm:$0xff]  ;;  %v7937_v4 = vld [vmem:[#allocation5_spill] sm:$0xff] }
 0xa8a   : > { %v4346_v8 = vpack.c.bf16 %v4331_v31, %v4330_v33  ;;  %v5781_v36 = vunpack.i.h.bf16 %v5779_v47  ;;  %v5780_v30 = vunpack.i.l.bf16 %v5779_v47  ;;  %v5784_v62 = vpop.permute.xlu0 %5783 }
 0xa8b   : > { %v5786_v19 = vunpack.i.h.bf16 %v5784_v62  ;;  %v5785_v55 = vunpack.i.l.bf16 %v5784_v62  ;;  %5134 = vmatprep.subr.msk.bf16.mxu0 %vm7406_vm6, %v5133_v44 }
 0xa8c   : > { %v4332_v52 = vsel %vm3695_vm8, %v5780_v30, %v5781_v36  ;;  %v5147_v30 = vld [vmem:[%s7886_s9 + $0x8] sm:$0x7] }
 0xa8d   : > { %v5136_v40 = vpack.c.bf16 %v5786_v19, %v5781_v36  ;;  %v4333_v48 = vsel %vm3695_vm8, %v5785_v55, %v5786_v19  ;;  %v4353_v63 = vpop.permute.xlu1 %4352  ;;  %4468 = vmatpush1.bf16.msra.mxu0 %v4346_v8  ;;  %v5140_v55 = vld [vmem:[%s7884_s7 + $0x8] sm:$0x3] }
 0xa8e   : > { %v4348_v13 = vpack.c.bf16 %v4333_v48, %v4332_v52  ;;  %v4378_v12 = vsel %vm3732_vm7, %v4353_v63, 0.0  ;;  %v4357_v27 = vpop.permute.xlu0 %4356  ;;  %v4583_v48 = vrot.slane %v5140_v55, %v6450_v60 }
 0xa8f   : > { %v4383_v1 = vmul.f32 %v4378_v12, %v7313_v26  ;;  %v4379_v51 = vsel %vm3732_vm7, %v4357_v27, 0.0  ;;  %5137 = vmatprep.subr.msk.bf16.mxu0 %vm7406_vm6, %v5136_v40  ;;  %v4579_v40 = vrot.slane %v5140_v55, %v6441_v9 }
 0xa90   : > { %v4385_v0 = vmul.f32 %v4379_v51, %v7313_v26 }
 0xa91   : > { %v4351_v22 = vpop.permute.xlu1 %4350  ;;  %4470 = vmatpush1.bf16.msra.mxu0 %v4348_v13 }
 0xa92   : > { %v4366_v37 = vsel %vm3732_vm7, %v4351_v22, %v4353_v63  ;;  %v4355_v59 = vpop.permute.xlu0 %4354  ;;  %v4391_v56 = vpack.c.bf16 %v4385_v0, %v4383_v1 }
 0xa93   : > { %v4382_v20 = vmul.f32 %v4366_v37, %v7322_v46  ;;  %v4367_v53 = vsel %vm3732_vm7, %v4355_v59, %v4357_v27 }
 0xa94   : > { %v4384_v39 = vmul.f32 %v4367_v53, %v7322_v46  ;;  %4472 = vmatmul.mubr.bf16.vlgmr.msra.gmra.mrb[56].mxu0 %v5853_v14  ;;  %4492 = vmatprep.subr.bf16.mxu0 %v4391_v56 }
 0xa95   : > { %v4361_v43 = vpop.permute.xlu1 %4360  ;;  %4481 = vmatprep.mubr.bf16.mxu0 %v5856_v5 }
 0xa96   : > { %v4390_v21 = vpack.c.bf16 %v4384_v39, %v4382_v20  ;;  %v4380_v57 = vsel %vm3732_vm7, %v4361_v43, 0.0  ;;  %v4365_v34 = vpop.permute.xlu0 %4364 }
 0xa97   : > { %v4387_v25 = vmul.f32 %v4380_v57, %v7313_v26  ;;  %v4381_v7 = vsel %vm3732_vm7, %v4365_v34, 0.0 }
 0xa98   : > { %v4389_v61 = vmul.f32 %v4381_v7, %v7313_v26  ;;  %4493 = vmatpush1.bf16.msra.mxu0 %v4390_v21 }
 0xa99   : > { %v4359_v10 = vpop.permute.xlu1 %4358 }
 0xa9a   : > { %v4368_v18 = vsel %vm3732_vm7, %v4359_v10, %v4361_v43  ;;  %v4363_v41 = vpop.permute.xlu0 %4362  ;;  %v4393_v54 = vpack.c.bf16 %v4389_v61, %v4387_v25 }
 0xa9b   : > { %v4386_v23 = vmul.f32 %v4368_v18, %v7322_v46  ;;  %v4369_v15 = vsel %vm3732_vm7, %v4363_v41, %v4365_v34 }
 0xa9c   : > { %v4388_v49 = vmul.f32 %v4369_v15, %v7322_v46  ;;  %4482 = vmatmul.mubr.bf16.gmra.mrb[60].mxu0 %v5858_v42  ;;  %4494 = vmatprep.subr.bf16.mxu0 %v4393_v54  ;;  %v7934_v46 = vld [vmem:[#allocation4_spill] sm:$0xff] }
 0xa9d   : > { %4524 = vmatprep.mubr.bf16.mxu0 %v7918_v17 }
 0xa9e   : > { %v4392_v26 = vpack.c.bf16 %v4388_v49, %v4386_v23 }
 0xaa0   : > { %4495 = vmatpush1.bf16.msra.mxu0 %v4392_v26 }
 0xaa4   : > { %5138 = vmatmul.mubr.msk.bf16.vlgmr.msra.gmra.mrb[56].mxu0 %vm1070_vm1, %v5859_v6 }
 0xaa5   : > { %4534 = vmatprep.mubr.bf16.mxu0 %v7918_v17 }
 0xaaa   : > { %v755_v28 = vpop.permute.xlu1 %754 }
 0xaab   : > { %v1048_v29 = vadd.f32 %v7934_v46, %v755_v28  ;;  %v760_v11 = vpop.permute.xlu0 %759 }
 0xaac   : > { %v1051_v32 = vadd.f32 %v7935_v24, %v760_v11  ;;  %5139 = vmatmul.mubr.msk.bf16.gmra.mrb[60].mxu0 %vm1070_vm1, %v5860_v2 }
 0xaad   : > { %4700 = vperm.xlu1 %5789, %v1048_v29  }
 0xaae   : > { %v765_v35 = vpop.permute.xlu1 %764  ;;  %4705 = vperm.xlu0 %5790, %v1051_v32  }
 0xaaf   : > { %v1056_v45 = vadd.f32 %v7936_v16, %v765_v35  ;;  %v4548_v38 = vpop.permute.xlu0 %4547 }
 0xab1   : > { %4710 = vperm.xlu1 %5789, %v1056_v45  }
 0xab2   : > { %v770_v50 = vpop.permute.xlu1 %769  ;;  %5791 = vset.pattern.permute.xlu0 %v7918_v17 }
 0xab3   : > { %v1059_v33 = vadd.f32 %v7937_v4, %v770_v50  ;;  %v4558_v44 = vpop.permute.xlu0 %4557  ;;  %4734 = vperm.xlu0 %5791, %v5147_v30  }
 0xab5   : > { %4715 = vperm.xlu1 %5789, %v1059_v33  }
 0xab6   : > { %v4553_v62 = vpop.permute.xlu1 %4552 }
 0xab7   : > { %v4602_v31 = vpop.permute.xlu0 %4601 }
 0xaba   : > { %v4563_v19 = vpop.permute.xlu1 %4562 }
 0xabb   : > { %v3184_v47 = vpop.permute.xlu0 %3183 }
 0xabc   : > { %v3224_v8 = vadd.f32 %v7699_v58, %v3184_v47 }
 0xabe   : > { %v4651_v36 = vpack.c.bf16 %v3224_v8, %v3224_v8  ;;  %v4607_v52 = vpop.permute.xlu1 %4606 }
 0xabf   : > { %v4617_v9 = vpop.permute.xlu0 %4616 }
 0xac0   : > { %5145 = vmatmul.mubr.msk.bf16.vlgmr.msra.gmra.mrb[60].mxu1 %vm852_vm0, %v4651_v36 }
 0xac1   : > { %4772 = vmatprep.mubr.bf16.mxu1 %v7918_v17 }
 0xac2   : > { %v4612_v22 = vpop.permute.xlu1 %4611 }
 0xb2c   : > { %v4701_v43 = vpop.permute.xlu1 %4700 }
 0xb2d   : > { %v4706_v15 = vpop.permute.xlu0 %4705 }
 0xb30   : > { %v4711_v16 = vpop.permute.xlu1 %4710 }
 0xb34   : > { %v4716_v55 = vpop.permute.xlu1 %4715 }
 0xb77   : > { %v4526_v58 = vpop.f32.mrb[56].mxu0 }
 0xb78   : > { %v4565_v63 = vmul.f32 %v4548_v38, %v4526_v58  ;;  %v4528_v13 = vpop.f32.mrb[57].mxu0 }
 0xb79   : > { %v4566_v17 = vmul.f32 %v4548_v38, %v4528_v13  ;;  %v4530_v12 = vpop.f32.mrb[58].mxu0 }
 0xb7a   : > { %v4586_v27 = vadd.f32 %v4579_v40, %v4565_v63  ;;  %v4567_v1 = vmul.f32 %v4553_v62, %v4530_v12  ;;  %v4532_v51 = vpop.f32.mrb[59].mxu0 }
 0xb7b   : > { %v4587_v0 = vadd.f32 %v4583_v48, %v4566_v17  ;;  %v4568_v14 = vmul.f32 %v4553_v62, %v4532_v51  ;;  %v5146_v17 = vld [vmem:[%s7885_s8 + $0x4] sm:$0x3] }
 0xb7c   : > { %v4619_v5 = vadd.f32 %v4602_v31, %v4586_v27  ;;  %v4588_v37 = vadd.f32 %v4579_v40, %v4567_v1 }
 0xb7d   : > { %v4620_v59 = vadd.f32 %v4602_v31, %v4587_v0  ;;  %v4589_v56 = vadd.f32 %v4583_v48, %v4568_v14 }
 0xb7e   : > { %vm4627_vm0 = vcmp.ge.f32.partialorder %v4619_v5, 0.0  ;;  %v4621_v20 = vadd.f32 %v4607_v52, %v4588_v37 }
 0xb7f   : > { %v4635_v53 = vsel %vm4627_vm0, 1.4142135, %v5922_v3  ;;  %vm4628_vm3 = vcmp.ge.f32.partialorder %v4620_v59, 0.0  ;;  %v4622_v60 = vadd.f32 %v4607_v52, %v4589_v56  ;;  %v4536_v39 = vpop.f32.mrb[60].mxu0 }
 0xb80   : > { %v4643_v21 = vmul.f32 %v4635_v53, %v4619_v5  ;;  %v4636_v57 = vsel %vm4628_vm3, 1.4142135, %v5922_v3  ;;  %vm4629_vm9 = vcmp.ge.f32.partialorder %v4621_v20, 0.0  ;;  %v4569_v34 = vmul.f32 %v4558_v44, %v4536_v39  ;;  %v4538_v25 = vpop.f32.mrb[61].mxu0 }
 0xb81   : > { %v4637_v7 = vsel %vm4629_vm9, 1.4142135, %v5922_v3  ;;  %vm4630_vm4 = vcmp.ge.f32.partialorder %v4622_v60, 0.0  ;;  %v4570_v61 = vmul.f32 %v4558_v44, %v4538_v25  ;;  %v4540_v42 = vpop.f32.mrb[62].mxu0  ;;  %v4644_v10 = vmul.f32 %v4636_v57, %v4620_v59 }
 0xb82   : > { %v4645_v18 = vmul.f32 %v4637_v7, %v4621_v20  ;;  %v4638_v41 = vsel %vm4630_vm4, 1.4142135, %v5922_v3  ;;  %v4590_v54 = vadd.f32 %v4579_v40, %v4569_v34  ;;  %v4542_v23 = vpop.f32.mrb[63].mxu0  ;;  %v4571_v6 = vmul.f32 %v4563_v19, %v4540_v42 }
 0xb83   : > { %v4646_v49 = vmul.f32 %v4638_v41, %v4622_v60  ;;  %v4591_v26 = vadd.f32 %v4583_v48, %v4570_v61  ;;  %v4572_v2 = vmul.f32 %v4563_v19, %v4542_v23  ;;  %v4718_v28 = vmul.f32 %v4701_v43, %v4643_v21 }
 0xb84   : > { %v4720_v46 = vmul.f32 %v4706_v15, %v4645_v18  ;;  %v4623_v29 = vadd.f32 %v4612_v22, %v4590_v54  ;;  %v4592_v24 = vadd.f32 %v4579_v40, %v4571_v6  ;;  %v4719_v45 = vmul.f32 %v4701_v43, %v4644_v10 }
 0xb85   : > { %v4624_v11 = vadd.f32 %v4612_v22, %v4591_v26  ;;  %v4593_v32 = vadd.f32 %v4583_v48, %v4572_v2  ;;  %v4721_v35 = vmul.f32 %v4706_v15, %v4646_v49 }
 0xb86   : > { %vm4631_vm13 = vcmp.ge.f32.partialorder %v4623_v29, 0.0  ;;  %v4726_v38 = vpack.c.bf16 %v4720_v46, %v4718_v28  ;;  %v4625_v4 = vadd.f32 %v4617_v9, %v4592_v24 }
 0xb87   : > { %v4639_v50 = vsel %vm4631_vm13, 1.4142135, %v5922_v3  ;;  %vm4632_vm2 = vcmp.ge.f32.partialorder %v4624_v11, 0.0  ;;  %v4626_v33 = vadd.f32 %v4617_v9, %v4593_v32  ;;  %v4727_v31 = vpack.c.bf16 %v4721_v35, %v4719_v45 }
 0xb88   : > { %v4640_v44 = vsel %vm4632_vm2, 1.4142135, %v5922_v3  ;;  %v4647_v47 = vmul.f32 %v4639_v50, %v4623_v29  ;;  %vm4633_vm10 = vcmp.ge.f32.partialorder %v4625_v4, 0.0 }
 0xb89   : > { %v4648_v8 = vmul.f32 %v4640_v44, %v4624_v11  ;;  %vm4634_vm14 = vcmp.ge.f32.partialorder %v4626_v33, 0.0  ;;  %v4641_v36 = vsel %vm4633_vm10, 1.4142135, %v5922_v3  ;;  %4740 = vmatprep.subr.bf16.mxu1 %v4727_v31 }
 0xb8a   : > { %v4642_v30 = vsel %vm4634_vm14, 1.4142135, %v5922_v3  ;;  %v4649_v62 = vmul.f32 %v4641_v36, %v4625_v4  ;;  %4741 = vmatpush1.bf16.msra.mxu1 %v4726_v38  ;;  %v4722_v52 = vmul.f32 %v4711_v16, %v4647_v47  ;;  %v4735_v3 = vpop.permute.xlu0 %4734 }
 0xb8b   : > { %v4650_v19 = vmul.f32 %v4642_v30, %v4626_v33  ;;  %v4723_v58 = vmul.f32 %v4711_v16, %v4648_v8 }
 0xb8c   : > { %v4724_v40 = vmul.f32 %v4716_v55, %v4649_v62 }
 0xb8d   : > { %v4725_v48 = vmul.f32 %v4716_v55, %v4650_v19 }
 0xb8e   : > { %v4728_v13 = vpack.c.bf16 %v4724_v40, %v4722_v52 }
 0xb8f   : > { %v4729_v63 = vpack.c.bf16 %v4725_v48, %v4723_v58 }
 0xb91   : > { %4742 = vmatprep.subr.bf16.mxu1 %v4729_v63 }
 0xb92   : > { %4743 = vmatpush1.bf16.msra.mxu1 %v4728_v13 }
 0xb95   : > { %5148 = vmatmul.mubr.msk.bf16.vlgmr.msra.gmra.mrb[60].mxu1 %vm1070_vm1, %v5146_v17 }
 0xc68   : > { %v4774_v12 = vpop.f32.mrb[60].mxu1 }
 0xc69   : > { %v4775_v27 = vadd.f32 %v4774_v12, %v4735_v3  ;;  %v4776_v1 = vpop.f32.mrb[61].mxu1 }
 0xc6a   : > { %v4777_v51 = vadd.f32 %v4776_v1, %v4735_v3  ;;  %v4778_v0 = vpop.f32.mrb[62].mxu1 }
 0xc6b   : > { %v4779_v14 = vpop.f32.mrb[63].mxu1 }
 0xc6c   : > { %v4785_v22 = vcombine.low %v4775_v27, %v4777_v51 }
 0xc6e   : > { %4787 = vst [vmem:[%s529_s28] sm:$0x77] %v4785_v22 }
 0xc6f PF: > { %s27_s21 = sadd.s32 1, %s5908_s21  }
 0xc70   : > { %p24_p4 = scmp.ge.s32.totalorder %s27_s21, 4  }
 0xc72   :  { %26 = sbr.rel (!%p24_p4) target bundleno = 2 (0x2), region = 142 }

</bundles_post_ra>
